<compile_context>
chip_gen: v6e
topology: v6e:2x2x1
jax: 0.10.0
libtpu: 0.0.40
codegen_flags: <defaults>
</compile_context>

<pallas_src>
import functools

import jax
import jax.numpy as jnp
from jax.experimental import pallas as pl
from jax.experimental.pallas import tpu as pltpu

# MXU fast path on v5e/v6e/v7x; elementwise / statistics stay in f32.
MATMUL_DTYPE = jnp.bfloat16
LN_EPS = 1e-12


def _gelu_new(x):
    # ALBERT's "gelu_new" (tanh approximation), matching HF ACT2FN["gelu_new"]. f32 math.
    return 0.5 * x * (1.0 + jnp.tanh(0.7978845608028654 * (x + 0.044715 * x * x * x)))


# ----------------------------------------------------------------------------
# Tiling helpers (row tiles chosen as exact divisors of M -> no pad/slice copies)
# ----------------------------------------------------------------------------

def _row_tile(M):
    if M <= 512:
        return M
    for tm in (256, 512, 128):          # 256 fills the 2x256x256 MXU on v6e/v7x
        if M % tm == 0:
            return tm
    # TODO(synk): ragged M (> 512, not a 128-multiple): pad once in encoder_forward.
    return M


def _pick_inner_tile(I):
    if I <= 512:
        return I
    for cand in (512, 384, 256, 128):
        if I % cand == 0:
            return cand
    return I


def _pick_n_tile(K, N, max_bytes=8 << 20):
    """Lane tile for a (K, N) bf16 weight so the resident tile stays small."""
    if K * N * 2 <= max_bytes:
        return N
    for tn in (2048, 1024, 512, 256, 128):
        if N % tn == 0 and K * tn * 2 <= max_bytes:
            return tn
    return N


def _pick_head_group(num_heads, head_dim):
    """Smallest head group whose lane span is 128-aligned (lane-dense stores)."""
    for g in range(1, num_heads + 1):
        if num_heads % g == 0 and (g * head_dim) % 128 == 0:
            return g
    # TODO(synk): non-128-aligned head groups (uncommon ALBERT configs).
    return num_heads


def _pick_q_tile(S):
    if S <= 256:
        return S
    for tq in (256, 128):
        if S % tq == 0:
            return tq
    return S


def _vmem_limit(*byte_counts):
    """Scoped-VMEM request from block sizes (double-buffer + temps margin)."""
    need = 3 * sum(int(b) for b in byte_counts) + (2 << 20)
    return int(min(max(need, 32 << 20), 56 << 20))


# ----------------------------------------------------------------------------
# Kernel 1: fused linear  y = x @ W + b   (emb mapping and fused QKV)
# N-tiled so even ALBERT-xxlarge (H,3H) weights never need one resident block.
# ----------------------------------------------------------------------------

def _linear_kernel(x_ref, w_ref, b_ref, o_ref):
    x = x_ref[...].astype(MATMUL_DTYPE)
    y = jnp.dot(x, w_ref[...], preferred_element_type=jnp.float32) + b_ref[...]
    o_ref[...] = y.astype(o_ref.dtype)


def linear(x, w, b, out_dtype=jnp.float32):
    """x: (M, K), w: (K, N) bf16, b: (N,) f32 -> (M, N) out_dtype."""
    M, K = x.shape
    _, N = w.shape
    tm = _row_tile(M)
    tn = _pick_n_tile(K, N)
    out_isz = jnp.dtype(out_dtype).itemsize
    blk = tm * K * x.dtype.itemsize + K * tn * 2 + tn * 4 + tm * tn * out_isz
    return pl.pallas_call(
        _linear_kernel,
        out_shape=jax.ShapeDtypeStruct((M, N), out_dtype),
        grid_spec=pltpu.PrefetchScalarGridSpec(
            num_scalar_prefetch=0,
            grid=(M // tm, N // tn),
            in_specs=[
                pl.BlockSpec((tm, K), lambda i, j: (i, 0)),
                pl.BlockSpec((K, tn), lambda i, j: (0, j)),
                pl.BlockSpec((1, tn), lambda i, j: (0, j)),
            ],
            out_specs=pl.BlockSpec((tm, tn), lambda i, j: (i, j)),
        ),
        compiler_params=pltpu.CompilerParams(
            dimension_semantics=("parallel", "parallel"),
            vmem_limit_bytes=_vmem_limit(blk)),
        cost_estimate=pl.CostEstimate(
            flops=2 * M * K * N, transcendentals=0,
            bytes_accessed=int(M * K * x.dtype.itemsize + M * N * out_isz + 2 * K * N)),
    )(x, w, b.reshape(1, N))


# ----------------------------------------------------------------------------
# Kernel 2: linear + residual add + LayerNorm epilogue  (attention output proj)
# ----------------------------------------------------------------------------

def _linear_add_ln_kernel(x_ref, w_ref, b_ref, r_ref, g_ref, bb_ref, o_ref, *, eps):
    x = x_ref[...].astype(MATMUL_DTYPE)          # ctx slab arrives bf16 -> no-op cast
    y = jnp.dot(x, w_ref[...], preferred_element_type=jnp.float32) + b_ref[...]
    h = y + r_ref[...]                           # residual add (f32)
    mu = jnp.mean(h, axis=-1, keepdims=True)
    d = h - mu
    var = jnp.mean(d * d, axis=-1, keepdims=True)
    inv = jax.lax.rsqrt(var + eps)
    o_ref[...] = (d * inv * g_ref[...] + bb_ref[...]).astype(o_ref.dtype)


def linear_add_layernorm(x, w, b, resid, gamma, beta, eps=LN_EPS):
    """LayerNorm(resid + x @ w + b). x: (M, H) bf16, resid: (M, H) f32 -> (M, H) f32."""
    M, K = x.shape
    _, N = w.shape
    tm = _row_tile(M)
    # TODO(synk): for ALBERT-xxlarge (H=4096) on v7x, K-tile this weight with an f32
    # VMEM accumulator (mirror _ffn_kernel) instead of one (K, N) resident block.
    blk = tm * K * x.dtype.itemsize + K * N * 2 + 3 * N * 4 + 2 * tm * N * 4
    return pl.pallas_call(
        functools.partial(_linear_add_ln_kernel, eps=eps),
        out_shape=jax.ShapeDtypeStruct((M, N), jnp.float32),
        grid_spec=pltpu.PrefetchScalarGridSpec(
            num_scalar_prefetch=0,
            grid=(M // tm,),
            in_specs=[
                pl.BlockSpec((tm, K), lambda i: (i, 0)),
                pl.BlockSpec((K, N), lambda i: (0, 0)),
                pl.BlockSpec((1, N), lambda i: (0, 0)),
                pl.BlockSpec((tm, N), lambda i: (i, 0)),
                pl.BlockSpec((1, N), lambda i: (0, 0)),
                pl.BlockSpec((1, N), lambda i: (0, 0)),
            ],
            out_specs=pl.BlockSpec((tm, N), lambda i: (i, 0)),
        ),
        compiler_params=pltpu.CompilerParams(
            dimension_semantics=("parallel",),
            vmem_limit_bytes=_vmem_limit(blk)),
        cost_estimate=pl.CostEstimate(
            flops=2 * M * K * N + 10 * M * N, transcendentals=0,
            bytes_accessed=int(M * K * x.dtype.itemsize + 2 * M * N * 4 + 2 * K * N)),
    )(x, w, b.reshape(1, N), resid, gamma.reshape(1, N), beta.reshape(1, N))


# ----------------------------------------------------------------------------
# Kernel 3: multi-head attention, grid = (batch, head_group, q_tile).
# The qkv slab is passed three times so each step DMAs only the bf16 lane slices
# it needs; 1/sqrt(hd) is pre-folded into the Q weights; softmax normalization is
# deferred to the (tq, hd) context; outputs are 128-lane-dense head-group slabs.
# ----------------------------------------------------------------------------

def _attention_kernel(mask_ref, q_ref, k_ref, v_ref, o_ref, *, heads_per_group, head_dim):
    mask = mask_ref[...]                                   # (1, S) additive, f32
    for h in range(heads_per_group):                       # static unroll inside group
        lo, hi = h * head_dim, (h + 1) * head_dim
        q = q_ref[:, lo:hi]                                # (tq, hd) bf16
        k = k_ref[:, lo:hi]                                # (S, hd) bf16
        v = v_ref[:, lo:hi]                                # (S, hd) bf16
        scores = jax.lax.dot_general(                      # (tq, S) = q @ k^T  (f32)
            q, k, (((1,), (1,)), ((), ())), preferred_element_type=jnp.float32)
        scores = scores + mask                             # scale already in q weights
        m = jnp.max(scores, axis=-1, keepdims=True)
        p = jnp.exp(scores - m)
        denom = jnp.sum(p, axis=-1, keepdims=True)
        ctx = jnp.dot(p.astype(MATMUL_DTYPE), v, preferred_element_type=jnp.float32)
        ctx = ctx * pl.reciprocal(denom, approx=True)      # deferred normalization (EUP)
        o_ref[:, lo:hi] = ctx.astype(o_ref.dtype)


def multihead_attention(ext_mask, qkv, B, S, num_heads, head_dim):
    """ext_mask: (B,1,1,S) additive; qkv: (B*S, 3H) bf16 -> (B*S, H) bf16 context."""
    H = num_heads * head_dim
    G = _pick_head_group(num_heads, head_dim)
    NG = num_heads // G
    Ghd = G * head_dim
    tq = _pick_q_tile(S)
    qkv3 = qkv.reshape(B, S, 3 * H)
    mask3 = ext_mask.reshape(B, 1, S).astype(jnp.float32)
    blk = S * 4 + 2 * tq * Ghd * 2 + 2 * S * Ghd * 2 + tq * S * 4   # + score temp
    out = pl.pallas_call(
        functools.partial(_attention_kernel, heads_per_group=G, head_dim=head_dim),
        out_shape=jax.ShapeDtypeStruct((B, S, H), MATMUL_DTYPE),
        grid_spec=pltpu.PrefetchScalarGridSpec(
            num_scalar_prefetch=0,
            grid=(B, NG, S // tq),
            in_specs=[
                pl.BlockSpec((None, 1, S), lambda b, g, qi: (b, 0, 0)),
                pl.BlockSpec((None, tq, Ghd), lambda b, g, qi: (b, qi, g)),
                pl.BlockSpec((None, S, Ghd), lambda b, g, qi: (b, 0, NG + g)),
                pl.BlockSpec((None, S, Ghd), lambda b, g, qi: (b, 0, 2 * NG + g)),
            ],
            out_specs=pl.BlockSpec((None, tq, Ghd), lambda b, g, qi: (b, qi, g)),
        ),
        compiler_params=pltpu.CompilerParams(
            dimension_semantics=("parallel", "parallel", "parallel"),
            vmem_limit_bytes=_vmem_limit(blk)),
        cost_estimate=pl.CostEstimate(
            flops=4 * B * num_heads * S * S * head_dim,
            transcendentals=B * num_heads * S * S,
            bytes_accessed=int(2 * B * S * 4 * H + 4 * B * S)),
    )(mask3, qkv3, qkv3, qkv3)
    return out.reshape(B * S, H)


# ----------------------------------------------------------------------------
# Kernel 4: fused FFN: LayerNorm(x + (gelu_new(x @ W1 + b1) @ W2 + b2)).
# The (tm, I) intermediate stays on-chip; I tiled along an "arbitrary" reduction
# axis with an f32 VMEM accumulator; the bf16 cast of the x tile is cached in a
# bf16 VMEM scratch at j==0 and reused for every I step.
# ----------------------------------------------------------------------------

def _ffn_kernel(x_ref, w1_ref, b1_ref, w2_ref, b2_ref, g_ref, bb_ref,
                o_ref, acc_ref, xbf_ref, *, eps):
    j = pl.program_id(1)

    @pl.when(j == 0)
    def _():
        acc_ref[...] = jnp.zeros_like(acc_ref)
        xbf_ref[...] = x_ref[...].astype(xbf_ref.dtype)    # cast once per row tile

    y1 = jnp.dot(xbf_ref[...], w1_ref[...],
                 preferred_element_type=jnp.float32) + b1_ref[...]
    y1 = _gelu_new(y1)                                     # f32 elementwise
    acc_ref[...] += jnp.dot(y1.astype(MATMUL_DTYPE), w2_ref[...],
                            preferred_element_type=jnp.float32)

    @pl.when(j == pl.num_programs(1) - 1)
    def _():
        h = acc_ref[...] + b2_ref[...] + x_ref[...]        # residual = FFN input (f32)
        mu = jnp.mean(h, axis=-1, keepdims=True)
        d = h - mu
        var = jnp.mean(d * d, axis=-1, keepdims=True)
        inv = jax.lax.rsqrt(var + eps)
        o_ref[...] = (d * inv * g_ref[...] + bb_ref[...]).astype(o_ref.dtype)


def ffn_fused(x, w1, b1, w2, b2, gamma, beta, eps=LN_EPS):
    """x: (M, H) f32; w1: (H, I); w2: (I, H) -> (M, H) f32."""
    M, H = x.shape
    _, I = w1.shape
    tm = _row_tile(M)
    ti = _pick_inner_tile(I)
    blk = tm * H * 4 + H * ti * 2 + ti * 4 + ti * H * 2 + 3 * H * 4 + tm * H * 4
    scratch = tm * H * 4 + tm * H * 2 + tm * ti * 4
    return pl.pallas_call(
        functools.partial(_ffn_kernel, eps=eps),
        out_shape=jax.ShapeDtypeStruct((M, H), jnp.float32),
        grid_spec=pltpu.PrefetchScalarGridSpec(
            num_scalar_prefetch=0,
            grid=(M // tm, I // ti),
            in_specs=[
                pl.BlockSpec((tm, H), lambda i, j: (i, 0)),
                pl.BlockSpec((H, ti), lambda i, j: (0, j)),
                pl.BlockSpec((1, ti), lambda i, j: (0, j)),
                pl.BlockSpec((ti, H), lambda i, j: (j, 0)),
                pl.BlockSpec((1, H), lambda i, j: (0, 0)),
                pl.BlockSpec((1, H), lambda i, j: (0, 0)),
                pl.BlockSpec((1, H), lambda i, j: (0, 0)),
            ],
            out_specs=pl.BlockSpec((tm, H), lambda i, j: (i, 0)),
            scratch_shapes=[pltpu.VMEM((tm, H), jnp.float32),
                            pltpu.VMEM((tm, H), MATMUL_DTYPE)],
        ),
        compiler_params=pltpu.CompilerParams(
            dimension_semantics=("parallel", "arbitrary"),
            vmem_limit_bytes=_vmem_limit(blk, scratch)),
        cost_estimate=pl.CostEstimate(
            flops=4 * M * H * I, transcendentals=M * I,
            bytes_accessed=int(8 * M * H + 4 * H * I)),
    )(x, w1, b1.reshape(1, I), w2, b2.reshape(1, H),
      gamma.reshape(1, H), beta.reshape(1, H))


# ----------------------------------------------------------------------------
# ALBERT encoder glue (pure reshapes in JAX; no XLA transposes)
# ----------------------------------------------------------------------------

def albert_layer(x2d, ext_mask, p, B, S, NH, HD):
    qkv = linear(x2d, p["qkv_w"], p["qkv_b"], out_dtype=MATMUL_DTYPE)   # (M, 3H) bf16
    ctx = multihead_attention(ext_mask, qkv, B, S, NH, HD)              # (M, H) bf16
    attn_out = linear_add_layernorm(ctx, p["o_w"], p["o_b"], x2d,
                                    p["ln1_g"], p["ln1_b"])             # (M, H) f32
    return ffn_fused(attn_out, p["ffn_w"], p["ffn_b"],
                     p["ffn_out_w"], p["ffn_out_b"],
                     p["ln2_g"], p["ln2_b"])                            # (M, H) f32


def prepare_params(params, num_heads):
    """One-time weight prep (NOT inside the jit'd forward): fold the softmax scale
    into q_w/q_b, fuse Q/K/V into one (H, 3H) weight, cast matmul weights to bf16."""
    H = params["q_w"].shape[0]
    scale = 1.0 / float(H // num_heads) ** 0.5
    q_w = params["q_w"] * scale
    q_b = params["q_b"] * scale
    return {
        "emb_w": params["emb_w"].astype(MATMUL_DTYPE), "emb_b": params["emb_b"],
        "qkv_w": jnp.concatenate([q_w, params["k_w"], params["v_w"]],
                                 axis=1).astype(MATMUL_DTYPE),
        "qkv_b": jnp.concatenate([q_b, params["k_b"], params["v_b"]]),
        "o_w": params["o_w"].astype(MATMUL_DTYPE), "o_b": params["o_b"],
        "ln1_g": params["ln1_g"], "ln1_b": params["ln1_b"],
        "ffn_w": params["ffn_w"].astype(MATMUL_DTYPE), "ffn_b": params["ffn_b"],
        "ffn_out_w": params["ffn_out_w"].astype(MATMUL_DTYPE),
        "ffn_out_b": params["ffn_out_b"],
        "ln2_g": params["ln2_g"], "ln2_b": params["ln2_b"],
    }


@functools.partial(jax.jit, static_argnames=("num_layers", "num_heads"))
def encoder_forward(embedding_output, extended_attention_mask, wp,
                    num_layers, num_heads):
    B, S, E = embedding_output.shape
    H = wp["o_w"].shape[0]
    HD = H // num_heads

    # embedding_hidden_mapping_in
    x = linear(embedding_output.reshape(B * S, E), wp["emb_w"], wp["emb_b"])

    # ALBERT shares the single AlbertLayer across all num_hidden_layers.
    for _ in range(num_layers):
        x = albert_layer(x, extended_attention_mask, wp, B, S, num_heads, HD)
    return x.reshape(B, S, H)


def init_params(key, E, H, I, scale=0.02):
    keys = jax.random.split(key, 8)
    w = lambda k, shape: scale * jax.random.normal(k, shape, dtype=jnp.float32)
    z = lambda n: jnp.zeros((n,), jnp.float32)
    o = lambda n: jnp.ones((n,), jnp.float32)
    return {
        # weights stored (in, out) == PyTorch Linear weight transposed
        "emb_w": w(keys[0], (E, H)), "emb_b": z(H),
        "q_w": w(keys[1], (H, H)), "q_b": z(H),
        "k_w": w(keys[2], (H, H)), "k_b": z(H),
        "v_w": w(keys[3], (H, H)), "v_b": z(H),
        "o_w": w(keys[4], (H, H)), "o_b": z(H),
        "ln1_g": o(H), "ln1_b": z(H),
        "ffn_w": w(keys[5], (H, I)), "ffn_b": z(I),
        "ffn_out_w": w(keys[6], (I, H)), "ffn_out_b": z(H),
        "ln2_g": o(H), "ln2_b": z(H),
    }


if __name__ == "__main__":
    # Small ALBERT-like config: batch=2, seq=8, emb=32, hidden=128, heads=4,
    # intermediate=512, 2 (weight-shared) layers. hidden=128 keeps output lanes dense.
    B, S, E, H, NH, I, L = 2, 8, 32, 128, 4, 512, 2

    key = jax.random.PRNGKey(0)
    k_emb, k_params = jax.random.split(key, 2)

    embedding_output = jax.random.normal(k_emb, (B, S, E), dtype=jnp.float32)
    # HF-style extended attention mask: 0 for visible, -10000 for masked,
    # shape (B, 1, 1, S). Mask the last 2 positions of the second sequence.
    attn = jnp.ones((B, S), jnp.float32).at[1, -2:].set(0.0)
    extended_attention_mask = ((1.0 - attn) * -10000.0).reshape(B, 1, 1, S)

    params = init_params(k_params, E, H, I)
    wp = prepare_params(params, num_heads=NH)   # one-time: scale fold, QKV fuse, bf16

    out = encoder_forward(embedding_output, extended_attention_mask, wp,
                          num_layers=L, num_heads=NH)
    jax.block_until_ready(out)
    assert out.shape == (B, S, H) and out.dtype == jnp.float32
    assert bool(jnp.all(jnp.isfinite(out)))
    print("KERNEL_OK")
</pallas_src>

<mosaic_0001>
module attributes {stable_mosaic.version = 11 : i64} {
  func.func @_linear_kernel(%arg0: i32, %arg1: i32, %arg2: memref<16x128xf32, #tpu.memory_space<vmem>>, %arg3: memref<128x384xbf16, #tpu.memory_space<vmem>>, %arg4: memref<1x384xf32, #tpu.memory_space<vmem>>, %arg5: memref<16x384xbf16, #tpu.memory_space<vmem>>) attributes {dimension_semantics = [#tpu.dimension_semantics<parallel>, #tpu.dimension_semantics<parallel>], iteration_bounds = array<i64: 1, 1>, scalar_prefetch = 0 : i64, scratch_operands = 0 : i64, tpu.core_type = #tpu.core_type<tc>, window_params = [{transform_indices = @transform_0, window_bounds = array<i64: 16, 128>}, {transform_indices = @transform_1, window_bounds = array<i64: 128, 384>}, {transform_indices = @transform_2, window_bounds = array<i64: 1, 384>}, {transform_indices = @transform_3, window_bounds = array<i64: 16, 384>}]} {
    %c0 = arith.constant 0 : index
    %c0_0 = arith.constant 0 : index
    %0 = vector.load %arg2[%c0, %c0_0] : memref<16x128xf32, #tpu.memory_space<vmem>>, vector<16x128xf32>
    %1 = arith.truncf %0 : vector<16x128xf32> to vector<16x128xbf16>
    %c0_1 = arith.constant 0 : index
    %c0_2 = arith.constant 0 : index
    %2 = vector.load %arg3[%c0_1, %c0_2] : memref<128x384xbf16, #tpu.memory_space<vmem>>, vector<128x384xbf16>
    %cst = arith.constant dense<0.000000e+00> : vector<16x384xf32>
    %3 = tpu.matmul %1, %2, %cst {dimension_numbers = #tpu.dot_dimension_numbers<[1], [0], [0], [1], [0, 0, 1, 1], [], []>} : vector<16x128xbf16>, vector<128x384xbf16>, vector<16x384xf32> -> vector<16x384xf32>
    %c0_3 = arith.constant 0 : index
    %c0_4 = arith.constant 0 : index
    %4 = vector.load %arg4[%c0_3, %c0_4] : memref<1x384xf32, #tpu.memory_space<vmem>>, vector<1x384xf32>
    %5 = vector.broadcast %4 : vector<1x384xf32> to vector<16x384xf32>
    %6 = arith.addf %3, %5 : vector<16x384xf32>
    %7 = arith.truncf %6 : vector<16x384xf32> to vector<16x384xbf16>
    %c0_5 = arith.constant 0 : index
    %c0_6 = arith.constant 0 : index
    %8 = vector.load %arg5[%c0_5, %c0_6] : memref<16x384xbf16, #tpu.memory_space<vmem>>, vector<16x384xbf16>
    tpu.vector_store %arg5[%c0_5, %c0_6], %7 {strides = array<i32>} : memref<16x384xbf16, #tpu.memory_space<vmem>>, vector<16x384xbf16>,
    return
  }
  func.func @transform_0(%arg0: i32, %arg1: i32) -> (i32, i32) {
    %c0_i32 = arith.constant 0 : i32
    %c0_i32_0 = arith.constant 0 : i32
    return %arg0, %c0_i32 : i32, i32
  }
  func.func @transform_1(%arg0: i32, %arg1: i32) -> (i32, i32) {
    %c0_i32 = arith.constant 0 : i32
    %c0_i32_0 = arith.constant 0 : i32
    return %c0_i32, %arg1 : i32, i32
  }
  func.func @transform_2(%arg0: i32, %arg1: i32) -> (i32, i32) {
    %c0_i32 = arith.constant 0 : i32
    %c0_i32_0 = arith.constant 0 : i32
    return %c0_i32, %arg1 : i32, i32
  }
  func.func @transform_3(%arg0: i32, %arg1: i32) -> (i32, i32) {
    %c0_i32 = arith.constant 0 : i32
    return %arg0, %arg1 : i32, i32
  }
}

module attributes {stable_mosaic.version = 11 : i64} {
  func.func @_linear_kernel(%arg0: i32, %arg1: i32, %arg2: memref<16x32xf32, #tpu.memory_space<vmem>>, %arg3: memref<32x128xbf16, #tpu.memory_space<vmem>>, %arg4: memref<1x128xf32, #tpu.memory_space<vmem>>, %arg5: memref<16x128xf32, #tpu.memory_space<vmem>>) attributes {dimension_semantics = [#tpu.dimension_semantics<parallel>, #tpu.dimension_semantics<parallel>], iteration_bounds = array<i64: 1, 1>, scalar_prefetch = 0 : i64, scratch_operands = 0 : i64, tpu.core_type = #tpu.core_type<tc>, window_params = [{transform_indices = @transform_0, window_bounds = array<i64: 16, 32>}, {transform_indices = @transform_1, window_bounds = array<i64: 32, 128>}, {transform_indices = @transform_2, window_bounds = array<i64: 1, 128>}, {transform_indices = @transform_3, window_bounds = array<i64: 16, 128>}]} {
    %c0 = arith.constant 0 : index
    %c0_0 = arith.constant 0 : index
    %0 = vector.load %arg2[%c0, %c0_0] : memref<16x32xf32, #tpu.memory_space<vmem>>, vector<16x32xf32>
    %1 = arith.truncf %0 : vector<16x32xf32> to vector<16x32xbf16>
    %c0_1 = arith.constant 0 : index
    %c0_2 = arith.constant 0 : index
    %2 = vector.load %arg3[%c0_1, %c0_2] : memref<32x128xbf16, #tpu.memory_space<vmem>>, vector<32x128xbf16>
    %cst = arith.constant dense<0.000000e+00> : vector<16x128xf32>
    %3 = tpu.matmul %1, %2, %cst {dimension_numbers = #tpu.dot_dimension_numbers<[1], [0], [0], [1], [0, 0, 1, 1], [], []>} : vector<16x32xbf16>, vector<32x128xbf16>, vector<16x128xf32> -> vector<16x128xf32>
    %c0_3 = arith.constant 0 : index
    %c0_4 = arith.constant 0 : index
    %4 = vector.load %arg4[%c0_3, %c0_4] : memref<1x128xf32, #tpu.memory_space<vmem>>, vector<1x128xf32>
    %5 = vector.broadcast %4 : vector<1x128xf32> to vector<16x128xf32>
    %6 = arith.addf %3, %5 : vector<16x128xf32>
    %c0_5 = arith.constant 0 : index
    %c0_6 = arith.constant 0 : index
    %7 = vector.load %arg5[%c0_5, %c0_6] : memref<16x128xf32, #tpu.memory_space<vmem>>, vector<16x128xf32>
    tpu.vector_store %arg5[%c0_5, %c0_6], %6 {strides = array<i32>} : memref<16x128xf32, #tpu.memory_space<vmem>>, vector<16x128xf32>,
    return
  }
  func.func @transform_0(%arg0: i32, %arg1: i32) -> (i32, i32) {
    %c0_i32 = arith.constant 0 : i32
    %c0_i32_0 = arith.constant 0 : i32
    return %arg0, %c0_i32 : i32, i32
  }
  func.func @transform_1(%arg0: i32, %arg1: i32) -> (i32, i32) {
    %c0_i32 = arith.constant 0 : i32
    %c0_i32_0 = arith.constant 0 : i32
    return %c0_i32, %arg1 : i32, i32
  }
  func.func @transform_2(%arg0: i32, %arg1: i32) -> (i32, i32) {
    %c0_i32 = arith.constant 0 : i32
    %c0_i32_0 = arith.constant 0 : i32
    return %c0_i32, %arg1 : i32, i32
  }
  func.func @transform_3(%arg0: i32, %arg1: i32) -> (i32, i32) {
    %c0_i32 = arith.constant 0 : i32
    return %arg0, %arg1 : i32, i32
  }
}

module attributes {stable_mosaic.version = 11 : i64} {
  func.func @_attention_kernel(%arg0: i32, %arg1: i32, %arg2: i32, %arg3: memref<1x1x8xf32, #tpu.memory_space<vmem>>, %arg4: memref<1x8x128xbf16, #tpu.memory_space<vmem>>, %arg5: memref<1x8x128xbf16, #tpu.memory_space<vmem>>, %arg6: memref<1x8x128xbf16, #tpu.memory_space<vmem>>, %arg7: memref<1x8x128xbf16, #tpu.memory_space<vmem>>) attributes {dimension_semantics = [#tpu.dimension_semantics<parallel>, #tpu.dimension_semantics<parallel>, #tpu.dimension_semantics<parallel>], iteration_bounds = array<i64: 2, 1, 1>, scalar_prefetch = 0 : i64, scratch_operands = 0 : i64, tpu.core_type = #tpu.core_type<tc>, window_params = [{transform_indices = @transform_0, window_bounds = array<i64: 1, 1, 8>}, {transform_indices = @transform_1, window_bounds = array<i64: 1, 8, 128>}, {transform_indices = @transform_2, window_bounds = array<i64: 1, 8, 128>}, {transform_indices = @transform_3, window_bounds = array<i64: 1, 8, 128>}, {transform_indices = @transform_4, window_bounds = array<i64: 1, 8, 128>}]} {
    %c0 = arith.constant 0 : index
    %c0_0 = arith.constant 0 : index
    %c0_1 = arith.constant 0 : index
    %0 = vector.load %arg3[%c0, %c0_0, %c0_1] : memref<1x1x8xf32, #tpu.memory_space<vmem>>, vector<1x1x8xf32>
    %1 = vector.shape_cast %0 : vector<1x1x8xf32> to vector<1x8xf32>
    %c0_2 = arith.constant 0 : index
    %c0_3 = arith.constant 0 : index
    %c0_4 = arith.constant 0 : index
    %2 = vector.load %arg4[%c0_2, %c0_3, %c0_4] : memref<1x8x128xbf16, #tpu.memory_space<vmem>>, vector<1x8x32xbf16>
    %3 = vector.shape_cast %2 : vector<1x8x32xbf16> to vector<8x32xbf16>
    %c0_5 = arith.constant 0 : index
    %c0_6 = arith.constant 0 : index
    %c0_7 = arith.constant 0 : index
    %4 = vector.load %arg5[%c0_5, %c0_6, %c0_7] : memref<1x8x128xbf16, #tpu.memory_space<vmem>>, vector<1x8x32xbf16>
    %5 = vector.shape_cast %4 : vector<1x8x32xbf16> to vector<8x32xbf16>
    %c0_8 = arith.constant 0 : index
    %c0_9 = arith.constant 0 : index
    %c0_10 = arith.constant 0 : index
    %6 = vector.load %arg6[%c0_8, %c0_9, %c0_10] : memref<1x8x128xbf16, #tpu.memory_space<vmem>>, vector<1x8x32xbf16>
    %7 = vector.shape_cast %6 : vector<1x8x32xbf16> to vector<8x32xbf16>
    %cst = arith.constant dense<0.000000e+00> : vector<8x8xf32>
    %8 = tpu.matmul %3, %5, %cst {dimension_numbers = #tpu.dot_dimension_numbers<[1], [1], [0], [0], [0, 0, 1, 0], [], []>} : vector<8x32xbf16>, vector<8x32xbf16>, vector<8x8xf32> -> vector<8x8xf32>
    %9 = vector.broadcast %1 : vector<1x8xf32> to vector<8x8xf32>
    %10 = arith.addf %8, %9 : vector<8x8xf32>
    %cst_11 = arith.constant dense<0xFF800000> : vector<8xf32>
    %11 = vector.multi_reduction <maximumf>, %10, %cst_11 [1] : vector<8x8xf32> to vector<8xf32>
    %12 = vector.shape_cast %11 : vector<8xf32> to vector<8x1xf32>
    %13 = vector.broadcast %12 : vector<8x1xf32> to vector<8x8xf32>
    %14 = arith.subf %10, %13 : vector<8x8xf32>
    %15 = math.exp %14 : vector<8x8xf32>
    %cst_12 = arith.constant dense<0.000000e+00> : vector<8xf32>
    %16 = vector.multi_reduction <add>, %15, %cst_12 [1] : vector<8x8xf32> to vector<8xf32>
    %17 = vector.shape_cast %16 : vector<8xf32> to vector<8x1xf32>
    %18 = arith.truncf %15 : vector<8x8xf32> to vector<8x8xbf16>
    %cst_13 = arith.constant dense<0.000000e+00> : vector<8x32xf32>
    %19 = tpu.matmul %18, %7, %cst_13 {dimension_numbers = #tpu.dot_dimension_numbers<[1], [0], [0], [1], [0, 0, 1, 1], [], []>} : vector<8x8xbf16>, vector<8x32xbf16>, vector<8x32xf32> -> vector<8x32xf32>
    %20 = tpu.reciprocal %17 {approx = true} : vector<8x1xf32> -> vector<8x1xf32>
    %21 = vector.broadcast %20 : vector<8x1xf32> to vector<8x32xf32>
    %22 = arith.mulf %19, %21 : vector<8x32xf32>
    %23 = arith.truncf %22 : vector<8x32xf32> to vector<8x32xbf16>
    %c0_14 = arith.constant 0 : index
    %c0_15 = arith.constant 0 : index
    %c0_16 = arith.constant 0 : index
    %24 = vector.load %arg7[%c0_14, %c0_15, %c0_16] : memref<1x8x128xbf16, #tpu.memory_space<vmem>>, vector<1x8x32xbf16>
    %25 = vector.shape_cast %24 : vector<1x8x32xbf16> to vector<8x32xbf16>
    %26 = vector.shape_cast %23 : vector<8x32xbf16> to vector<1x8x32xbf16>
    tpu.vector_store %arg7[%c0_14, %c0_15, %c0_16], %26 {strides = array<i32>} : memref<1x8x128xbf16, #tpu.memory_space<vmem>>, vector<1x8x32xbf16>,
    %c0_17 = arith.constant 0 : index
    %c0_18 = arith.constant 0 : index
    %c32 = arith.constant 32 : index
    %27 = vector.load %arg4[%c0_17, %c0_18, %c32] : memref<1x8x128xbf16, #tpu.memory_space<vmem>>, vector<1x8x32xbf16>
    %28 = vector.shape_cast %27 : vector<1x8x32xbf16> to vector<8x32xbf16>
    %c0_19 = arith.constant 0 : index
    %c0_20 = arith.constant 0 : index
    %c32_21 = arith.constant 32 : index
    %29 = vector.load %arg5[%c0_19, %c0_20, %c32_21] : memref<1x8x128xbf16, #tpu.memory_space<vmem>>, vector<1x8x32xbf16>
    %30 = vector.shape_cast %29 : vector<1x8x32xbf16> to vector<8x32xbf16>
    %c0_22 = arith.constant 0 : index
    %c0_23 = arith.constant 0 : index
    %c32_24 = arith.constant 32 : index
    %31 = vector.load %arg6[%c0_22, %c0_23, %c32_24] : memref<1x8x128xbf16, #tpu.memory_space<vmem>>, vector<1x8x32xbf16>
    %32 = vector.shape_cast %31 : vector<1x8x32xbf16> to vector<8x32xbf16>
    %cst_25 = arith.constant dense<0.000000e+00> : vector<8x8xf32>
    %33 = tpu.matmul %28, %30, %cst_25 {dimension_numbers = #tpu.dot_dimension_numbers<[1], [1], [0], [0], [0, 0, 1, 0], [], []>} : vector<8x32xbf16>, vector<8x32xbf16>, vector<8x8xf32> -> vector<8x8xf32>
    %34 = vector.broadcast %1 : vector<1x8xf32> to vector<8x8xf32>
    %35 = arith.addf %33, %34 : vector<8x8xf32>
    %cst_26 = arith.constant dense<0xFF800000> : vector<8xf32>
    %36 = vector.multi_reduction <maximumf>, %35, %cst_26 [1] : vector<8x8xf32> to vector<8xf32>
    %37 = vector.shape_cast %36 : vector<8xf32> to vector<8x1xf32>
    %38 = vector.broadcast %37 : vector<8x1xf32> to vector<8x8xf32>
    %39 = arith.subf %35, %38 : vector<8x8xf32>
    %40 = math.exp %39 : vector<8x8xf32>
    %cst_27 = arith.constant dense<0.000000e+00> : vector<8xf32>
    %41 = vector.multi_reduction <add>, %40, %cst_27 [1] : vector<8x8xf32> to vector<8xf32>
    %42 = vector.shape_cast %41 : vector<8xf32> to vector<8x1xf32>
    %43 = arith.truncf %40 : vector<8x8xf32> to vector<8x8xbf16>
    %cst_28 = arith.constant dense<0.000000e+00> : vector<8x32xf32>
    %44 = tpu.matmul %43, %32, %cst_28 {dimension_numbers = #tpu.dot_dimension_numbers<[1], [0], [0], [1], [0, 0, 1, 1], [], []>} : vector<8x8xbf16>, vector<8x32xbf16>, vector<8x32xf32> -> vector<8x32xf32>
    %45 = tpu.reciprocal %42 {approx = true} : vector<8x1xf32> -> vector<8x1xf32>
    %46 = vector.broadcast %45 : vector<8x1xf32> to vector<8x32xf32>
    %47 = arith.mulf %44, %46 : vector<8x32xf32>
    %48 = arith.truncf %47 : vector<8x32xf32> to vector<8x32xbf16>
    %c0_29 = arith.constant 0 : index
    %c0_30 = arith.constant 0 : index
    %c32_31 = arith.constant 32 : index
    %49 = vector.load %arg7[%c0_29, %c0_30, %c32_31] : memref<1x8x128xbf16, #tpu.memory_space<vmem>>, vector<1x8x32xbf16>
    %50 = vector.shape_cast %49 : vector<1x8x32xbf16> to vector<8x32xbf16>
    %51 = vector.shape_cast %48 : vector<8x32xbf16> to vector<1x8x32xbf16>
    tpu.vector_store %arg7[%c0_29, %c0_30, %c32_31], %51 {strides = array<i32>} : memref<1x8x128xbf16, #tpu.memory_space<vmem>>, vector<1x8x32xbf16>,
    %c0_32 = arith.constant 0 : index
    %c0_33 = arith.constant 0 : index
    %c64 = arith.constant 64 : index
    %52 = vector.load %arg4[%c0_32, %c0_33, %c64] : memref<1x8x128xbf16, #tpu.memory_space<vmem>>, vector<1x8x32xbf16>
    %53 = vector.shape_cast %52 : vector<1x8x32xbf16> to vector<8x32xbf16>
    %c0_34 = arith.constant 0 : index
    %c0_35 = arith.constant 0 : index
    %c64_36 = arith.constant 64 : index
    %54 = vector.load %arg5[%c0_34, %c0_35, %c64_36] : memref<1x8x128xbf16, #tpu.memory_space<vmem>>, vector<1x8x32xbf16>
    %55 = vector.shape_cast %54 : vector<1x8x32xbf16> to vector<8x32xbf16>
    %c0_37 = arith.constant 0 : index
    %c0_38 = arith.constant 0 : index
    %c64_39 = arith.constant 64 : index
    %56 = vector.load %arg6[%c0_37, %c0_38, %c64_39] : memref<1x8x128xbf16, #tpu.memory_space<vmem>>, vector<1x8x32xbf16>
    %57 = vector.shape_cast %56 : vector<1x8x32xbf16> to vector<8x32xbf16>
    %cst_40 = arith.constant dense<0.000000e+00> : vector<8x8xf32>
    %58 = tpu.matmul %53, %55, %cst_40 {dimension_numbers = #tpu.dot_dimension_numbers<[1], [1], [0], [0], [0, 0, 1, 0], [], []>} : vector<8x32xbf16>, vector<8x32xbf16>, vector<8x8xf32> -> vector<8x8xf32>
    %59 = vector.broadcast %1 : vector<1x8xf32> to vector<8x8xf32>
    %60 = arith.addf %58, %59 : vector<8x8xf32>
    %cst_41 = arith.constant dense<0xFF800000> : vector<8xf32>
    %61 = vector.multi_reduction <maximumf>, %60, %cst_41 [1] : vector<8x8xf32> to vector<8xf32>
    %62 = vector.shape_cast %61 : vector<8xf32> to vector<8x1xf32>
    %63 = vector.broadcast %62 : vector<8x1xf32> to vector<8x8xf32>
    %64 = arith.subf %60, %63 : vector<8x8xf32>
    %65 = math.exp %64 : vector<8x8xf32>
    %cst_42 = arith.constant dense<0.000000e+00> : vector<8xf32>
    %66 = vector.multi_reduction <add>, %65, %cst_42 [1] : vector<8x8xf32> to vector<8xf32>
    %67 = vector.shape_cast %66 : vector<8xf32> to vector<8x1xf32>
    %68 = arith.truncf %65 : vector<8x8xf32> to vector<8x8xbf16>
    %cst_43 = arith.constant dense<0.000000e+00> : vector<8x32xf32>
    %69 = tpu.matmul %68, %57, %cst_43 {dimension_numbers = #tpu.dot_dimension_numbers<[1], [0], [0], [1], [0, 0, 1, 1], [], []>} : vector<8x8xbf16>, vector<8x32xbf16>, vector<8x32xf32> -> vector<8x32xf32>
    %70 = tpu.reciprocal %67 {approx = true} : vector<8x1xf32> -> vector<8x1xf32>
    %71 = vector.broadcast %70 : vector<8x1xf32> to vector<8x32xf32>
    %72 = arith.mulf %69, %71 : vector<8x32xf32>
    %73 = arith.truncf %72 : vector<8x32xf32> to vector<8x32xbf16>
    %c0_44 = arith.constant 0 : index
    %c0_45 = arith.constant 0 : index
    %c64_46 = arith.constant 64 : index
    %74 = vector.load %arg7[%c0_44, %c0_45, %c64_46] : memref<1x8x128xbf16, #tpu.memory_space<vmem>>, vector<1x8x32xbf16>
    %75 = vector.shape_cast %74 : vector<1x8x32xbf16> to vector<8x32xbf16>
    %76 = vector.shape_cast %73 : vector<8x32xbf16> to vector<1x8x32xbf16>
    tpu.vector_store %arg7[%c0_44, %c0_45, %c64_46], %76 {strides = array<i32>} : memref<1x8x128xbf16, #tpu.memory_space<vmem>>, vector<1x8x32xbf16>,
    %c0_47 = arith.constant 0 : index
    %c0_48 = arith.constant 0 : index
    %c96 = arith.constant 96 : index
    %77 = vector.load %arg4[%c0_47, %c0_48, %c96] : memref<1x8x128xbf16, #tpu.memory_space<vmem>>, vector<1x8x32xbf16>
    %78 = vector.shape_cast %77 : vector<1x8x32xbf16> to vector<8x32xbf16>
    %c0_49 = arith.constant 0 : index
    %c0_50 = arith.constant 0 : index
    %c96_51 = arith.constant 96 : index
    %79 = vector.load %arg5[%c0_49, %c0_50, %c96_51] : memref<1x8x128xbf16, #tpu.memory_space<vmem>>, vector<1x8x32xbf16>
    %80 = vector.shape_cast %79 : vector<1x8x32xbf16> to vector<8x32xbf16>
    %c0_52 = arith.constant 0 : index
    %c0_53 = arith.constant 0 : index
    %c96_54 = arith.constant 96 : index
    %81 = vector.load %arg6[%c0_52, %c0_53, %c96_54] : memref<1x8x128xbf16, #tpu.memory_space<vmem>>, vector<1x8x32xbf16>
    %82 = vector.shape_cast %81 : vector<1x8x32xbf16> to vector<8x32xbf16>
    %cst_55 = arith.constant dense<0.000000e+00> : vector<8x8xf32>
    %83 = tpu.matmul %78, %80, %cst_55 {dimension_numbers = #tpu.dot_dimension_numbers<[1], [1], [0], [0], [0, 0, 1, 0], [], []>} : vector<8x32xbf16>, vector<8x32xbf16>, vector<8x8xf32> -> vector<8x8xf32>
    %84 = vector.broadcast %1 : vector<1x8xf32> to vector<8x8xf32>
    %85 = arith.addf %83, %84 : vector<8x8xf32>
    %cst_56 = arith.constant dense<0xFF800000> : vector<8xf32>
    %86 = vector.multi_reduction <maximumf>, %85, %cst_56 [1] : vector<8x8xf32> to vector<8xf32>
    %87 = vector.shape_cast %86 : vector<8xf32> to vector<8x1xf32>
    %88 = vector.broadcast %87 : vector<8x1xf32> to vector<8x8xf32>
    %89 = arith.subf %85, %88 : vector<8x8xf32>
    %90 = math.exp %89 : vector<8x8xf32>
    %cst_57 = arith.constant dense<0.000000e+00> : vector<8xf32>
    %91 = vector.multi_reduction <add>, %90, %cst_57 [1] : vector<8x8xf32> to vector<8xf32>
    %92 = vector.shape_cast %91 : vector<8xf32> to vector<8x1xf32>
    %93 = arith.truncf %90 : vector<8x8xf32> to vector<8x8xbf16>
    %cst_58 = arith.constant dense<0.000000e+00> : vector<8x32xf32>
    %94 = tpu.matmul %93, %82, %cst_58 {dimension_numbers = #tpu.dot_dimension_numbers<[1], [0], [0], [1], [0, 0, 1, 1], [], []>} : vector<8x8xbf16>, vector<8x32xbf16>, vector<8x32xf32> -> vector<8x32xf32>
    %95 = tpu.reciprocal %92 {approx = true} : vector<8x1xf32> -> vector<8x1xf32>
    %96 = vector.broadcast %95 : vector<8x1xf32> to vector<8x32xf32>
    %97 = arith.mulf %94, %96 : vector<8x32xf32>
    %98 = arith.truncf %97 : vector<8x32xf32> to vector<8x32xbf16>
    %c0_59 = arith.constant 0 : index
    %c0_60 = arith.constant 0 : index
    %c96_61 = arith.constant 96 : index
    %99 = vector.load %arg7[%c0_59, %c0_60, %c96_61] : memref<1x8x128xbf16, #tpu.memory_space<vmem>>, vector<1x8x32xbf16>
    %100 = vector.shape_cast %99 : vector<1x8x32xbf16> to vector<8x32xbf16>
    %101 = vector.shape_cast %98 : vector<8x32xbf16> to vector<1x8x32xbf16>
    tpu.vector_store %arg7[%c0_59, %c0_60, %c96_61], %101 {strides = array<i32>} : memref<1x8x128xbf16, #tpu.memory_space<vmem>>, vector<1x8x32xbf16>,
    return
  }
  func.func @transform_0(%arg0: i32, %arg1: i32, %arg2: i32) -> (i32, i32, i32) {
    %c0_i32 = arith.constant 0 : i32
    %c0_i32_0 = arith.constant 0 : i32
    %c0_i32_1 = arith.constant 0 : i32
    return %arg0, %c0_i32, %c0_i32_0 : i32, i32, i32
  }
  func.func @transform_1(%arg0: i32, %arg1: i32, %arg2: i32) -> (i32, i32, i32) {
    %c0_i32 = arith.constant 0 : i32
    return %arg0, %arg2, %arg1 : i32, i32, i32
  }
  func.func @transform_2(%arg0: i32, %arg1: i32, %arg2: i32) -> (i32, i32, i32) {
    %c1_i32 = arith.constant 1 : i32
    %0 = arith.addi %c1_i32, %arg1 : i32
    %c0_i32 = arith.constant 0 : i32
    %c0_i32_0 = arith.constant 0 : i32
    return %arg0, %c0_i32, %0 : i32, i32, i32
  }
  func.func @transform_3(%arg0: i32, %arg1: i32, %arg2: i32) -> (i32, i32, i32) {
    %c2_i32 = arith.constant 2 : i32
    %0 = arith.addi %c2_i32, %arg1 : i32
    %c0_i32 = arith.constant 0 : i32
    %c0_i32_0 = arith.constant 0 : i32
    return %arg0, %c0_i32, %0 : i32, i32, i32
  }
  func.func @transform_4(%arg0: i32, %arg1: i32, %arg2: i32) -> (i32, i32, i32) {
    %c0_i32 = arith.constant 0 : i32
    return %arg0, %arg2, %arg1 : i32, i32, i32
  }
}

module attributes {stable_mosaic.version = 11 : i64} {
  func.func @_linear_add_ln_kernel(%arg0: i32, %arg1: memref<16x128xbf16, #tpu.memory_space<vmem>>, %arg2: memref<128x128xbf16, #tpu.memory_space<vmem>>, %arg3: memref<1x128xf32, #tpu.memory_space<vmem>>, %arg4: memref<16x128xf32, #tpu.memory_space<vmem>>, %arg5: memref<1x128xf32, #tpu.memory_space<vmem>>, %arg6: memref<1x128xf32, #tpu.memory_space<vmem>>, %arg7: memref<16x128xf32, #tpu.memory_space<vmem>>) attributes {dimension_semantics = [#tpu.dimension_semantics<parallel>], iteration_bounds = array<i64: 1>, scalar_prefetch = 0 : i64, scratch_operands = 0 : i64, tpu.core_type = #tpu.core_type<tc>, window_params = [{transform_indices = @transform_0, window_bounds = array<i64: 16, 128>}, {pipeline_mode = #tpu.pipeline_mode<synchronous>, transform_indices = @transform_1, window_bounds = array<i64: 128, 128>}, {pipeline_mode = #tpu.pipeline_mode<synchronous>, transform_indices = @transform_2, window_bounds = array<i64: 1, 128>}, {transform_indices = @transform_3, window_bounds = array<i64: 16, 128>}, {pipeline_mode = #tpu.pipeline_mode<synchronous>, transform_indices = @transform_4, window_bounds = array<i64: 1, 128>}, {pipeline_mode = #tpu.pipeline_mode<synchronous>, transform_indices = @transform_5, window_bounds = array<i64: 1, 128>}, {transform_indices = @transform_6, window_bounds = array<i64: 16, 128>}]} {
    %c0 = arith.constant 0 : index
    %c0_0 = arith.constant 0 : index
    %0 = vector.load %arg1[%c0, %c0_0] : memref<16x128xbf16, #tpu.memory_space<vmem>>, vector<16x128xbf16>
    %c0_1 = arith.constant 0 : index
    %c0_2 = arith.constant 0 : index
    %1 = vector.load %arg2[%c0_1, %c0_2] : memref<128x128xbf16, #tpu.memory_space<vmem>>, vector<128x128xbf16>
    %cst = arith.constant dense<0.000000e+00> : vector<16x128xf32>
    %2 = tpu.matmul %0, %1, %cst {dimension_numbers = #tpu.dot_dimension_numbers<[1], [0], [0], [1], [0, 0, 1, 1], [], []>} : vector<16x128xbf16>, vector<128x128xbf16>, vector<16x128xf32> -> vector<16x128xf32>
    %c0_3 = arith.constant 0 : index
    %c0_4 = arith.constant 0 : index
    %3 = vector.load %arg3[%c0_3, %c0_4] : memref<1x128xf32, #tpu.memory_space<vmem>>, vector<1x128xf32>
    %4 = vector.broadcast %3 : vector<1x128xf32> to vector<16x128xf32>
    %5 = arith.addf %2, %4 : vector<16x128xf32>
    %c0_5 = arith.constant 0 : index
    %c0_6 = arith.constant 0 : index
    %6 = vector.load %arg4[%c0_5, %c0_6] : memref<16x128xf32, #tpu.memory_space<vmem>>, vector<16x128xf32>
    %7 = arith.addf %5, %6 : vector<16x128xf32>
    %cst_7 = arith.constant dense<0.000000e+00> : vector<16xf32>
    %8 = vector.multi_reduction <add>, %7, %cst_7 [1] : vector<16x128xf32> to vector<16xf32>
    %9 = vector.shape_cast %8 : vector<16xf32> to vector<16x1xf32>
    %cst_8 = arith.constant 1.280000e+02 : f32
    %10 = vector.broadcast %cst_8 : f32 to vector<16x1xf32>
    %11 = arith.divf %9, %10 : vector<16x1xf32>
    %12 = vector.broadcast %11 : vector<16x1xf32> to vector<16x128xf32>
    %13 = arith.subf %7, %12 : vector<16x128xf32>
    %14 = arith.mulf %13, %13 : vector<16x128xf32>
    %cst_9 = arith.constant dense<0.000000e+00> : vector<16xf32>
    %15 = vector.multi_reduction <add>, %14, %cst_9 [1] : vector<16x128xf32> to vector<16xf32>
    %16 = vector.shape_cast %15 : vector<16xf32> to vector<16x1xf32>
    %cst_10 = arith.constant 1.280000e+02 : f32
    %17 = vector.broadcast %cst_10 : f32 to vector<16x1xf32>
    %18 = arith.divf %16, %17 : vector<16x1xf32>
    %cst_11 = arith.constant 9.99999996E-13 : f32
    %19 = vector.broadcast %cst_11 : f32 to vector<16x1xf32>
    %20 = arith.addf %18, %19 : vector<16x1xf32>
    %21 = math.rsqrt %20 : vector<16x1xf32>
    %22 = vector.broadcast %21 : vector<16x1xf32> to vector<16x128xf32>
    %23 = arith.mulf %13, %22 : vector<16x128xf32>
    %c0_12 = arith.constant 0 : index
    %c0_13 = arith.constant 0 : index
    %24 = vector.load %arg5[%c0_12, %c0_13] : memref<1x128xf32, #tpu.memory_space<vmem>>, vector<1x128xf32>
    %25 = vector.broadcast %24 : vector<1x128xf32> to vector<16x128xf32>
    %26 = arith.mulf %23, %25 : vector<16x128xf32>
    %c0_14 = arith.constant 0 : index
    %c0_15 = arith.constant 0 : index
    %27 = vector.load %arg6[%c0_14, %c0_15] : memref<1x128xf32, #tpu.memory_space<vmem>>, vector<1x128xf32>
    %28 = vector.broadcast %27 : vector<1x128xf32> to vector<16x128xf32>
    %29 = arith.addf %26, %28 : vector<16x128xf32>
    %c0_16 = arith.constant 0 : index
    %c0_17 = arith.constant 0 : index
    %30 = vector.load %arg7[%c0_16, %c0_17] : memref<16x128xf32, #tpu.memory_space<vmem>>, vector<16x128xf32>
    tpu.vector_store %arg7[%c0_16, %c0_17], %29 {strides = array<i32>} : memref<16x128xf32, #tpu.memory_space<vmem>>, vector<16x128xf32>,
    return
  }
  func.func @transform_0(%arg0: i32) -> (i32, i32) {
    %c0_i32 = arith.constant 0 : i32
    %c0_i32_0 = arith.constant 0 : i32
    return %arg0, %c0_i32 : i32, i32
  }
  func.func @transform_1(%arg0: i32) -> (i32, i32) {
    %c0_i32 = arith.constant 0 : i32
    %c0_i32_0 = arith.constant 0 : i32
    %c0_i32_1 = arith.constant 0 : i32
    return %c0_i32, %c0_i32_0 : i32, i32
  }
  func.func @transform_2(%arg0: i32) -> (i32, i32) {
    %c0_i32 = arith.constant 0 : i32
    %c0_i32_0 = arith.constant 0 : i32
    %c0_i32_1 = arith.constant 0 : i32
    return %c0_i32, %c0_i32_0 : i32, i32
  }
  func.func @transform_3(%arg0: i32) -> (i32, i32) {
    %c0_i32 = arith.constant 0 : i32
    %c0_i32_0 = arith.constant 0 : i32
    return %arg0, %c0_i32 : i32, i32
  }
  func.func @transform_4(%arg0: i32) -> (i32, i32) {
    %c0_i32 = arith.constant 0 : i32
    %c0_i32_0 = arith.constant 0 : i32
    %c0_i32_1 = arith.constant 0 : i32
    return %c0_i32, %c0_i32_0 : i32, i32
  }
  func.func @transform_5(%arg0: i32) -> (i32, i32) {
    %c0_i32 = arith.constant 0 : i32
    %c0_i32_0 = arith.constant 0 : i32
    %c0_i32_1 = arith.constant 0 : i32
    return %c0_i32, %c0_i32_0 : i32, i32
  }
  func.func @transform_6(%arg0: i32) -> (i32, i32) {
    %c0_i32 = arith.constant 0 : i32
    %c0_i32_0 = arith.constant 0 : i32
    return %arg0, %c0_i32 : i32, i32
  }
}

module attributes {stable_mosaic.version = 11 : i64} {
  func.func @_ffn_kernel(%arg0: i32, %arg1: i32, %arg2: memref<16x128xf32, #tpu.memory_space<vmem>>, %arg3: memref<128x512xbf16, #tpu.memory_space<vmem>>, %arg4: memref<1x512xf32, #tpu.memory_space<vmem>>, %arg5: memref<512x128xbf16, #tpu.memory_space<vmem>>, %arg6: memref<1x128xf32, #tpu.memory_space<vmem>>, %arg7: memref<1x128xf32, #tpu.memory_space<vmem>>, %arg8: memref<1x128xf32, #tpu.memory_space<vmem>>, %arg9: memref<16x128xf32, #tpu.memory_space<vmem>>, %arg10: memref<16x128xf32, #tpu.memory_space<vmem>>, %arg11: memref<16x128xbf16, #tpu.memory_space<vmem>>) attributes {dimension_semantics = [#tpu.dimension_semantics<parallel>, #tpu.dimension_semantics<arbitrary>], iteration_bounds = array<i64: 1, 1>, scalar_prefetch = 0 : i64, scratch_operands = 2 : i64, tpu.core_type = #tpu.core_type<tc>, window_params = [{transform_indices = @transform_0, window_bounds = array<i64: 16, 128>}, {transform_indices = @transform_1, window_bounds = array<i64: 128, 512>}, {transform_indices = @transform_2, window_bounds = array<i64: 1, 512>}, {transform_indices = @transform_3, window_bounds = array<i64: 512, 128>}, {pipeline_mode = #tpu.pipeline_mode<synchronous>, transform_indices = @transform_4, window_bounds = array<i64: 1, 128>}, {pipeline_mode = #tpu.pipeline_mode<synchronous>, transform_indices = @transform_5, window_bounds = array<i64: 1, 128>}, {pipeline_mode = #tpu.pipeline_mode<synchronous>, transform_indices = @transform_6, window_bounds = array<i64: 1, 128>}, {transform_indices = @transform_7, window_bounds = array<i64: 16, 128>}]} {
    %c0_i32 = arith.constant 0 : i32
    %0 = arith.cmpi eq, %arg1, %c0_i32 : i32
    %1 = arith.extui %0 : i1 to i32
    %c0_i32_0 = arith.constant 0 : i32
    %2 = arith.cmpi ne, %1, %c0_i32_0 : i32
    scf.if %2 {
      %cst_19 = arith.constant 0.000000e+00 : f32
      %31 = vector.broadcast %cst_19 : f32 to vector<16x128xf32>
      %c0_20 = arith.constant 0 : index
      %c0_21 = arith.constant 0 : index
      %32 = vector.load %arg10[%c0_20, %c0_21] : memref<16x128xf32, #tpu.memory_space<vmem>>, vector<16x128xf32>
      tpu.vector_store %arg10[%c0_20, %c0_21], %31 {strides = array<i32>} : memref<16x128xf32, #tpu.memory_space<vmem>>, vector<16x128xf32>,
      %c0_22 = arith.constant 0 : index
      %c0_23 = arith.constant 0 : index
      %33 = vector.load %arg2[%c0_22, %c0_23] : memref<16x128xf32, #tpu.memory_space<vmem>>, vector<16x128xf32>
      %34 = arith.truncf %33 : vector<16x128xf32> to vector<16x128xbf16>
      %c0_24 = arith.constant 0 : index
      %c0_25 = arith.constant 0 : index
      %35 = vector.load %arg11[%c0_24, %c0_25] : memref<16x128xbf16, #tpu.memory_space<vmem>>, vector<16x128xbf16>
      tpu.vector_store %arg11[%c0_24, %c0_25], %34 {strides = array<i32>} : memref<16x128xbf16, #tpu.memory_space<vmem>>, vector<16x128xbf16>,
    } else {
    }
    %c0 = arith.constant 0 : index
    %c0_1 = arith.constant 0 : index
    %3 = vector.load %arg11[%c0, %c0_1] : memref<16x128xbf16, #tpu.memory_space<vmem>>, vector<16x128xbf16>
    %c0_2 = arith.constant 0 : index
    %c0_3 = arith.constant 0 : index
    %4 = vector.load %arg3[%c0_2, %c0_3] : memref<128x512xbf16, #tpu.memory_space<vmem>>, vector<128x512xbf16>
    %cst = arith.constant dense<0.000000e+00> : vector<16x512xf32>
    %5 = tpu.matmul %3, %4, %cst {dimension_numbers = #tpu.dot_dimension_numbers<[1], [0], [0], [1], [0, 0, 1, 1], [], []>} : vector<16x128xbf16>, vector<128x512xbf16>, vector<16x512xf32> -> vector<16x512xf32>
    %c0_4 = arith.constant 0 : index
    %c0_5 = arith.constant 0 : index
    %6 = vector.load %arg4[%c0_4, %c0_5] : memref<1x512xf32, #tpu.memory_space<vmem>>, vector<1x512xf32>
    %7 = vector.broadcast %6 : vector<1x512xf32> to vector<16x512xf32>
    %8 = arith.addf %5, %7 : vector<16x512xf32>
    %cst_6 = arith.constant 5.000000e-01 : f32
    %9 = vector.broadcast %cst_6 : f32 to vector<16x512xf32>
    %10 = arith.mulf %9, %8 : vector<16x512xf32>
    %cst_7 = arith.constant 4.471500e-02 : f32
    %11 = vector.broadcast %cst_7 : f32 to vector<16x512xf32>
    %12 = arith.mulf %11, %8 : vector<16x512xf32>
    %13 = arith.mulf %12, %8 : vector<16x512xf32>
    %14 = arith.mulf %13, %8 : vector<16x512xf32>
    %15 = arith.addf %8, %14 : vector<16x512xf32>
    %cst_8 = arith.constant 0.797884583 : f32
    %16 = vector.broadcast %cst_8 : f32 to vector<16x512xf32>
    %17 = arith.mulf %16, %15 : vector<16x512xf32>
    %18 = math.tanh %17 : vector<16x512xf32>
    %cst_9 = arith.constant 1.000000e+00 : f32
    %19 = vector.broadcast %cst_9 : f32 to vector<16x512xf32>
    %20 = arith.addf %19, %18 : vector<16x512xf32>
    %21 = arith.mulf %10, %20 : vector<16x512xf32>
    %c0_10 = arith.constant 0 : index
    %c0_11 = arith.constant 0 : index
    %22 = vector.load %arg10[%c0_10, %c0_11] : memref<16x128xf32, #tpu.memory_space<vmem>>, vector<16x128xf32>
    %23 = arith.truncf %21 : vector<16x512xf32> to vector<16x512xbf16>
    %c0_12 = arith.constant 0 : index
    %c0_13 = arith.constant 0 : index
    %24 = vector.load %arg5[%c0_12, %c0_13] : memref<512x128xbf16, #tpu.memory_space<vmem>>, vector<512x128xbf16>
    %cst_14 = arith.constant dense<0.000000e+00> : vector<16x128xf32>
    %25 = tpu.matmul %23, %24, %cst_14 {dimension_numbers = #tpu.dot_dimension_numbers<[1], [0], [0], [1], [0, 0, 1, 1], [], []>} : vector<16x512xbf16>, vector<512x128xbf16>, vector<16x128xf32> -> vector<16x128xf32>
    %26 = arith.addf %22, %25 : vector<16x128xf32>
    %c0_15 = arith.constant 0 : index
    %c0_16 = arith.constant 0 : index
    %27 = vector.load %arg10[%c0_15, %c0_16] : memref<16x128xf32, #tpu.memory_space<vmem>>, vector<16x128xf32>
    tpu.vector_store %arg10[%c0_15, %c0_16], %26 {strides = array<i32>} : memref<16x128xf32, #tpu.memory_space<vmem>>, vector<16x128xf32>,
    %c0_i32_17 = arith.constant 0 : i32
    %28 = arith.cmpi eq, %arg1, %c0_i32_17 : i32
    %29 = arith.extui %28 : i1 to i32
    %c0_i32_18 = arith.constant 0 : i32
    %30 = arith.cmpi ne, %29, %c0_i32_18 : i32
    scf.if %30 {
      %c0_19 = arith.constant 0 : index
      %c0_20 = arith.constant 0 : index
      %31 = vector.load %arg10[%c0_19, %c0_20] : memref<16x128xf32, #tpu.memory_space<vmem>>, vector<16x128xf32>
      %c0_21 = arith.constant 0 : index
      %c0_22 = arith.constant 0 : index
      %32 = vector.load %arg6[%c0_21, %c0_22] : memref<1x128xf32, #tpu.memory_space<vmem>>, vector<1x128xf32>
      %33 = vector.broadcast %32 : vector<1x128xf32> to vector<16x128xf32>
      %34 = arith.addf %31, %33 : vector<16x128xf32>
      %c0_23 = arith.constant 0 : index
      %c0_24 = arith.constant 0 : index
      %35 = vector.load %arg2[%c0_23, %c0_24] : memref<16x128xf32, #tpu.memory_space<vmem>>, vector<16x128xf32>
      %36 = arith.addf %34, %35 : vector<16x128xf32>
      %cst_25 = arith.constant dense<0.000000e+00> : vector<16xf32>
      %37 = vector.multi_reduction <add>, %36, %cst_25 [1] : vector<16x128xf32> to vector<16xf32>
      %38 = vector.shape_cast %37 : vector<16xf32> to vector<16x1xf32>
      %cst_26 = arith.constant 1.280000e+02 : f32
      %39 = vector.broadcast %cst_26 : f32 to vector<16x1xf32>
      %40 = arith.divf %38, %39 : vector<16x1xf32>
      %41 = vector.broadcast %40 : vector<16x1xf32> to vector<16x128xf32>
      %42 = arith.subf %36, %41 : vector<16x128xf32>
      %43 = arith.mulf %42, %42 : vector<16x128xf32>
      %cst_27 = arith.constant dense<0.000000e+00> : vector<16xf32>
      %44 = vector.multi_reduction <add>, %43, %cst_27 [1] : vector<16x128xf32> to vector<16xf32>
      %45 = vector.shape_cast %44 : vector<16xf32> to vector<16x1xf32>
      %cst_28 = arith.constant 1.280000e+02 : f32
      %46 = vector.broadcast %cst_28 : f32 to vector<16x1xf32>
      %47 = arith.divf %45, %46 : vector<16x1xf32>
      %cst_29 = arith.constant 9.99999996E-13 : f32
      %48 = vector.broadcast %cst_29 : f32 to vector<16x1xf32>
      %49 = arith.addf %47, %48 : vector<16x1xf32>
      %50 = math.rsqrt %49 : vector<16x1xf32>
      %51 = vector.broadcast %50 : vector<16x1xf32> to vector<16x128xf32>
      %52 = arith.mulf %42, %51 : vector<16x128xf32>
      %c0_30 = arith.constant 0 : index
      %c0_31 = arith.constant 0 : index
      %53 = vector.load %arg7[%c0_30, %c0_31] : memref<1x128xf32, #tpu.memory_space<vmem>>, vector<1x128xf32>
      %54 = vector.broadcast %53 : vector<1x128xf32> to vector<16x128xf32>
      %55 = arith.mulf %52, %54 : vector<16x128xf32>
      %c0_32 = arith.constant 0 : index
      %c0_33 = arith.constant 0 : index
      %56 = vector.load %arg8[%c0_32, %c0_33] : memref<1x128xf32, #tpu.memory_space<vmem>>, vector<1x128xf32>
      %57 = vector.broadcast %56 : vector<1x128xf32> to vector<16x128xf32>
      %58 = arith.addf %55, %57 : vector<16x128xf32>
      %c0_34 = arith.constant 0 : index
      %c0_35 = arith.constant 0 : index
      %59 = vector.load %arg9[%c0_34, %c0_35] : memref<16x128xf32, #tpu.memory_space<vmem>>, vector<16x128xf32>
      tpu.vector_store %arg9[%c0_34, %c0_35], %58 {strides = array<i32>} : memref<16x128xf32, #tpu.memory_space<vmem>>, vector<16x128xf32>,
    } else {
    }
    return
  }
  func.func @transform_0(%arg0: i32, %arg1: i32) -> (i32, i32) {
    %c0_i32 = arith.constant 0 : i32
    %c0_i32_0 = arith.constant 0 : i32
    return %arg0, %c0_i32 : i32, i32
  }
  func.func @transform_1(%arg0: i32, %arg1: i32) -> (i32, i32) {
    %c0_i32 = arith.constant 0 : i32
    %c0_i32_0 = arith.constant 0 : i32
    return %c0_i32, %arg1 : i32, i32
  }
  func.func @transform_2(%arg0: i32, %arg1: i32) -> (i32, i32) {
    %c0_i32 = arith.constant 0 : i32
    %c0_i32_0 = arith.constant 0 : i32
    return %c0_i32, %arg1 : i32, i32
  }
  func.func @transform_3(%arg0: i32, %arg1: i32) -> (i32, i32) {
    %c0_i32 = arith.constant 0 : i32
    %c0_i32_0 = arith.constant 0 : i32
    return %arg1, %c0_i32 : i32, i32
  }
  func.func @transform_4(%arg0: i32, %arg1: i32) -> (i32, i32) {
    %c0_i32 = arith.constant 0 : i32
    %c0_i32_0 = arith.constant 0 : i32
    %c0_i32_1 = arith.constant 0 : i32
    return %c0_i32, %c0_i32_0 : i32, i32
  }
  func.func @transform_5(%arg0: i32, %arg1: i32) -> (i32, i32) {
    %c0_i32 = arith.constant 0 : i32
    %c0_i32_0 = arith.constant 0 : i32
    %c0_i32_1 = arith.constant 0 : i32
    return %c0_i32, %c0_i32_0 : i32, i32
  }
  func.func @transform_6(%arg0: i32, %arg1: i32) -> (i32, i32) {
    %c0_i32 = arith.constant 0 : i32
    %c0_i32_0 = arith.constant 0 : i32
    %c0_i32_1 = arith.constant 0 : i32
    return %c0_i32, %c0_i32_0 : i32, i32
  }
  func.func @transform_7(%arg0: i32, %arg1: i32) -> (i32, i32) {
    %c0_i32 = arith.constant 0 : i32
    %c0_i32_0 = arith.constant 0 : i32
    return %arg0, %c0_i32 : i32, i32
  }
}

module attributes {stable_mosaic.version = 11 : i64} {
  func.func @_linear_kernel(%arg0: i32, %arg1: i32, %arg2: memref<16x128xf32, #tpu.memory_space<vmem>>, %arg3: memref<128x384xbf16, #tpu.memory_space<vmem>>, %arg4: memref<1x384xf32, #tpu.memory_space<vmem>>, %arg5: memref<16x384xbf16, #tpu.memory_space<vmem>>) attributes {dimension_semantics = [#tpu.dimension_semantics<parallel>, #tpu.dimension_semantics<parallel>], iteration_bounds = array<i64: 1, 1>, scalar_prefetch = 0 : i64, scratch_operands = 0 : i64, tpu.core_type = #tpu.core_type<tc>, window_params = [{transform_indices = @transform_0, window_bounds = array<i64: 16, 128>}, {transform_indices = @transform_1, window_bounds = array<i64: 128, 384>}, {transform_indices = @transform_2, window_bounds = array<i64: 1, 384>}, {transform_indices = @transform_3, window_bounds = array<i64: 16, 384>}]} {
    %c0 = arith.constant 0 : index
    %c0_0 = arith.constant 0 : index
    %0 = vector.load %arg2[%c0, %c0_0] : memref<16x128xf32, #tpu.memory_space<vmem>>, vector<16x128xf32>
    %1 = arith.truncf %0 : vector<16x128xf32> to vector<16x128xbf16>
    %c0_1 = arith.constant 0 : index
    %c0_2 = arith.constant 0 : index
    %2 = vector.load %arg3[%c0_1, %c0_2] : memref<128x384xbf16, #tpu.memory_space<vmem>>, vector<128x384xbf16>
    %cst = arith.constant dense<0.000000e+00> : vector<16x384xf32>
    %3 = tpu.matmul %1, %2, %cst {dimension_numbers = #tpu.dot_dimension_numbers<[1], [0], [0], [1], [0, 0, 1, 1], [], []>} : vector<16x128xbf16>, vector<128x384xbf16>, vector<16x384xf32> -> vector<16x384xf32>
    %c0_3 = arith.constant 0 : index
    %c0_4 = arith.constant 0 : index
    %4 = vector.load %arg4[%c0_3, %c0_4] : memref<1x384xf32, #tpu.memory_space<vmem>>, vector<1x384xf32>
    %5 = vector.broadcast %4 : vector<1x384xf32> to vector<16x384xf32>
    %6 = arith.addf %3, %5 : vector<16x384xf32>
    %7 = arith.truncf %6 : vector<16x384xf32> to vector<16x384xbf16>
    %c0_5 = arith.constant 0 : index
    %c0_6 = arith.constant 0 : index
    %8 = vector.load %arg5[%c0_5, %c0_6] : memref<16x384xbf16, #tpu.memory_space<vmem>>, vector<16x384xbf16>
    tpu.vector_store %arg5[%c0_5, %c0_6], %7 {strides = array<i32>} : memref<16x384xbf16, #tpu.memory_space<vmem>>, vector<16x384xbf16>,
    return
  }
  func.func @transform_0(%arg0: i32, %arg1: i32) -> (i32, i32) {
    %c0_i32 = arith.constant 0 : i32
    %c0_i32_0 = arith.constant 0 : i32
    return %arg0, %c0_i32 : i32, i32
  }
  func.func @transform_1(%arg0: i32, %arg1: i32) -> (i32, i32) {
    %c0_i32 = arith.constant 0 : i32
    %c0_i32_0 = arith.constant 0 : i32
    return %c0_i32, %arg1 : i32, i32
  }
  func.func @transform_2(%arg0: i32, %arg1: i32) -> (i32, i32) {
    %c0_i32 = arith.constant 0 : i32
    %c0_i32_0 = arith.constant 0 : i32
    return %c0_i32, %arg1 : i32, i32
  }
  func.func @transform_3(%arg0: i32, %arg1: i32) -> (i32, i32) {
    %c0_i32 = arith.constant 0 : i32
    return %arg0, %arg1 : i32, i32
  }
}

module attributes {stable_mosaic.version = 11 : i64} {
  func.func @_linear_add_ln_kernel(%arg0: i32, %arg1: memref<16x128xbf16, #tpu.memory_space<vmem>>, %arg2: memref<128x128xbf16, #tpu.memory_space<vmem>>, %arg3: memref<1x128xf32, #tpu.memory_space<vmem>>, %arg4: memref<16x128xf32, #tpu.memory_space<vmem>>, %arg5: memref<1x128xf32, #tpu.memory_space<vmem>>, %arg6: memref<1x128xf32, #tpu.memory_space<vmem>>, %arg7: memref<16x128xf32, #tpu.memory_space<vmem>>) attributes {dimension_semantics = [#tpu.dimension_semantics<parallel>], iteration_bounds = array<i64: 1>, scalar_prefetch = 0 : i64, scratch_operands = 0 : i64, tpu.core_type = #tpu.core_type<tc>, window_params = [{transform_indices = @transform_0, window_bounds = array<i64: 16, 128>}, {pipeline_mode = #tpu.pipeline_mode<synchronous>, transform_indices = @transform_1, window_bounds = array<i64: 128, 128>}, {pipeline_mode = #tpu.pipeline_mode<synchronous>, transform_indices = @transform_2, window_bounds = array<i64: 1, 128>}, {transform_indices = @transform_3, window_bounds = array<i64: 16, 128>}, {pipeline_mode = #tpu.pipeline_mode<synchronous>, transform_indices = @transform_4, window_bounds = array<i64: 1, 128>}, {pipeline_mode = #tpu.pipeline_mode<synchronous>, transform_indices = @transform_5, window_bounds = array<i64: 1, 128>}, {transform_indices = @transform_6, window_bounds = array<i64: 16, 128>}]} {
    %c0 = arith.constant 0 : index
    %c0_0 = arith.constant 0 : index
    %0 = vector.load %arg1[%c0, %c0_0] : memref<16x128xbf16, #tpu.memory_space<vmem>>, vector<16x128xbf16>
    %c0_1 = arith.constant 0 : index
    %c0_2 = arith.constant 0 : index
    %1 = vector.load %arg2[%c0_1, %c0_2] : memref<128x128xbf16, #tpu.memory_space<vmem>>, vector<128x128xbf16>
    %cst = arith.constant dense<0.000000e+00> : vector<16x128xf32>
    %2 = tpu.matmul %0, %1, %cst {dimension_numbers = #tpu.dot_dimension_numbers<[1], [0], [0], [1], [0, 0, 1, 1], [], []>} : vector<16x128xbf16>, vector<128x128xbf16>, vector<16x128xf32> -> vector<16x128xf32>
    %c0_3 = arith.constant 0 : index
    %c0_4 = arith.constant 0 : index
    %3 = vector.load %arg3[%c0_3, %c0_4] : memref<1x128xf32, #tpu.memory_space<vmem>>, vector<1x128xf32>
    %4 = vector.broadcast %3 : vector<1x128xf32> to vector<16x128xf32>
    %5 = arith.addf %2, %4 : vector<16x128xf32>
    %c0_5 = arith.constant 0 : index
    %c0_6 = arith.constant 0 : index
    %6 = vector.load %arg4[%c0_5, %c0_6] : memref<16x128xf32, #tpu.memory_space<vmem>>, vector<16x128xf32>
    %7 = arith.addf %5, %6 : vector<16x128xf32>
    %cst_7 = arith.constant dense<0.000000e+00> : vector<16xf32>
    %8 = vector.multi_reduction <add>, %7, %cst_7 [1] : vector<16x128xf32> to vector<16xf32>
    %9 = vector.shape_cast %8 : vector<16xf32> to vector<16x1xf32>
    %cst_8 = arith.constant 1.280000e+02 : f32
    %10 = vector.broadcast %cst_8 : f32 to vector<16x1xf32>
    %11 = arith.divf %9, %10 : vector<16x1xf32>
    %12 = vector.broadcast %11 : vector<16x1xf32> to vector<16x128xf32>
    %13 = arith.subf %7, %12 : vector<16x128xf32>
    %14 = arith.mulf %13, %13 : vector<16x128xf32>
    %cst_9 = arith.constant dense<0.000000e+00> : vector<16xf32>
    %15 = vector.multi_reduction <add>, %14, %cst_9 [1] : vector<16x128xf32> to vector<16xf32>
    %16 = vector.shape_cast %15 : vector<16xf32> to vector<16x1xf32>
    %cst_10 = arith.constant 1.280000e+02 : f32
    %17 = vector.broadcast %cst_10 : f32 to vector<16x1xf32>
    %18 = arith.divf %16, %17 : vector<16x1xf32>
    %cst_11 = arith.constant 9.99999996E-13 : f32
    %19 = vector.broadcast %cst_11 : f32 to vector<16x1xf32>
    %20 = arith.addf %18, %19 : vector<16x1xf32>
    %21 = math.rsqrt %20 : vector<16x1xf32>
    %22 = vector.broadcast %21 : vector<16x1xf32> to vector<16x128xf32>
    %23 = arith.mulf %13, %22 : vector<16x128xf32>
    %c0_12 = arith.constant 0 : index
    %c0_13 = arith.constant 0 : index
    %24 = vector.load %arg5[%c0_12, %c0_13] : memref<1x128xf32, #tpu.memory_space<vmem>>, vector<1x128xf32>
    %25 = vector.broadcast %24 : vector<1x128xf32> to vector<16x128xf32>
    %26 = arith.mulf %23, %25 : vector<16x128xf32>
    %c0_14 = arith.constant 0 : index
    %c0_15 = arith.constant 0 : index
    %27 = vector.load %arg6[%c0_14, %c0_15] : memref<1x128xf32, #tpu.memory_space<vmem>>, vector<1x128xf32>
    %28 = vector.broadcast %27 : vector<1x128xf32> to vector<16x128xf32>
    %29 = arith.addf %26, %28 : vector<16x128xf32>
    %c0_16 = arith.constant 0 : index
    %c0_17 = arith.constant 0 : index
    %30 = vector.load %arg7[%c0_16, %c0_17] : memref<16x128xf32, #tpu.memory_space<vmem>>, vector<16x128xf32>
    tpu.vector_store %arg7[%c0_16, %c0_17], %29 {strides = array<i32>} : memref<16x128xf32, #tpu.memory_space<vmem>>, vector<16x128xf32>,
    return
  }
  func.func @transform_0(%arg0: i32) -> (i32, i32) {
    %c0_i32 = arith.constant 0 : i32
    %c0_i32_0 = arith.constant 0 : i32
    return %arg0, %c0_i32 : i32, i32
  }
  func.func @transform_1(%arg0: i32) -> (i32, i32) {
    %c0_i32 = arith.constant 0 : i32
    %c0_i32_0 = arith.constant 0 : i32
    %c0_i32_1 = arith.constant 0 : i32
    return %c0_i32, %c0_i32_0 : i32, i32
  }
  func.func @transform_2(%arg0: i32) -> (i32, i32) {
    %c0_i32 = arith.constant 0 : i32
    %c0_i32_0 = arith.constant 0 : i32
    %c0_i32_1 = arith.constant 0 : i32
    return %c0_i32, %c0_i32_0 : i32, i32
  }
  func.func @transform_3(%arg0: i32) -> (i32, i32) {
    %c0_i32 = arith.constant 0 : i32
    %c0_i32_0 = arith.constant 0 : i32
    return %arg0, %c0_i32 : i32, i32
  }
  func.func @transform_4(%arg0: i32) -> (i32, i32) {
    %c0_i32 = arith.constant 0 : i32
    %c0_i32_0 = arith.constant 0 : i32
    %c0_i32_1 = arith.constant 0 : i32
    return %c0_i32, %c0_i32_0 : i32, i32
  }
  func.func @transform_5(%arg0: i32) -> (i32, i32) {
    %c0_i32 = arith.constant 0 : i32
    %c0_i32_0 = arith.constant 0 : i32
    %c0_i32_1 = arith.constant 0 : i32
    return %c0_i32, %c0_i32_0 : i32, i32
  }
  func.func @transform_6(%arg0: i32) -> (i32, i32) {
    %c0_i32 = arith.constant 0 : i32
    %c0_i32_0 = arith.constant 0 : i32
    return %arg0, %c0_i32 : i32, i32
  }
}

module attributes {stable_mosaic.version = 11 : i64} {
  func.func @_attention_kernel(%arg0: i32, %arg1: i32, %arg2: i32, %arg3: memref<1x1x8xf32, #tpu.memory_space<vmem>>, %arg4: memref<1x8x128xbf16, #tpu.memory_space<vmem>>, %arg5: memref<1x8x128xbf16, #tpu.memory_space<vmem>>, %arg6: memref<1x8x128xbf16, #tpu.memory_space<vmem>>, %arg7: memref<1x8x128xbf16, #tpu.memory_space<vmem>>) attributes {dimension_semantics = [#tpu.dimension_semantics<parallel>, #tpu.dimension_semantics<parallel>, #tpu.dimension_semantics<parallel>], iteration_bounds = array<i64: 2, 1, 1>, scalar_prefetch = 0 : i64, scratch_operands = 0 : i64, tpu.core_type = #tpu.core_type<tc>, window_params = [{transform_indices = @transform_0, window_bounds = array<i64: 1, 1, 8>}, {transform_indices = @transform_1, window_bounds = array<i64: 1, 8, 128>}, {transform_indices = @transform_2, window_bounds = array<i64: 1, 8, 128>}, {transform_indices = @transform_3, window_bounds = array<i64: 1, 8, 128>}, {transform_indices = @transform_4, window_bounds = array<i64: 1, 8, 128>}]} {
    %c0 = arith.constant 0 : index
    %c0_0 = arith.constant 0 : index
    %c0_1 = arith.constant 0 : index
    %0 = vector.load %arg3[%c0, %c0_0, %c0_1] : memref<1x1x8xf32, #tpu.memory_space<vmem>>, vector<1x1x8xf32>
    %1 = vector.shape_cast %0 : vector<1x1x8xf32> to vector<1x8xf32>
    %c0_2 = arith.constant 0 : index
    %c0_3 = arith.constant 0 : index
    %c0_4 = arith.constant 0 : index
    %2 = vector.load %arg4[%c0_2, %c0_3, %c0_4] : memref<1x8x128xbf16, #tpu.memory_space<vmem>>, vector<1x8x32xbf16>
    %3 = vector.shape_cast %2 : vector<1x8x32xbf16> to vector<8x32xbf16>
    %c0_5 = arith.constant 0 : index
    %c0_6 = arith.constant 0 : index
    %c0_7 = arith.constant 0 : index
    %4 = vector.load %arg5[%c0_5, %c0_6, %c0_7] : memref<1x8x128xbf16, #tpu.memory_space<vmem>>, vector<1x8x32xbf16>
    %5 = vector.shape_cast %4 : vector<1x8x32xbf16> to vector<8x32xbf16>
    %c0_8 = arith.constant 0 : index
    %c0_9 = arith.constant 0 : index
    %c0_10 = arith.constant 0 : index
    %6 = vector.load %arg6[%c0_8, %c0_9, %c0_10] : memref<1x8x128xbf16, #tpu.memory_space<vmem>>, vector<1x8x32xbf16>
    %7 = vector.shape_cast %6 : vector<1x8x32xbf16> to vector<8x32xbf16>
    %cst = arith.constant dense<0.000000e+00> : vector<8x8xf32>
    %8 = tpu.matmul %3, %5, %cst {dimension_numbers = #tpu.dot_dimension_numbers<[1], [1], [0], [0], [0, 0, 1, 0], [], []>} : vector<8x32xbf16>, vector<8x32xbf16>, vector<8x8xf32> -> vector<8x8xf32>
    %9 = vector.broadcast %1 : vector<1x8xf32> to vector<8x8xf32>
    %10 = arith.addf %8, %9 : vector<8x8xf32>
    %cst_11 = arith.constant dense<0xFF800000> : vector<8xf32>
    %11 = vector.multi_reduction <maximumf>, %10, %cst_11 [1] : vector<8x8xf32> to vector<8xf32>
    %12 = vector.shape_cast %11 : vector<8xf32> to vector<8x1xf32>
    %13 = vector.broadcast %12 : vector<8x1xf32> to vector<8x8xf32>
    %14 = arith.subf %10, %13 : vector<8x8xf32>
    %15 = math.exp %14 : vector<8x8xf32>
    %cst_12 = arith.constant dense<0.000000e+00> : vector<8xf32>
    %16 = vector.multi_reduction <add>, %15, %cst_12 [1] : vector<8x8xf32> to vector<8xf32>
    %17 = vector.shape_cast %16 : vector<8xf32> to vector<8x1xf32>
    %18 = arith.truncf %15 : vector<8x8xf32> to vector<8x8xbf16>
    %cst_13 = arith.constant dense<0.000000e+00> : vector<8x32xf32>
    %19 = tpu.matmul %18, %7, %cst_13 {dimension_numbers = #tpu.dot_dimension_numbers<[1], [0], [0], [1], [0, 0, 1, 1], [], []>} : vector<8x8xbf16>, vector<8x32xbf16>, vector<8x32xf32> -> vector<8x32xf32>
    %20 = tpu.reciprocal %17 {approx = true} : vector<8x1xf32> -> vector<8x1xf32>
    %21 = vector.broadcast %20 : vector<8x1xf32> to vector<8x32xf32>
    %22 = arith.mulf %19, %21 : vector<8x32xf32>
    %23 = arith.truncf %22 : vector<8x32xf32> to vector<8x32xbf16>
    %c0_14 = arith.constant 0 : index
    %c0_15 = arith.constant 0 : index
    %c0_16 = arith.constant 0 : index
    %24 = vector.load %arg7[%c0_14, %c0_15, %c0_16] : memref<1x8x128xbf16, #tpu.memory_space<vmem>>, vector<1x8x32xbf16>
    %25 = vector.shape_cast %24 : vector<1x8x32xbf16> to vector<8x32xbf16>
    %26 = vector.shape_cast %23 : vector<8x32xbf16> to vector<1x8x32xbf16>
    tpu.vector_store %arg7[%c0_14, %c0_15, %c0_16], %26 {strides = array<i32>} : memref<1x8x128xbf16, #tpu.memory_space<vmem>>, vector<1x8x32xbf16>,
    %c0_17 = arith.constant 0 : index
    %c0_18 = arith.constant 0 : index
    %c32 = arith.constant 32 : index
    %27 = vector.load %arg4[%c0_17, %c0_18, %c32] : memref<1x8x128xbf16, #tpu.memory_space<vmem>>, vector<1x8x32xbf16>
    %28 = vector.shape_cast %27 : vector<1x8x32xbf16> to vector<8x32xbf16>
    %c0_19 = arith.constant 0 : index
    %c0_20 = arith.constant 0 : index
    %c32_21 = arith.constant 32 : index
    %29 = vector.load %arg5[%c0_19, %c0_20, %c32_21] : memref<1x8x128xbf16, #tpu.memory_space<vmem>>, vector<1x8x32xbf16>
    %30 = vector.shape_cast %29 : vector<1x8x32xbf16> to vector<8x32xbf16>
    %c0_22 = arith.constant 0 : index
    %c0_23 = arith.constant 0 : index
    %c32_24 = arith.constant 32 : index
    %31 = vector.load %arg6[%c0_22, %c0_23, %c32_24] : memref<1x8x128xbf16, #tpu.memory_space<vmem>>, vector<1x8x32xbf16>
    %32 = vector.shape_cast %31 : vector<1x8x32xbf16> to vector<8x32xbf16>
    %cst_25 = arith.constant dense<0.000000e+00> : vector<8x8xf32>
    %33 = tpu.matmul %28, %30, %cst_25 {dimension_numbers = #tpu.dot_dimension_numbers<[1], [1], [0], [0], [0, 0, 1, 0], [], []>} : vector<8x32xbf16>, vector<8x32xbf16>, vector<8x8xf32> -> vector<8x8xf32>
    %34 = vector.broadcast %1 : vector<1x8xf32> to vector<8x8xf32>
    %35 = arith.addf %33, %34 : vector<8x8xf32>
    %cst_26 = arith.constant dense<0xFF800000> : vector<8xf32>
    %36 = vector.multi_reduction <maximumf>, %35, %cst_26 [1] : vector<8x8xf32> to vector<8xf32>
    %37 = vector.shape_cast %36 : vector<8xf32> to vector<8x1xf32>
    %38 = vector.broadcast %37 : vector<8x1xf32> to vector<8x8xf32>
    %39 = arith.subf %35, %38 : vector<8x8xf32>
    %40 = math.exp %39 : vector<8x8xf32>
    %cst_27 = arith.constant dense<0.000000e+00> : vector<8xf32>
    %41 = vector.multi_reduction <add>, %40, %cst_27 [1] : vector<8x8xf32> to vector<8xf32>
    %42 = vector.shape_cast %41 : vector<8xf32> to vector<8x1xf32>
    %43 = arith.truncf %40 : vector<8x8xf32> to vector<8x8xbf16>
    %cst_28 = arith.constant dense<0.000000e+00> : vector<8x32xf32>
    %44 = tpu.matmul %43, %32, %cst_28 {dimension_numbers = #tpu.dot_dimension_numbers<[1], [0], [0], [1], [0, 0, 1, 1], [], []>} : vector<8x8xbf16>, vector<8x32xbf16>, vector<8x32xf32> -> vector<8x32xf32>
    %45 = tpu.reciprocal %42 {approx = true} : vector<8x1xf32> -> vector<8x1xf32>
    %46 = vector.broadcast %45 : vector<8x1xf32> to vector<8x32xf32>
    %47 = arith.mulf %44, %46 : vector<8x32xf32>
    %48 = arith.truncf %47 : vector<8x32xf32> to vector<8x32xbf16>
    %c0_29 = arith.constant 0 : index
    %c0_30 = arith.constant 0 : index
    %c32_31 = arith.constant 32 : index
    %49 = vector.load %arg7[%c0_29, %c0_30, %c32_31] : memref<1x8x128xbf16, #tpu.memory_space<vmem>>, vector<1x8x32xbf16>
    %50 = vector.shape_cast %49 : vector<1x8x32xbf16> to vector<8x32xbf16>
    %51 = vector.shape_cast %48 : vector<8x32xbf16> to vector<1x8x32xbf16>
    tpu.vector_store %arg7[%c0_29, %c0_30, %c32_31], %51 {strides = array<i32>} : memref<1x8x128xbf16, #tpu.memory_space<vmem>>, vector<1x8x32xbf16>,
    %c0_32 = arith.constant 0 : index
    %c0_33 = arith.constant 0 : index
    %c64 = arith.constant 64 : index
    %52 = vector.load %arg4[%c0_32, %c0_33, %c64] : memref<1x8x128xbf16, #tpu.memory_space<vmem>>, vector<1x8x32xbf16>
    %53 = vector.shape_cast %52 : vector<1x8x32xbf16> to vector<8x32xbf16>
    %c0_34 = arith.constant 0 : index
    %c0_35 = arith.constant 0 : index
    %c64_36 = arith.constant 64 : index
    %54 = vector.load %arg5[%c0_34, %c0_35, %c64_36] : memref<1x8x128xbf16, #tpu.memory_space<vmem>>, vector<1x8x32xbf16>
    %55 = vector.shape_cast %54 : vector<1x8x32xbf16> to vector<8x32xbf16>
    %c0_37 = arith.constant 0 : index
    %c0_38 = arith.constant 0 : index
    %c64_39 = arith.constant 64 : index
    %56 = vector.load %arg6[%c0_37, %c0_38, %c64_39] : memref<1x8x128xbf16, #tpu.memory_space<vmem>>, vector<1x8x32xbf16>
    %57 = vector.shape_cast %56 : vector<1x8x32xbf16> to vector<8x32xbf16>
    %cst_40 = arith.constant dense<0.000000e+00> : vector<8x8xf32>
    %58 = tpu.matmul %53, %55, %cst_40 {dimension_numbers = #tpu.dot_dimension_numbers<[1], [1], [0], [0], [0, 0, 1, 0], [], []>} : vector<8x32xbf16>, vector<8x32xbf16>, vector<8x8xf32> -> vector<8x8xf32>
    %59 = vector.broadcast %1 : vector<1x8xf32> to vector<8x8xf32>
    %60 = arith.addf %58, %59 : vector<8x8xf32>
    %cst_41 = arith.constant dense<0xFF800000> : vector<8xf32>
    %61 = vector.multi_reduction <maximumf>, %60, %cst_41 [1] : vector<8x8xf32> to vector<8xf32>
    %62 = vector.shape_cast %61 : vector<8xf32> to vector<8x1xf32>
    %63 = vector.broadcast %62 : vector<8x1xf32> to vector<8x8xf32>
    %64 = arith.subf %60, %63 : vector<8x8xf32>
    %65 = math.exp %64 : vector<8x8xf32>
    %cst_42 = arith.constant dense<0.000000e+00> : vector<8xf32>
    %66 = vector.multi_reduction <add>, %65, %cst_42 [1] : vector<8x8xf32> to vector<8xf32>
    %67 = vector.shape_cast %66 : vector<8xf32> to vector<8x1xf32>
    %68 = arith.truncf %65 : vector<8x8xf32> to vector<8x8xbf16>
    %cst_43 = arith.constant dense<0.000000e+00> : vector<8x32xf32>
    %69 = tpu.matmul %68, %57, %cst_43 {dimension_numbers = #tpu.dot_dimension_numbers<[1], [0], [0], [1], [0, 0, 1, 1], [], []>} : vector<8x8xbf16>, vector<8x32xbf16>, vector<8x32xf32> -> vector<8x32xf32>
    %70 = tpu.reciprocal %67 {approx = true} : vector<8x1xf32> -> vector<8x1xf32>
    %71 = vector.broadcast %70 : vector<8x1xf32> to vector<8x32xf32>
    %72 = arith.mulf %69, %71 : vector<8x32xf32>
    %73 = arith.truncf %72 : vector<8x32xf32> to vector<8x32xbf16>
    %c0_44 = arith.constant 0 : index
    %c0_45 = arith.constant 0 : index
    %c64_46 = arith.constant 64 : index
    %74 = vector.load %arg7[%c0_44, %c0_45, %c64_46] : memref<1x8x128xbf16, #tpu.memory_space<vmem>>, vector<1x8x32xbf16>
    %75 = vector.shape_cast %74 : vector<1x8x32xbf16> to vector<8x32xbf16>
    %76 = vector.shape_cast %73 : vector<8x32xbf16> to vector<1x8x32xbf16>
    tpu.vector_store %arg7[%c0_44, %c0_45, %c64_46], %76 {strides = array<i32>} : memref<1x8x128xbf16, #tpu.memory_space<vmem>>, vector<1x8x32xbf16>,
    %c0_47 = arith.constant 0 : index
    %c0_48 = arith.constant 0 : index
    %c96 = arith.constant 96 : index
    %77 = vector.load %arg4[%c0_47, %c0_48, %c96] : memref<1x8x128xbf16, #tpu.memory_space<vmem>>, vector<1x8x32xbf16>
    %78 = vector.shape_cast %77 : vector<1x8x32xbf16> to vector<8x32xbf16>
    %c0_49 = arith.constant 0 : index
    %c0_50 = arith.constant 0 : index
    %c96_51 = arith.constant 96 : index
    %79 = vector.load %arg5[%c0_49, %c0_50, %c96_51] : memref<1x8x128xbf16, #tpu.memory_space<vmem>>, vector<1x8x32xbf16>
    %80 = vector.shape_cast %79 : vector<1x8x32xbf16> to vector<8x32xbf16>
    %c0_52 = arith.constant 0 : index
    %c0_53 = arith.constant 0 : index
    %c96_54 = arith.constant 96 : index
    %81 = vector.load %arg6[%c0_52, %c0_53, %c96_54] : memref<1x8x128xbf16, #tpu.memory_space<vmem>>, vector<1x8x32xbf16>
    %82 = vector.shape_cast %81 : vector<1x8x32xbf16> to vector<8x32xbf16>
    %cst_55 = arith.constant dense<0.000000e+00> : vector<8x8xf32>
    %83 = tpu.matmul %78, %80, %cst_55 {dimension_numbers = #tpu.dot_dimension_numbers<[1], [1], [0], [0], [0, 0, 1, 0], [], []>} : vector<8x32xbf16>, vector<8x32xbf16>, vector<8x8xf32> -> vector<8x8xf32>
    %84 = vector.broadcast %1 : vector<1x8xf32> to vector<8x8xf32>
    %85 = arith.addf %83, %84 : vector<8x8xf32>
    %cst_56 = arith.constant dense<0xFF800000> : vector<8xf32>
    %86 = vector.multi_reduction <maximumf>, %85, %cst_56 [1] : vector<8x8xf32> to vector<8xf32>
    %87 = vector.shape_cast %86 : vector<8xf32> to vector<8x1xf32>
    %88 = vector.broadcast %87 : vector<8x1xf32> to vector<8x8xf32>
    %89 = arith.subf %85, %88 : vector<8x8xf32>
    %90 = math.exp %89 : vector<8x8xf32>
    %cst_57 = arith.constant dense<0.000000e+00> : vector<8xf32>
    %91 = vector.multi_reduction <add>, %90, %cst_57 [1] : vector<8x8xf32> to vector<8xf32>
    %92 = vector.shape_cast %91 : vector<8xf32> to vector<8x1xf32>
    %93 = arith.truncf %90 : vector<8x8xf32> to vector<8x8xbf16>
    %cst_58 = arith.constant dense<0.000000e+00> : vector<8x32xf32>
    %94 = tpu.matmul %93, %82, %cst_58 {dimension_numbers = #tpu.dot_dimension_numbers<[1], [0], [0], [1], [0, 0, 1, 1], [], []>} : vector<8x8xbf16>, vector<8x32xbf16>, vector<8x32xf32> -> vector<8x32xf32>
    %95 = tpu.reciprocal %92 {approx = true} : vector<8x1xf32> -> vector<8x1xf32>
    %96 = vector.broadcast %95 : vector<8x1xf32> to vector<8x32xf32>
    %97 = arith.mulf %94, %96 : vector<8x32xf32>
    %98 = arith.truncf %97 : vector<8x32xf32> to vector<8x32xbf16>
    %c0_59 = arith.constant 0 : index
    %c0_60 = arith.constant 0 : index
    %c96_61 = arith.constant 96 : index
    %99 = vector.load %arg7[%c0_59, %c0_60, %c96_61] : memref<1x8x128xbf16, #tpu.memory_space<vmem>>, vector<1x8x32xbf16>
    %100 = vector.shape_cast %99 : vector<1x8x32xbf16> to vector<8x32xbf16>
    %101 = vector.shape_cast %98 : vector<8x32xbf16> to vector<1x8x32xbf16>
    tpu.vector_store %arg7[%c0_59, %c0_60, %c96_61], %101 {strides = array<i32>} : memref<1x8x128xbf16, #tpu.memory_space<vmem>>, vector<1x8x32xbf16>,
    return
  }
  func.func @transform_0(%arg0: i32, %arg1: i32, %arg2: i32) -> (i32, i32, i32) {
    %c0_i32 = arith.constant 0 : i32
    %c0_i32_0 = arith.constant 0 : i32
    %c0_i32_1 = arith.constant 0 : i32
    return %arg0, %c0_i32, %c0_i32_0 : i32, i32, i32
  }
  func.func @transform_1(%arg0: i32, %arg1: i32, %arg2: i32) -> (i32, i32, i32) {
    %c0_i32 = arith.constant 0 : i32
    return %arg0, %arg2, %arg1 : i32, i32, i32
  }
  func.func @transform_2(%arg0: i32, %arg1: i32, %arg2: i32) -> (i32, i32, i32) {
    %c1_i32 = arith.constant 1 : i32
    %0 = arith.addi %c1_i32, %arg1 : i32
    %c0_i32 = arith.constant 0 : i32
    %c0_i32_0 = arith.constant 0 : i32
    return %arg0, %c0_i32, %0 : i32, i32, i32
  }
  func.func @transform_3(%arg0: i32, %arg1: i32, %arg2: i32) -> (i32, i32, i32) {
    %c2_i32 = arith.constant 2 : i32
    %0 = arith.addi %c2_i32, %arg1 : i32
    %c0_i32 = arith.constant 0 : i32
    %c0_i32_0 = arith.constant 0 : i32
    return %arg0, %c0_i32, %0 : i32, i32, i32
  }
  func.func @transform_4(%arg0: i32, %arg1: i32, %arg2: i32) -> (i32, i32, i32) {
    %c0_i32 = arith.constant 0 : i32
    return %arg0, %arg2, %arg1 : i32, i32, i32
  }
}

module attributes {stable_mosaic.version = 11 : i64} {
  func.func @_ffn_kernel(%arg0: i32, %arg1: i32, %arg2: memref<16x128xf32, #tpu.memory_space<vmem>>, %arg3: memref<128x512xbf16, #tpu.memory_space<vmem>>, %arg4: memref<1x512xf32, #tpu.memory_space<vmem>>, %arg5: memref<512x128xbf16, #tpu.memory_space<vmem>>, %arg6: memref<1x128xf32, #tpu.memory_space<vmem>>, %arg7: memref<1x128xf32, #tpu.memory_space<vmem>>, %arg8: memref<1x128xf32, #tpu.memory_space<vmem>>, %arg9: memref<16x128xf32, #tpu.memory_space<vmem>>, %arg10: memref<16x128xf32, #tpu.memory_space<vmem>>, %arg11: memref<16x128xbf16, #tpu.memory_space<vmem>>) attributes {dimension_semantics = [#tpu.dimension_semantics<parallel>, #tpu.dimension_semantics<arbitrary>], iteration_bounds = array<i64: 1, 1>, scalar_prefetch = 0 : i64, scratch_operands = 2 : i64, tpu.core_type = #tpu.core_type<tc>, window_params = [{transform_indices = @transform_0, window_bounds = array<i64: 16, 128>}, {transform_indices = @transform_1, window_bounds = array<i64: 128, 512>}, {transform_indices = @transform_2, window_bounds = array<i64: 1, 512>}, {transform_indices = @transform_3, window_bounds = array<i64: 512, 128>}, {pipeline_mode = #tpu.pipeline_mode<synchronous>, transform_indices = @transform_4, window_bounds = array<i64: 1, 128>}, {pipeline_mode = #tpu.pipeline_mode<synchronous>, transform_indices = @transform_5, window_bounds = array<i64: 1, 128>}, {pipeline_mode = #tpu.pipeline_mode<synchronous>, transform_indices = @transform_6, window_bounds = array<i64: 1, 128>}, {transform_indices = @transform_7, window_bounds = array<i64: 16, 128>}]} {
    %c0_i32 = arith.constant 0 : i32
    %0 = arith.cmpi eq, %arg1, %c0_i32 : i32
    %1 = arith.extui %0 : i1 to i32
    %c0_i32_0 = arith.constant 0 : i32
    %2 = arith.cmpi ne, %1, %c0_i32_0 : i32
    scf.if %2 {
      %cst_19 = arith.constant 0.000000e+00 : f32
      %31 = vector.broadcast %cst_19 : f32 to vector<16x128xf32>
      %c0_20 = arith.constant 0 : index
      %c0_21 = arith.constant 0 : index
      %32 = vector.load %arg10[%c0_20, %c0_21] : memref<16x128xf32, #tpu.memory_space<vmem>>, vector<16x128xf32>
      tpu.vector_store %arg10[%c0_20, %c0_21], %31 {strides = array<i32>} : memref<16x128xf32, #tpu.memory_space<vmem>>, vector<16x128xf32>,
      %c0_22 = arith.constant 0 : index
      %c0_23 = arith.constant 0 : index
      %33 = vector.load %arg2[%c0_22, %c0_23] : memref<16x128xf32, #tpu.memory_space<vmem>>, vector<16x128xf32>
      %34 = arith.truncf %33 : vector<16x128xf32> to vector<16x128xbf16>
      %c0_24 = arith.constant 0 : index
      %c0_25 = arith.constant 0 : index
      %35 = vector.load %arg11[%c0_24, %c0_25] : memref<16x128xbf16, #tpu.memory_space<vmem>>, vector<16x128xbf16>
      tpu.vector_store %arg11[%c0_24, %c0_25], %34 {strides = array<i32>} : memref<16x128xbf16, #tpu.memory_space<vmem>>, vector<16x128xbf16>,
    } else {
    }
    %c0 = arith.constant 0 : index
    %c0_1 = arith.constant 0 : index
    %3 = vector.load %arg11[%c0, %c0_1] : memref<16x128xbf16, #tpu.memory_space<vmem>>, vector<16x128xbf16>
    %c0_2 = arith.constant 0 : index
    %c0_3 = arith.constant 0 : index
    %4 = vector.load %arg3[%c0_2, %c0_3] : memref<128x512xbf16, #tpu.memory_space<vmem>>, vector<128x512xbf16>
    %cst = arith.constant dense<0.000000e+00> : vector<16x512xf32>
    %5 = tpu.matmul %3, %4, %cst {dimension_numbers = #tpu.dot_dimension_numbers<[1], [0], [0], [1], [0, 0, 1, 1], [], []>} : vector<16x128xbf16>, vector<128x512xbf16>, vector<16x512xf32> -> vector<16x512xf32>
    %c0_4 = arith.constant 0 : index
    %c0_5 = arith.constant 0 : index
    %6 = vector.load %arg4[%c0_4, %c0_5] : memref<1x512xf32, #tpu.memory_space<vmem>>, vector<1x512xf32>
    %7 = vector.broadcast %6 : vector<1x512xf32> to vector<16x512xf32>
    %8 = arith.addf %5, %7 : vector<16x512xf32>
    %cst_6 = arith.constant 5.000000e-01 : f32
    %9 = vector.broadcast %cst_6 : f32 to vector<16x512xf32>
    %10 = arith.mulf %9, %8 : vector<16x512xf32>
    %cst_7 = arith.constant 4.471500e-02 : f32
    %11 = vector.broadcast %cst_7 : f32 to vector<16x512xf32>
    %12 = arith.mulf %11, %8 : vector<16x512xf32>
    %13 = arith.mulf %12, %8 : vector<16x512xf32>
    %14 = arith.mulf %13, %8 : vector<16x512xf32>
    %15 = arith.addf %8, %14 : vector<16x512xf32>
    %cst_8 = arith.constant 0.797884583 : f32
    %16 = vector.broadcast %cst_8 : f32 to vector<16x512xf32>
    %17 = arith.mulf %16, %15 : vector<16x512xf32>
    %18 = math.tanh %17 : vector<16x512xf32>
    %cst_9 = arith.constant 1.000000e+00 : f32
    %19 = vector.broadcast %cst_9 : f32 to vector<16x512xf32>
    %20 = arith.addf %19, %18 : vector<16x512xf32>
    %21 = arith.mulf %10, %20 : vector<16x512xf32>
    %c0_10 = arith.constant 0 : index
    %c0_11 = arith.constant 0 : index
    %22 = vector.load %arg10[%c0_10, %c0_11] : memref<16x128xf32, #tpu.memory_space<vmem>>, vector<16x128xf32>
    %23 = arith.truncf %21 : vector<16x512xf32> to vector<16x512xbf16>
    %c0_12 = arith.constant 0 : index
    %c0_13 = arith.constant 0 : index
    %24 = vector.load %arg5[%c0_12, %c0_13] : memref<512x128xbf16, #tpu.memory_space<vmem>>, vector<512x128xbf16>
    %cst_14 = arith.constant dense<0.000000e+00> : vector<16x128xf32>
    %25 = tpu.matmul %23, %24, %cst_14 {dimension_numbers = #tpu.dot_dimension_numbers<[1], [0], [0], [1], [0, 0, 1, 1], [], []>} : vector<16x512xbf16>, vector<512x128xbf16>, vector<16x128xf32> -> vector<16x128xf32>
    %26 = arith.addf %22, %25 : vector<16x128xf32>
    %c0_15 = arith.constant 0 : index
    %c0_16 = arith.constant 0 : index
    %27 = vector.load %arg10[%c0_15, %c0_16] : memref<16x128xf32, #tpu.memory_space<vmem>>, vector<16x128xf32>
    tpu.vector_store %arg10[%c0_15, %c0_16], %26 {strides = array<i32>} : memref<16x128xf32, #tpu.memory_space<vmem>>, vector<16x128xf32>,
    %c0_i32_17 = arith.constant 0 : i32
    %28 = arith.cmpi eq, %arg1, %c0_i32_17 : i32
    %29 = arith.extui %28 : i1 to i32
    %c0_i32_18 = arith.constant 0 : i32
    %30 = arith.cmpi ne, %29, %c0_i32_18 : i32
    scf.if %30 {
      %c0_19 = arith.constant 0 : index
      %c0_20 = arith.constant 0 : index
      %31 = vector.load %arg10[%c0_19, %c0_20] : memref<16x128xf32, #tpu.memory_space<vmem>>, vector<16x128xf32>
      %c0_21 = arith.constant 0 : index
      %c0_22 = arith.constant 0 : index
      %32 = vector.load %arg6[%c0_21, %c0_22] : memref<1x128xf32, #tpu.memory_space<vmem>>, vector<1x128xf32>
      %33 = vector.broadcast %32 : vector<1x128xf32> to vector<16x128xf32>
      %34 = arith.addf %31, %33 : vector<16x128xf32>
      %c0_23 = arith.constant 0 : index
      %c0_24 = arith.constant 0 : index
      %35 = vector.load %arg2[%c0_23, %c0_24] : memref<16x128xf32, #tpu.memory_space<vmem>>, vector<16x128xf32>
      %36 = arith.addf %34, %35 : vector<16x128xf32>
      %cst_25 = arith.constant dense<0.000000e+00> : vector<16xf32>
      %37 = vector.multi_reduction <add>, %36, %cst_25 [1] : vector<16x128xf32> to vector<16xf32>
      %38 = vector.shape_cast %37 : vector<16xf32> to vector<16x1xf32>
      %cst_26 = arith.constant 1.280000e+02 : f32
      %39 = vector.broadcast %cst_26 : f32 to vector<16x1xf32>
      %40 = arith.divf %38, %39 : vector<16x1xf32>
      %41 = vector.broadcast %40 : vector<16x1xf32> to vector<16x128xf32>
      %42 = arith.subf %36, %41 : vector<16x128xf32>
      %43 = arith.mulf %42, %42 : vector<16x128xf32>
      %cst_27 = arith.constant dense<0.000000e+00> : vector<16xf32>
      %44 = vector.multi_reduction <add>, %43, %cst_27 [1] : vector<16x128xf32> to vector<16xf32>
      %45 = vector.shape_cast %44 : vector<16xf32> to vector<16x1xf32>
      %cst_28 = arith.constant 1.280000e+02 : f32
      %46 = vector.broadcast %cst_28 : f32 to vector<16x1xf32>
      %47 = arith.divf %45, %46 : vector<16x1xf32>
      %cst_29 = arith.constant 9.99999996E-13 : f32
      %48 = vector.broadcast %cst_29 : f32 to vector<16x1xf32>
      %49 = arith.addf %47, %48 : vector<16x1xf32>
      %50 = math.rsqrt %49 : vector<16x1xf32>
      %51 = vector.broadcast %50 : vector<16x1xf32> to vector<16x128xf32>
      %52 = arith.mulf %42, %51 : vector<16x128xf32>
      %c0_30 = arith.constant 0 : index
      %c0_31 = arith.constant 0 : index
      %53 = vector.load %arg7[%c0_30, %c0_31] : memref<1x128xf32, #tpu.memory_space<vmem>>, vector<1x128xf32>
      %54 = vector.broadcast %53 : vector<1x128xf32> to vector<16x128xf32>
      %55 = arith.mulf %52, %54 : vector<16x128xf32>
      %c0_32 = arith.constant 0 : index
      %c0_33 = arith.constant 0 : index
      %56 = vector.load %arg8[%c0_32, %c0_33] : memref<1x128xf32, #tpu.memory_space<vmem>>, vector<1x128xf32>
      %57 = vector.broadcast %56 : vector<1x128xf32> to vector<16x128xf32>
      %58 = arith.addf %55, %57 : vector<16x128xf32>
      %c0_34 = arith.constant 0 : index
      %c0_35 = arith.constant 0 : index
      %59 = vector.load %arg9[%c0_34, %c0_35] : memref<16x128xf32, #tpu.memory_space<vmem>>, vector<16x128xf32>
      tpu.vector_store %arg9[%c0_34, %c0_35], %58 {strides = array<i32>} : memref<16x128xf32, #tpu.memory_space<vmem>>, vector<16x128xf32>,
    } else {
    }
    return
  }
  func.func @transform_0(%arg0: i32, %arg1: i32) -> (i32, i32) {
    %c0_i32 = arith.constant 0 : i32
    %c0_i32_0 = arith.constant 0 : i32
    return %arg0, %c0_i32 : i32, i32
  }
  func.func @transform_1(%arg0: i32, %arg1: i32) -> (i32, i32) {
    %c0_i32 = arith.constant 0 : i32
    %c0_i32_0 = arith.constant 0 : i32
    return %c0_i32, %arg1 : i32, i32
  }
  func.func @transform_2(%arg0: i32, %arg1: i32) -> (i32, i32) {
    %c0_i32 = arith.constant 0 : i32
    %c0_i32_0 = arith.constant 0 : i32
    return %c0_i32, %arg1 : i32, i32
  }
  func.func @transform_3(%arg0: i32, %arg1: i32) -> (i32, i32) {
    %c0_i32 = arith.constant 0 : i32
    %c0_i32_0 = arith.constant 0 : i32
    return %arg1, %c0_i32 : i32, i32
  }
  func.func @transform_4(%arg0: i32, %arg1: i32) -> (i32, i32) {
    %c0_i32 = arith.constant 0 : i32
    %c0_i32_0 = arith.constant 0 : i32
    %c0_i32_1 = arith.constant 0 : i32
    return %c0_i32, %c0_i32_0 : i32, i32
  }
  func.func @transform_5(%arg0: i32, %arg1: i32) -> (i32, i32) {
    %c0_i32 = arith.constant 0 : i32
    %c0_i32_0 = arith.constant 0 : i32
    %c0_i32_1 = arith.constant 0 : i32
    return %c0_i32, %c0_i32_0 : i32, i32
  }
  func.func @transform_6(%arg0: i32, %arg1: i32) -> (i32, i32) {
    %c0_i32 = arith.constant 0 : i32
    %c0_i32_0 = arith.constant 0 : i32
    %c0_i32_1 = arith.constant 0 : i32
    return %c0_i32, %c0_i32_0 : i32, i32
  }
  func.func @transform_7(%arg0: i32, %arg1: i32) -> (i32, i32) {
    %c0_i32 = arith.constant 0 : i32
    %c0_i32_0 = arith.constant 0 : i32
    return %arg0, %c0_i32 : i32, i32
  }
}

</mosaic_0001>

<bundles_post_ra>
// kernel: encoder_forward.9
= control target key start
LH: loop header
LB: loop body
LE: loop exit
PB: predicated region body
PF: predicated region fallthrough
CT: control target
= control target key end

     0   :  { %8 = vsyncpa [#allocation3], 0  ;;  %s267_s0 = inlined_call_operand.hbm [shape: f32[16,32], index: 0, kind: input, shape index: {}]   ;;  %s268_s1 = inlined_call_operand.hbm [shape: bf16[32,128], index: 1, kind: input, shape index: {}]   ;;  %s269_s2 = inlined_call_operand.hbm [shape: f32[1,128], index: 2, kind: input, shape index: {}]   ;;  %s270_s3 = inlined_call_operand.vmem [shape: f32[16,128], index: 3, kind: output, shape index: {}]  }
   0x1   :  { %9 = vsyncpa [#allocation5], 0  ;;  %s223_s12 = smov [#allocation4]  }
   0x2   :  { %s27_s13 = sshll.u32 %s223_s12, 4  ;;  %s28_s13 = int_to_ptr.vmem [resolvable:$true] %s27_s13 }
   0x3   :  { %s167_s14 = scalar_lea.vmem %s28_s13, 256  ;;  %p172_p1 = scmp.lt.s32.totalorder %s28_s13, %s28_s13 }
   0x4   :  { %p168_p0 = scmp.ne.s32.totalorder %s28_s13, %s167_s14  ;;  %p173_p2 = scmp.lt.s32.totalorder %s167_s14, %s167_s14 }
   0x6   :  { %p174_p3 = por %p173_p2, %p172_p1 }
   0x8   :  { %p175_p4 = pnand %p174_p3, %p168_p0 }
   0xa   :  { %178 = shalt.err (!%p175_p4)
}
   0xb   :  { %s224_s15 = smov 64   ;;  %s225_s16 = smov 4  }
   0xc   :  { %33 = dma.hbm_to_vmem [thread:$0]  %s268_s1, 256, %s28_s13, [#allocation5], %s224_s15, %s224_s15, %s225_s16  }
   0xd   :  { %s226_s19 = smov [#allocation2]  }
   0xe   :  { %s15_s20 = sshll.u32 %s226_s19, 4  ;;  %s16_s20 = int_to_ptr.vmem [resolvable:$true] %s15_s20 }
   0xf   :  { %s187_s21 = scalar_lea.vmem %s16_s20, 256  ;;  %p192_p6 = scmp.lt.s32.totalorder %s16_s20, %s16_s20 }
  0x10   :  { %p188_p5 = scmp.ne.s32.totalorder %s16_s20, %s187_s21  ;;  %p193_p7 = scmp.lt.s32.totalorder %s187_s21, %s187_s21 }
  0x12   :  { %p194_p8 = por %p193_p7, %p192_p6 }
  0x14   :  { %p195_p9 = pnand %p194_p8, %p188_p5 }
  0x16   :  { %198 = shalt.err (!%p195_p9)
}
  0x17   :  { %s227_s22 = smov 128   ;;  %s228_s23 = smov 8  }
  0x18   :  { %21 = dma.hbm_to_vmem [thread:$0]  %s267_s0, 256, %s16_s20, [#allocation3], %s227_s22, %s227_s22, %s228_s23  }
  0x19   :  { %s229_s26 = smov [#allocation6]  }
  0x1a   :  { %s40_s27 = sshll.u32 %s229_s26, 4  ;;  %s41_s27 = int_to_ptr.vmem [resolvable:$true] %s40_s27 }
  0x1b   :  { %s207_s1 = scalar_lea.vmem %s41_s27, 16  ;;  %s211_s28 = scalar_lea.vmem %s41_s27, 32 }
  0x1c   :  { %p208_p10 = scmp.ne.s32.totalorder %s41_s27, %s207_s1  ;;  %p212_p11 = scmp.lt.s32.totalorder %s41_s27, %s41_s27 }
  0x1d   :  { %p213_p12 = scmp.lt.s32.totalorder %s211_s28, %s207_s1 }
  0x1f   :  { %p214_p13 = por %p213_p12, %p212_p11 }
  0x21   :  { %p215_p0 = pnand %p214_p13, %p208_p10 }
  0x23   :  { %218 = shalt.err (!%p215_p0)
}
  0x24   :  { %43 = dma.hbm_to_vmem [thread:$0]  %s269_s2, 16, %s41_s27, [#allocation5]  }
  0x25   :  { %219 = dma.done.wait [#allocation3], 256  }
  0x26   :  { %220 = vsyncadd [#allocation3], 4294967040 }
  0x27   :  { %221 = dma.done.wait [#allocation5], 272  }
  0x28   :  { %222 = vsyncadd [#allocation5], 4294967024  ;;  %v230_v0 = vmov 0.0   ;;  %vm231_vm0 = vmmov 0   ;;  %v157_v1 = vld [vmem:[#allocation4 + $0x8] sm:$0xff]   ;;  %v158_v2 = vld [vmem:[#allocation4] sm:$0xff]  }
  0x29   :  { %140 = vmatprep.subr.bf16.mxu0 %v230_v0  ;;  %144 = vmatprep.mubr.msk.bf16.mxu0 %vm231_vm0, %v230_v0  ;;  %v54_v3 = vld [vmem:[#allocation2] sm:$0xff]  ;;  %v55_v4 = vld [vmem:[#allocation2 + $0x8] sm:$0xff]  ;;  %vm80_vm1 = vcmask 261120  }
  0x2a   :  { %141 = vmatpush3.bf16.msra.mxu0 %v157_v1  ;;  %v56_v5 = vpack.c.bf16 %v55_v4, %v54_v3  ;;  %v133_v6 = vld [vmem:[#allocation6] ss:$0 sm:$0xff] }
  0x2b   :  { %142 = vmatprep.subr.bf16.mxu0 %v230_v0 }
  0x2e   :  { %143 = vmatpush3.bf16.msra.mxu0 %v158_v2 }
  0x31   :  { %145 = vmatmul.mubr.msk.bf16.vlgmr.msra.gmra.mxu0 %vm80_vm1, %v56_v5 }
  0xf1   :  { %v118_v7 = vpop.f32.mrf.mxu0 }
  0xf2   :  { %v119_v8 = vadd.f32 %v133_v6, %v118_v7 }
  0xf3   :  { %v146_v9 = vpop.f32.mrf.mxu0 }
  0xf4   :  { %125 = vst [vmem:[%s270_s3] sm:$0xff] %v119_v8 }
  0xf5   :  { %v121_v10 = vpop.f32.mrf.mxu0 }
  0xf6   :  { %v122_v11 = vadd.f32 %v133_v6, %v121_v10 }
  0xf7   :  { %v147_v12 = vpop.f32.mrf.mxu0 }
  0xf8   :  { %126 = vst [vmem:[%s270_s3 + $0x8] sm:$0xff] %v122_v11 }
  0xf9   :  { %131 = vsyncpa [#allocation3], 1 }
  0xfa   :  { %132 = vsyncpa [#allocation5], 1 }

// kernel: encoder_forward.10
= control target key start
LH: loop header
LB: loop body
LE: loop exit
PB: predicated region body
PF: predicated region fallthrough
CT: control target
= control target key end

     0   :  { %8 = vsyncpa [#allocation3], 0  ;;  %s443_s12 = smov [#allocation2]   ;;  %s493_s0 = inlined_call_operand.vmem [shape: f32[16,128], index: 0, kind: input, shape index: {}]   ;;  %s494_s1 = inlined_call_operand.hbm [shape: bf16[128,384], index: 1, kind: input, shape index: {}]   ;;  %s495_s2 = inlined_call_operand.vmem [shape: f32[1,384], index: 2, kind: input, shape index: {}]   ;;  %s496_s3 = inlined_call_operand.vmem [shape: bf16[16,384], index: 3, kind: output, shape index: {}]  }
   0x1   :  { %s16_s13 = sshll.u32 %s443_s12, 4  ;;  %s17_s13 = int_to_ptr.vmem [resolvable:$true] %s16_s13 }
   0x2   :  { %s429_s14 = scalar_lea.vmem %s17_s13, 3072  ;;  %p434_p1 = scmp.lt.s32.totalorder %s17_s13, %s17_s13 }
   0x3   :  { %p430_p0 = scmp.ne.s32.totalorder %s17_s13, %s429_s14  ;;  %p435_p2 = scmp.lt.s32.totalorder %s429_s14, %s429_s14 }
   0x5   :  { %p436_p3 = por %p435_p2, %p434_p1 }
   0x7   :  { %p437_p4 = pnand %p436_p3, %p430_p0 }
   0x9   :  { %440 = shalt.err (!%p437_p4)
}
   0xa   :  { %s444_s15 = smov 192   ;;  %s445_s16 = smov 12  }
   0xb   :  { %22 = dma.hbm_to_vmem [thread:$0]  %s494_s1, 3072, %s17_s13, [#allocation3], %s444_s15, %s444_s15, %s445_s16  }
   0xc   :  { %441 = dma.done.wait [#allocation3], 3072  }
   0xd   :  { %442 = vsyncadd [#allocation3], 4294964224  ;;  %v446_v0 = vmov 0.0   ;;  %vm447_vm0 = vmmov 0   ;;  %v448_v1 = vmov 0   ;;  %v29_v25 = vld [vmem:[%s493_s0] sm:$0xff]  ;;  %v66_v29 = vlaneseq }
   0xe   :  { %363 = vmatprep.subr.bf16.mxu1 %v446_v0  ;;  %379 = vmatprep.mubr.msk.bf16.mxu1 %vm447_vm0, %v446_v0  ;;  %v389_v2 = vld [vmem:[#allocation2 + $0xac] ss:$12 sps:$4 sm:$0xff]   ;;  %v391_v3 = vld [vmem:[#allocation2 + $0xb0] ss:$12 sps:$4 sm:$0xff]   ;;  %v392_v4 = vld [vmem:[#allocation2 + $0xa8] ss:$12 sps:$4 sm:$0xff]  }
   0xf   :  { %241 = vmatprep.mubr.bf16.mxu0 %v448_v1  ;;  %209 = vmatprep.subr.bf16.mxu0 %v389_v2  ;;  %v393_v5 = vld [vmem:[#allocation2 + $0x94] ss:$12 sps:$4 sm:$0xff]   ;;  %v395_v6 = vld [vmem:[#allocation2 + $0x98] ss:$12 sps:$4 sm:$0xff]   ;;  %v396_v7 = vld [vmem:[#allocation2 + $0x90] ss:$12 sps:$4 sm:$0xff]  }
  0x10   :  { %364 = vmatpush3.bf16.msra.mxu1 %v391_v3  ;;  %210 = vmatpush1.bf16.msra.mxu0 %v392_v4  ;;  %v397_v8 = vld [vmem:[#allocation2 + $0x7c] ss:$12 sps:$4 sm:$0xff]   ;;  %v399_v9 = vld [vmem:[#allocation2 + $0x80] ss:$12 sps:$4 sm:$0xff]   ;;  %v400_v10 = vld [vmem:[#allocation2 + $0x78] ss:$12 sps:$4 sm:$0xff]  }
  0x11   :  { %365 = vmatprep.subr.bf16.mxu1 %v446_v0  ;;  %211 = vmatprep.subr.bf16.mxu0 %v393_v5  ;;  %v401_v11 = vld [vmem:[#allocation2 + $0x64] ss:$12 sps:$4 sm:$0xff]   ;;  %v403_v12 = vld [vmem:[#allocation2 + $0x68] ss:$12 sps:$4 sm:$0xff]   ;;  %v404_v13 = vld [vmem:[#allocation2 + $0x60] ss:$12 sps:$4 sm:$0xff]  }
  0x12   :  { %v405_v14 = vld [vmem:[#allocation2 + $0x4c] ss:$12 sps:$4 sm:$0xff]   ;;  %v407_v15 = vld [vmem:[#allocation2 + $0x50] ss:$12 sps:$4 sm:$0xff]   ;;  %v408_v16 = vld [vmem:[#allocation2 + $0x48] ss:$12 sps:$4 sm:$0xff]  }
  0x13   :  { %v409_v17 = vld [vmem:[#allocation2 + $0x34] ss:$12 sps:$4 sm:$0xff]   ;;  %v411_v18 = vld [vmem:[#allocation2 + $0x38] ss:$12 sps:$4 sm:$0xff]   ;;  %v412_v19 = vld [vmem:[#allocation2 + $0x30] ss:$12 sps:$4 sm:$0xff]  }
  0x14   :  { %366 = vmatpush3.bf16.msra.mxu1 %v395_v6  ;;  %212 = vmatpush1.bf16.msra.mxu0 %v396_v7  ;;  %v413_v20 = vld [vmem:[#allocation2 + $0x1c] ss:$12 sps:$4 sm:$0xff]   ;;  %v415_v21 = vld [vmem:[#allocation2 + $0x20] ss:$12 sps:$4 sm:$0xff]   ;;  %v416_v22 = vld [vmem:[#allocation2 + $0x18] ss:$12 sps:$4 sm:$0xff]  }
  0x15   :  { %367 = vmatprep.subr.bf16.mxu1 %v446_v0  ;;  %213 = vmatprep.subr.bf16.mxu0 %v397_v8  ;;  %v417_v23 = vld [vmem:[#allocation2 + $0x4] ss:$12 sps:$4 sm:$0xff]   ;;  %v419_v24 = vld [vmem:[#allocation2 + $0x8] ss:$12 sps:$4 sm:$0xff]   ;;  %v420_v27 = vld [vmem:[#allocation2] ss:$12 sps:$4 sm:$0xff]  }
  0x16   :  { %v30_v26 = vld [vmem:[%s493_s0 + $0x8] sm:$0xff]  ;;  %v67_v30 = vshrl.u32 %v66_v29, 7  ;;  %v64_v32 = vld [vmem:[%s495_s2] sm:$0x7] }
  0x17   :  { %v31_v28 = vpack.c.bf16 %v30_v26, %v29_v25 }
  0x18   :  { %368 = vmatpush3.bf16.msra.mxu1 %v399_v9  ;;  %214 = vmatpush1.bf16.msra.mxu0 %v400_v10  ;;  %v76_v31 = vsub.s32 2, %v67_v30  ;;  %v68_v33 = vsub.s32 0, %v67_v30  ;;  %v72_v34 = vsub.s32 1, %v67_v30 }
  0x19   :  { %369 = vmatprep.subr.bf16.mxu1 %v446_v0  ;;  %215 = vmatprep.subr.bf16.mxu0 %v401_v11 }
  0x1a   :  { %v77_v35 = vrot.slane %v64_v32, %v76_v31  ;;  %v69_v37 = vrot.slane %v64_v32, %v68_v33  ;;  %v73_v38 = vrot.slane %v64_v32, %v72_v34 }
  0x1c   :  { %370 = vmatpush3.bf16.msra.mxu1 %v403_v12  ;;  %216 = vmatpush1.bf16.msra.mxu0 %v404_v13 }
  0x1d   :  { %371 = vmatprep.subr.bf16.mxu1 %v446_v0  ;;  %217 = vmatprep.subr.bf16.mxu0 %v405_v14 }
  0x20   :  { %372 = vmatpush3.bf16.msra.mxu1 %v407_v15  ;;  %218 = vmatpush1.bf16.msra.mxu0 %v408_v16 }
  0x21   :  { %373 = vmatprep.subr.bf16.mxu1 %v446_v0  ;;  %219 = vmatprep.subr.bf16.mxu0 %v409_v17 }
  0x24   :  { %374 = vmatpush3.bf16.msra.mxu1 %v411_v18  ;;  %220 = vmatpush1.bf16.msra.mxu0 %v412_v19 }
  0x25   :  { %375 = vmatprep.subr.bf16.mxu1 %v446_v0  ;;  %221 = vmatprep.subr.bf16.mxu0 %v413_v20 }
  0x28   :  { %376 = vmatpush3.bf16.msra.mxu1 %v415_v21  ;;  %222 = vmatpush1.bf16.msra.mxu0 %v416_v22 }
  0x29   :  { %377 = vmatprep.subr.bf16.mxu1 %v446_v0  ;;  %223 = vmatprep.subr.bf16.mxu0 %v417_v23 }
  0x2c   :  { %378 = vmatpush3.bf16.msra.mxu1 %v419_v24  ;;  %224 = vmatpush1.bf16.msra.mxu0 %v420_v27 }
  0x2f   :  { %380 = vmatmul.mubr.bf16.vlgmr.msra.gmra.mxu1 %v31_v28  ;;  %242 = vmatmul.mubr.bf16.vlgmr.msra.gmra.mxu0 %v31_v28 }
  0xef   :  { %v286_v36 = vpop.f32.mrf.mxu1  ;;  %v243_v40 = vpop.f32.mrf.mxu0 }
  0xf0   :  { %v287_v39 = vadd.f32 %v286_v36, %v77_v35  ;;  %v244_v44 = vadd.f32 %v243_v40, %v69_v37 }
  0xf1   :  { %v381_v41 = vpop.f32.mrf.mxu1  ;;  %v245_v43 = vpop.f32.mrf.mxu0 }
  0xf2   :  { %v351_v42 = vpack.c.bf16 %v287_v39, %v287_v39  ;;  %v246_v45 = vadd.f32 %v245_v43, %v73_v38 }
  0xf3   :  { %v289_v46 = vpop.f32.mrf.mxu1  ;;  %v247_v48 = vpop.f32.mrf.mxu0 }
  0xf4   :  { %314 = vst [vmem:[%s496_s3 + $0x8] sm:$0xf] %v351_v42  ;;  %v290_v47 = vadd.f32 %v289_v46, %v77_v35  ;;  %v350_v49 = vpack.c.bf16 %v246_v45, %v244_v44  ;;  %v248_v53 = vadd.f32 %v247_v48, %v69_v37 }
  0xf5   :  { %v382_v50 = vpop.f32.mrf.mxu1  ;;  %v249_v52 = vpop.f32.mrf.mxu0 }
  0xf6   :  { %v353_v51 = vpack.c.bf16 %v290_v47, %v290_v47  ;;  %313 = vst [vmem:[%s496_s3] sm:$0xff] %v350_v49  ;;  %v250_v54 = vadd.f32 %v249_v52, %v73_v38 }
  0xf8   :  { %316 = vst [vmem:[%s496_s3 + $0x14] sm:$0xf] %v353_v51  ;;  %v352_v55 = vpack.c.bf16 %v250_v54, %v248_v53 }
  0xfa   :  { %315 = vst [vmem:[%s496_s3 + $0xc] sm:$0xff] %v352_v55 }
  0xfb   :  { %321 = vsyncpa [#allocation3], 1 }

// kernel: encoder_forward.11
= control target key start
LH: loop header
LB: loop body
LE: loop exit
PB: predicated region body
PF: predicated region fallthrough
CT: control target
= control target key end

     0   :  { %9 = vsyncpa [#allocation3], 0  ;;  %s1543_s0 = inlined_call_operand.hbm [shape: f32[2,1,8], index: 0, kind: input, shape index: {}]   ;;  %s1544_s1 = inlined_call_operand.vmem [shape: bf16[2,8,384], index: 1, kind: input, shape index: {}, may-alias: {1,2,3}]   ;;  %s1545_s2 = inlined_call_operand.vmem [shape: bf16[2,8,384], index: 2, kind: input, shape index: {}, may-alias: {1,2,3}]   ;;  %s1546_s3 = inlined_call_operand.vmem [shape: bf16[2,8,384], index: 3, kind: input, shape index: {}, may-alias: {1,2,3}]   ;;  %s1547_s4 = inlined_call_operand.vmem [shape: bf16[2,8,128], index: 4, kind: output, shape index: {}]  }
   0x1   :  { %11 = vsyncpa [#allocation3 + $0x1], 0  ;;  %s1336_s15 = smov 0   ;;  %s1338_s16 = smov 0  }
   0x2   :  { %s1340_s17 = smov 0   ;;  %s1342_s18 = smov 0  }
   0x3   :  { %s1344_s19 = smov 0   ;;  %s1346_s20 = smov 0  }
   0x4 LB: > { %s1033_s21 = sadd.s32 4294967295, %s1303_s20   ;;  %s36_s22 = sadd.s32 1, %s1299_s19  ;;  %s1303_s20 = sphi %s1346_s20, %s17_s20   ;;  %s1299_s19 = sphi %s1344_s19, %s1555_s19   ;;  %s1295_s18 = sphi %s1342_s18, %s1554_s18   ;;  %s1291_s17 = sphi %s1340_s17, %s1553_s17   ;;  %s1287_s16 = sphi %s1338_s16, %s1552_s16   ;;  %s1283_s15 = sphi %s1336_s15, %s1551_s15  }
   0x5   : > { %p38_p0 = scmp.ge.s32.totalorder %s36_s22, 2  ;;  %s43_s23 = sadd.s32 1, %s1291_s17 }
   0x6   : > { %p50_p1 = scmp.ne.s32.totalorder %s1291_s17, %s1287_s16  ;;  %p51_p2 = scmp.eq.s32.totalorder %s1303_s20, 0 }
   0x7   : > { %s1557_s22 = smov (%p38_p0, %s36_s22), 0  ;;  %p56_p4 = scmp.ne.s32.totalorder %s1287_s16, %s1283_s15 }
   0x8   : > { %p1372_p3 = por %p51_p2, %p50_p1  ;;  %s40_s25 = ssub.s32 %s1299_s19, %s1557_s22 }
   0x9   : > { %p57_p5 = scmp.eq.s32.totalorder %s1033_s21, 0  ;;  %p41_p6 = scmp.eq.s32.totalorder %s40_s25, 0 }
   0xa   : > { %p1145_p8 = scmp.lt.s32.totalorder %s1303_s20, 2  ;;  %s200_s28 = sand.u32 1, %s1291_s17  }
   0xb   : > { %p1379_p7 = por %p57_p5, %p56_p4  ;;  %s1037_s29 = sshll.u32 %s1299_s19, 4 }
   0xc   : > { %s1385_s27 = scalar_select %p41_p6, %s1291_s17, %s43_s23  }
   0xd   : > { %s208_s6 = scalar_lea.hbm %s1543_s0, %s1037_s29  ;;  %s203_s7 = scalar_lea.vmem [#allocation2], %s200_s28 }
   0xe   : > { %s210_s8 = sshll.u32 %s203_s7, 4  ;;  %p1394_p9 = pnand %p1145_p8, %p1372_p3  ;;  %s211_s8 = int_to_ptr.vmem [resolvable:$true] %s210_s8 }
   0xf   : > { %p1038_p10 = scmp.ge.s32.totalorder %s1303_s20, 1  ;;  %p256_p11 = scmp.lt.s32.totalorder %s1303_s20, 3 }
  0x10   : > { %s201_s10 = scalar_lea.sflag [#allocation3], %s200_s28  ;;  %p1227_p12 = pneg %p1394_p9 }
  0x11   : > { %s1238_s11 = scalar_lea.vmem %s211_s8, 16  ;;  %s1305_s12 = smov [#allocation2]  }
  0x12   : > { %p1239_p13 = scmp.ne.s32.totalorder %s211_s8, %s1238_s11  ;;  %s1243_s13 = sshll.u32 %s1305_s12, 4  ;;  %s1244_s13 = int_to_ptr.vmem [resolvable:$false] %s1243_s13 }
  0x13   : > { %s1245_s14 = scalar_lea.vmem %s1244_s13, 32  ;;  %p1246_p2 = scmp.lt.s32.totalorder %s211_s8, %s1244_s13 }
  0x14   : > { %p1241_p0 = pnand %p1239_p13, %p1227_p12  ;;  %p1247_p4 = scmp.lt.s32.totalorder %s1245_s14, %s1238_s11 }
  0x16   : > { %p1242_p1 = pneg %p1241_p0  ;;  %p1248_p3 = por %p1247_p4, %p1246_p2 }
  0x18   : > { %p1249_p5 = pnand %p1248_p3, %p1242_p1 }
  0x1a   : > { %1252 = shalt.err (!%p1249_p5)
}
  0x1b   : > { %1144 = dma.hbm_to_vmem [thread:$0]  (!%p1394_p9), %s208_s6, 16, %s211_s8, %s201_s10  }
  0x1c   : > { %p257_p6 = pnand %p1038_p10, %p256_p11 }
  0x1d   : > { %s262_s15 = sand.u32 (!%p257_p6), 1, %s1287_s16  }
  0x1e   : > { %260 = sbr.rel (%p257_p6) target bundleno = 1134 (0x46e), region = 36  ;;  %s263_s21 = scalar_lea.sflag (!%p257_p6), [#allocation3], %s262_s15 }
  0x1f   : > { %s1409_s23 = scalar_lea.vmem (!%p257_p6), [#allocation2], %s262_s15 }
  0x23   : > { %1278 = dma.done.wait (%p1379_p7), %s263_s21, 16  }
  0x24   : > { %1280 = vsyncadd (%p1379_p7), %s263_s21, 4294967280  ;;  %p324_p8 = scmp.lt.s32.totalorder %s1295_s18, 1  ;;  %v1306_v0 = vmov 0.0   ;;  %vm1307_vm0 = vmmov 0   ;;  %vm377_vm1 = vcmask 261120   ;;  %s1308_s7 = smov 96  }
  0x25   : > { %1089 = vmatprep.subr.bf16.mxu0 %v1306_v0  ;;  %1091 = vmatprep.mubr.msk.bf16.mxu0 %vm1307_vm0, %v1306_v0  ;;  %s1309_s8 = smov 64   ;;  %s1310_s9 = smov 32   ;;  %v1452_v9 = vld [vmem:[%s1409_s23] ss:$0 sm:$0xff]  ;;  %vm424_vm2 = vcmask 64512   ;;  %vm438_vm3 = vcmask 1043456  }
  0x26   : > { %s1559_s18 = smov (!%p324_p8, %s1295_s18), 1  ;;  %1095 = vmatprep.subr.bf16.mxu1 %v1306_v0  ;;  %1097 = vmatprep.mubr.msk.bf16.mxu1 %vm1307_vm0, %v1306_v0  ;;  %vm485_vm4 = vcmask 257024   ;;  %vm616_vm5 = vcmask 519424   ;;  %vm747_vm6 = vcmask 781824   ;;  %vm878_vm7 = vcmask 1044224  }
  0x27   : > { %s1426_s24 = smul.u32 12, %s1559_s18  ;;  %s1042_s14 = sshll.u32 %s1559_s18, 2 }
  0x28   : > { %s365_s23 = scalar_lea.vmem %s1547_s4, %s1042_s14 }
  0x29   : > { %s1067_s25 = sadd.s32 4, %s1426_s24  ;;  %s335_s29 = scalar_lea.vmem %s1544_s1, %s1426_s24 }
  0x2a   : > { %s1436_s6 = scalar_lea.vmem %s1545_s2, %s1067_s25  ;;  %v368_v3 = vld [vmem:[%s335_s29] sm:$0xf]  ;;  %s1069_s10 = sadd.s32 8, %s1426_s24 }
  0x2b   : > { %v369_v1 = vld [vmem:[%s1436_s6] sm:$0xf]  ;;  %s1460_s13 = scalar_lea.vmem %s1546_s3, %s1069_s10 }
  0x2c   : > { %v382_v2 = vsel %vm377_vm1, %v369_v1, 0  ;;  %v1201_v4 = vld [vmem:[%s335_s29] ss:$0 sps:$4 sm:$0xff]  }
  0x2d   : > { %1090 = vmatpush3.bf16.xpose.msra.mxu0 %v382_v2  ;;  %493 = vrot.lane.b32.xlu1 %v1201_v4, %s1308_s7  ;;  %v1202_v5 = vld [vmem:[%s1436_s6] ss:$0 sps:$4 sm:$0xff]  }
  0x2e   : > { %1107 = vmatprep.subr.bf16.mxu0 %v1306_v0  ;;  %v1203_v6 = vld [vmem:[%s335_s29] ss:$0 sps:$4 sm:$0xff]  }
  0x2f   : > { %v1204_v7 = vld [vmem:[%s1436_s6] ss:$0 sps:$4 sm:$0xff]  }
  0x30   : > { %v1205_v8 = vld [vmem:[%s335_s29] ss:$0 sps:$4 sm:$0xff]  }
  0x31   : > { %629 = vrot.lane.b32.xlu1 %v1202_v5, %s1309_s8  ;;  %v370_v16 = vld [vmem:[%s1460_s13] sm:$0xf] }
  0x32   : > { %v440_v17 = vsel %vm438_vm3, %v370_v16, 0  ;;  %v1200_v18 = vld [vmem:[%s1436_s6] ss:$0 sps:$4 sm:$0xff]  }
  0x33   : > { %1096 = vmatpush3.bf16.msra.mxu1 %v440_v17  ;;  %v1206_v50 = vld [vmem:[%s1460_s13] ss:$0 sps:$4 sm:$0xff]  }
  0x34   : > { %1092 = vmatmul.mubr.msk.bf16.vlgmr.msra.gmra.mxu0 %vm377_vm1, %v368_v3  ;;  %1101 = vmatprep.subr.bf16.mxu1 %v1306_v0  ;;  %v1207_v54 = vld [vmem:[%s1460_s13] ss:$0 sps:$4 sm:$0xff]  }
  0x35   : > { %1109 = vmatprep.mubr.msk.bf16.mxu0 %vm1307_vm0, %v1306_v0  ;;  %624 = vrot.lane.b32.xlu1 %v1203_v6, %s1309_s8  ;;  %v1208_v57 = vld [vmem:[%s1460_s13] ss:$0 sps:$4 sm:$0xff]  }
  0x39   : > { %760 = vrot.lane.b32.xlu1 %v1204_v7, %s1310_s9 }
  0x3d   : > { %755 = vrot.lane.b32.xlu1 %v1205_v8, %s1310_s9 }
  0x9f   : > { %v494_v24 = vpop.permute.xlu1 %493 }
  0xa3   : > { %v630_v27 = vpop.permute.xlu1 %629 }
  0xa4   : > { %v635_v28 = vsel %vm377_vm1, %v630_v27, 0 }
  0xa7   : > { %v625_v29 = vpop.permute.xlu1 %624 }
  0xab   : > { %v761_v30 = vpop.permute.xlu1 %760 }
  0xac   : > { %v766_v31 = vsel %vm377_vm1, %v761_v30, 0 }
  0xaf   : > { %v756_v32 = vpop.permute.xlu1 %755 }
  0xf4   : > { %v418_v10 = vpop.f32.mrf.mxu0 }
  0xf5   : > { %v419_v11 = vadd.f32 %v1452_v9, %v418_v10 }
  0xf6   : > { %v1093_v12 = vpop.f32.mrf.mxu0 }
  0xf7   : > { %v425_v13 = vsel %vm424_vm2, %v419_v11, -inf }
  0xf8   : > { %v421_v14 = vpop.f32.mrf.mxu0  ;;  %426 = vmax.xlane.f32.xlu0 %v425_v13 }
  0xfa   : > { %v1094_v15 = vpop.f32.mrf.mxu0 }
 0x10e   : > { %498 = vrot.lane.b32.xlu0 %v1200_v18, %s1308_s7 }
 0x181   : > { %v427_v19 = vpop.xlane.xlu0 %426 }
 0x182   : > { %v428_v20 = vsub.f32 %v419_v11, %v427_v19 }
 0x184   : > { %v429_v21 = vmul.f32 1.442695, %v428_v20 }
 0x185   : > { %v499_v22 = vpop.permute.xlu0 %498 }
 0x186   : > { %1209 = vpow2.f32 %v429_v21  ;;  %v504_v25 = vsel %vm377_vm1, %v499_v22, 0 }
 0x193   : > { %v1467_v23 = vpop.eup %1209 }
 0x194   : > { %v434_v26 = vpack.c.bf16 %v1467_v23, %v1467_v23  ;;  %v431_v19 = vsel %vm424_vm2, %v1467_v23, 0.0 }
 0x196   : > { %1098 = vmatmul.mubr.msk.bf16.vlgmr.msra.gmra.mxu1 %vm424_vm2, %v434_v26 }
 0x197   : > { %1102 = vmatpush3.bf16.xpose.msra.mxu1 %v504_v25  ;;  %1103 = vmatprep.mubr.msk.bf16.mxu1 %vm1307_vm0, %v1306_v0 }
 0x198   : > { %1113 = vmatprep.subr.bf16.mxu1 %v1306_v0 }
 0x19e   : > { %1104 = vmatmul.mubr.msk.bf16.vlgmr.msra.gmra.mxu1 %vm377_vm1, %v494_v24 }
 0x19f   : > { %1114 = vmatpush3.bf16.xpose.msra.mxu1 %v635_v28  ;;  %1115 = vmatprep.mubr.msk.bf16.mxu1 %vm1307_vm0, %v1306_v0 }
 0x1a0   : > { %1125 = vmatprep.subr.bf16.mxu1 %v1306_v0 }
 0x1a6   : > { %1116 = vmatmul.mubr.msk.bf16.vlgmr.msra.gmra.mxu1 %vm377_vm1, %v625_v29 }
 0x1a7   : > { %1126 = vmatpush3.bf16.xpose.msra.mxu1 %v766_v31  ;;  %1127 = vmatprep.mubr.msk.bf16.mxu1 %vm1307_vm0, %v1306_v0 }
 0x1ae   : > { %1128 = vmatmul.mubr.msk.bf16.vlgmr.msra.gmra.mxu1 %vm377_vm1, %v756_v32 }
 0x256   : > { %v1486_v33 = vpop.f32.mrf.mxu1 }
 0x258   : > { %v1099_v34 = vpop.f32.mrf.mxu1 }
 0x25a   : > { %v479_v35 = vpop.f32.mrf.mxu1 }
 0x25c   : > { %v1100_v36 = vpop.f32.mrf.mxu1 }
 0x25e   : > { %v540_v37 = vpop.f32.mrf.mxu1 }
 0x25f   : > { %v541_v38 = vadd.f32 %v1452_v9, %v540_v37 }
 0x260   : > { %v1105_v39 = vpop.f32.mrf.mxu1 }
 0x261   : > { %v546_v40 = vsel %vm424_vm2, %v541_v38, -inf }
 0x262   : > { %547 = vmax.xlane.f32.xlu1 %v546_v40  ;;  %v543_v41 = vpop.f32.mrf.mxu1 }
 0x264   : > { %v1106_v42 = vpop.f32.mrf.mxu1 }
 0x266   : > { %v671_v43 = vpop.f32.mrf.mxu1 }
 0x267   : > { %v672_v44 = vadd.f32 %v1452_v9, %v671_v43 }
 0x268   : > { %v1117_v45 = vpop.f32.mrf.mxu1 }
 0x269   : > { %v677_v46 = vsel %vm424_vm2, %v672_v44, -inf }
 0x26a   : > { %678 = vmax.xlane.f32.xlu0 %v677_v46  ;;  %v674_v47 = vpop.f32.mrf.mxu1 }
 0x26c   : > { %v1118_v48 = vpop.f32.mrf.mxu1 }
 0x26e   : > { %v802_v49 = vpop.f32.mrf.mxu1 }
 0x26f   : > { %v803_v55 = vadd.f32 %v1452_v9, %v802_v49 }
 0x270   : > { %v1129_v51 = vpop.f32.mrf.mxu1 }
 0x271   : > { %v808_v56 = vsel %vm424_vm2, %v803_v55, -inf }
 0x272   : > { %v805_v52 = vpop.f32.mrf.mxu1 }
 0x273   : > { %690 = vrot.lane.b32.xlu1 %v1206_v50, %s1309_s8 }
 0x274   : > { %v1130_v53 = vpop.f32.mrf.mxu1 }
 0x280   : > { %559 = vrot.lane.b32.xlu0 %v1207_v54, %s1308_s7 }
 0x297   : > { %809 = vmax.xlane.f32.xlu1 %v808_v56 }
 0x2a8   : > { %821 = vrot.lane.b32.xlu1 %v1208_v57, %s1310_s9 }
 0x2eb   : > { %v548_v58 = vpop.xlane.xlu1 %547 }
 0x2ec   : > { %v549_v59 = vsub.f32 %v541_v38, %v548_v58 }
 0x2ee   : > { %v550_v60 = vmul.f32 1.442695, %v549_v59 }
 0x2ef   : > { %v691_v4 = vpop.permute.xlu1 %690 }
 0x2f0   : > { %1211 = vpow2.f32 %v550_v60  ;;  %v696_v7 = vsel %vm438_vm3, %v691_v4, 0 }
 0x2f3   : > { %v679_v61 = vpop.xlane.xlu0 %678 }
 0x2f4   : > { %v680_v62 = vsub.f32 %v672_v44, %v679_v61 }
 0x2f6   : > { %v681_v63 = vmul.f32 1.442695, %v680_v62 }
 0x2f7   : > { %v560_v1 = vpop.permute.xlu0 %559 }
 0x2f8   : > { %1213 = vpow2.f32 %v681_v63  ;;  %v565_v2 = vsel %vm438_vm3, %v560_v1, 0 }
 0x2f9   : > { %1108 = vmatpush3.bf16.msra.mxu0 %v565_v2 }
 0x2fa   : > { %1119 = vmatprep.subr.bf16.mxu0 %v1306_v0 }
 0x2fd   : > { %v1212_v3 = vpop.eup %1211 }
 0x2fe   : > { %v552_v5 = vsel %vm424_vm2, %v1212_v3, 0.0  ;;  %v555_v6 = vpack.c.bf16 %v1212_v3, %v1212_v3 }
 0x2ff   : > { %553 = vadd.xlane.f32.xlu0 %v552_v5 }
 0x300   : > { %1110 = vmatmul.mubr.msk.bf16.vlgmr.msra.gmra.mxu0 %vm424_vm2, %v555_v6 }
 0x301   : > { %1120 = vmatpush3.bf16.msra.mxu0 %v696_v7  ;;  %1121 = vmatprep.mubr.msk.bf16.mxu0 %vm1307_vm0, %v1306_v0 }
 0x302   : > { %1131 = vmatprep.subr.bf16.mxu0 %v1306_v0 }
 0x305   : > { %v1214_v8 = vpop.eup %1213 }
 0x306   : > { %v683_v9 = vsel %vm424_vm2, %v1214_v8, 0.0  ;;  %v686_v10 = vpack.c.bf16 %v1214_v8, %v1214_v8 }
 0x307   : > { %684 = vadd.xlane.f32.xlu1 %v683_v9 }
 0x308   : > { %1122 = vmatmul.mubr.msk.bf16.vlgmr.msra.gmra.mxu0 %vm424_vm2, %v686_v10 }
 0x309   : > { %1133 = vmatprep.mubr.msk.bf16.mxu0 %vm1307_vm0, %v1306_v0 }
 0x320   : > { %v810_v11 = vpop.xlane.xlu1 %809 }
 0x321   : > { %v811_v12 = vsub.f32 %v803_v55, %v810_v11 }
 0x323   : > { %v812_v13 = vmul.f32 1.442695, %v811_v12 }
 0x324   : > { %v822_v14 = vpop.permute.xlu1 %821 }
 0x325   : > { %1215 = vpow2.f32 %v812_v13  ;;  %v827_v15 = vsel %vm438_vm3, %v822_v14, 0 }
 0x326   : > { %1132 = vmatpush3.bf16.msra.mxu0 %v827_v15 }
 0x332   : > { %v1216_v16 = vpop.eup %1215 }
 0x333   : > { %v814_v17 = vsel %vm424_vm2, %v1216_v16, 0.0  ;;  %v817_v18 = vpack.c.bf16 %v1216_v16, %v1216_v16 }
 0x334   : > { %815 = vadd.xlane.f32.xlu0 %v814_v17 }
 0x335   : > { %1134 = vmatmul.mubr.msk.bf16.vlgmr.msra.gmra.mxu0 %vm424_vm2, %v817_v18 }
 0x338   : > { %432 = vadd.xlane.f32.xlu0 %v431_v19 }
 0x388   : > { %v554_v0 = vpop.xlane.xlu0 %553 }
 0x389   : > { %1217 = vrcp.f32 %v554_v0 }
 0x390   : > { %v685_v20 = vpop.xlane.xlu1 %684 }
 0x391   : > { %1219 = vrcp.f32 %v685_v20 }
 0x396   : > { %v1218_v22 = vpop.eup %1217 }
 0x39e   : > { %v1220_v31 = vpop.eup %1219 }
 0x3bd   : > { %v816_v21 = vpop.xlane.xlu0 %815 }
 0x3c0   : > { %v601_v24 = vpop.f32.mrf.mxu0 }
 0x3c1   : > { %v608_v25 = vmul.f32 %v1218_v22, %v601_v24  ;;  %v433_v26 = vpop.xlane.xlu0 %432 }
 0x3c2   : > { %1221 = vrcp.f32 %v433_v26  ;;  %v1111_v27 = vpop.f32.mrf.mxu0 }
 0x3c3   : > { %v1070_v28 = vpack.c.bf16 %v608_v25, %v608_v25  ;;  %1223 = vrcp.f32 %v816_v21 }
 0x3c4   : > { %v604_v29 = vpop.f32.mrf.mxu0 }
 0x3c5   : > { %613 = vrot.lane.b32.xlu1 %v1070_v28, %s1310_s9 }
 0x3c6   : > { %v1112_v30 = vpop.f32.mrf.mxu0 }
 0x3c8   : > { %v732_v23 = vpop.f32.mrf.mxu0 }
 0x3c9   : > { %v739_v32 = vmul.f32 %v1220_v31, %v732_v23 }
 0x3ca   : > { %v1123_v34 = vpop.f32.mrf.mxu0 }
 0x3cb   : > { %v1071_v35 = vpack.c.bf16 %v739_v32, %v739_v32 }
 0x3cc   : > { %v735_v36 = vpop.f32.mrf.mxu0 }
 0x3cd   : > { %744 = vrot.lane.b32.xlu0 %v1071_v35, %s1309_s8 }
 0x3ce   : > { %v1124_v37 = vpop.f32.mrf.mxu0 }
 0x3cf   : > { %v1222_v38 = vpop.eup %1221 }
 0x3d0   : > { %v483_v39 = vmul.f32 %v1222_v38, %v1486_v33  ;;  %v1224_v41 = vpop.eup %1223 }
 0x3d2   : > { %v484_v40 = vpack.c.bf16 %v483_v39, %v483_v39 }
 0x3d4   : > { %486 = vst.msk [vmem:[%s365_s23] sm:$0xf] %vm485_vm4, %v484_v40 }
 0x3f5   : > { %v863_v42 = vpop.f32.mrf.mxu0 }
 0x3f6   : > { %v870_v43 = vmul.f32 %v1224_v41, %v863_v42 }
 0x3f7   : > { %v1135_v44 = vpop.f32.mrf.mxu0 }
 0x3f8   : > { %v1072_v45 = vpack.c.bf16 %v870_v43, %v870_v43 }
 0x3f9   : > { %v866_v46 = vpop.f32.mrf.mxu0 }
 0x3fa   : > { %875 = vrot.lane.b32.xlu1 %v1072_v45, %s1308_s7 }
 0x3fb   : > { %v1136_v47 = vpop.f32.mrf.mxu0 }
 0x437   : > { %v614_v48 = vpop.permute.xlu1 %613 }
 0x438   : > { %617 = vst.msk [vmem:[%s365_s23] sm:$0xf] %vm616_vm5, %v614_v48 }
 0x43f   : > { %v745_v33 = vpop.permute.xlu0 %744 }
 0x440   : > { %748 = vst.msk [vmem:[%s365_s23] sm:$0xf] %vm747_vm6, %v745_v33 }
 0x46c   : > { %v876_v49 = vpop.permute.xlu1 %875 }
 0x46d   : > { %879 = vst.msk [vmem:[%s365_s23] sm:$0xf] %vm878_vm7, %v876_v49 }
 0x46e PF: > { %s17_s20 = sadd.s32 1, %s1303_s20   ;;  %s1551_s15 = smov %s1287_s16 }
 0x46f   : > { %p14_p7 = scmp.ge.s32.totalorder %s17_s20, 4   ;;  %s1552_s16 = smov %s1291_s17 }
 0x470   : > { %s1553_s17 = smov %s1385_s27  ;;  %s1554_s18 = smov %s1299_s19 }
 0x471   : > { %s1555_s19 = smov %s1557_s22  ;;  %16 = sbr.rel (!%p14_p7) target bundleno = 4 (0x4), region = 85 }
 0x476   :  { %911 = vsyncpa [#allocation3], 1 }
 0x477   :  { %913 = vsyncpa [#allocation3 + $0x1], 1 }

// kernel: encoder_forward.12
= control target key start
LH: loop header
LB: loop body
LE: loop exit
PB: predicated region body
PF: predicated region fallthrough
CT: control target
= control target key end

     0   :  { %11 = vsyncpa [#allocation3], 0  ;;  %s428_s0 = inlined_call_operand.vmem [shape: bf16[16,128], index: 0, kind: input, shape index: {}]   ;;  %s429_s1 = inlined_call_operand.hbm [shape: bf16[128,128], index: 1, kind: input, shape index: {}]   ;;  %s430_s2 = inlined_call_operand.vmem [shape: f32[1,128], index: 2, kind: input, shape index: {}]   ;;  %s431_s3 = inlined_call_operand.vmem [shape: f32[16,128], index: 3, kind: input, shape index: {}]   ;;  %s432_s4 = inlined_call_operand.hbm [shape: f32[1,128], index: 4, kind: input, shape index: {}]   ;;  %s433_s5 = inlined_call_operand.hbm [shape: f32[1,128], index: 5, kind: input, shape index: {}]   ;;  %s434_s6 = inlined_call_operand.vmem [shape: f32[16,128], index: 6, kind: output, shape index: {}]  }
   0x1   :  { %12 = vsyncpa [#allocation5], 0  ;;  %s359_s21 = smov [#allocation4]   ;;  %s360_s23 = smov [#allocation2]  }
   0x2   :  { %s37_s22 = sshll.u32 %s359_s21, 4  ;;  %s20_s24 = sshll.u32 %s360_s23, 4  ;;  %s38_s22 = int_to_ptr.vmem [resolvable:$true] %s37_s22  ;;  %s21_s24 = int_to_ptr.vmem [resolvable:$true] %s20_s24 }
   0x3   :  { %s303_s25 = scalar_lea.vmem %s38_s22, 16  ;;  %s307_s26 = scalar_lea.vmem %s38_s22, 32 }
   0x4   :  { %p304_p0 = scmp.ne.s32.totalorder %s38_s22, %s303_s25  ;;  %p308_p1 = scmp.lt.s32.totalorder %s38_s22, %s38_s22 }
   0x5   :  { %p309_p2 = scmp.lt.s32.totalorder %s307_s26, %s303_s25 }
   0x7   :  { %p310_p3 = por %p309_p2, %p308_p1 }
   0x9   :  { %p311_p4 = pnand %p310_p3, %p304_p0 }
   0xb   :  { %314 = shalt.err (!%p311_p4)
}
   0xc   :  { %40 = dma.hbm_to_vmem [thread:$0]  %s432_s4, 16, %s38_s22, [#allocation5]  }
   0xd   :  { %s323_s29 = scalar_lea.vmem %s21_s24, 1024  ;;  %p328_p6 = scmp.lt.s32.totalorder %s21_s24, %s21_s24 }
   0xe   :  { %p324_p5 = scmp.ne.s32.totalorder %s21_s24, %s323_s29  ;;  %p329_p7 = scmp.lt.s32.totalorder %s323_s29, %s323_s29 }
  0x10   :  { %p330_p8 = por %p329_p7, %p328_p6 }
  0x12   :  { %p331_p9 = pnand %p330_p8, %p324_p5 }
  0x14   :  { %334 = shalt.err (!%p331_p9)
}
  0x15   :  { %s361_s30 = smov 64   ;;  %s362_s7 = smov 4  }
  0x16   :  { %26 = dma.hbm_to_vmem [thread:$0]  %s429_s1, 1024, %s21_s24, [#allocation3], %s361_s30, %s361_s30, %s362_s7  }
  0x17   :  { %s363_s10 = smov [#allocation6]  }
  0x18   :  { %s47_s11 = sshll.u32 %s363_s10, 4  ;;  %s48_s11 = int_to_ptr.vmem [resolvable:$true] %s47_s11 }
  0x19   :  { %s343_s12 = scalar_lea.vmem %s48_s11, 16  ;;  %s347_s13 = scalar_lea.vmem %s48_s11, 32 }
  0x1a   :  { %p344_p10 = scmp.ne.s32.totalorder %s48_s11, %s343_s12  ;;  %p348_p11 = scmp.lt.s32.totalorder %s48_s11, %s48_s11 }
  0x1b   :  { %p349_p12 = scmp.lt.s32.totalorder %s347_s13, %s343_s12 }
  0x1d   :  { %p350_p13 = por %p349_p12, %p348_p11 }
  0x1f   :  { %p351_p0 = pnand %p350_p13, %p344_p10 }
  0x21   :  { %354 = shalt.err (!%p351_p0)
}
  0x22   :  { %50 = dma.hbm_to_vmem [thread:$0]  %s433_s5, 16, %s48_s11, [#allocation5]  }
  0x23   :  { %355 = dma.done.wait [#allocation3], 1024  }
  0x24   :  { %356 = vsyncadd [#allocation3], 4294966272 }
  0x25   :  { %357 = dma.done.wait [#allocation5], 32  }
  0x26   :  { %358 = vsyncadd [#allocation5], 4294967264  ;;  %v364_v0 = vmov 0.0   ;;  %vm365_vm0 = vmmov 0   ;;  %v282_v1 = vld [vmem:[#allocation2 + $0x38] sm:$0xff]   ;;  %v283_v2 = vld [vmem:[#allocation2 + $0x30] sm:$0xff]  }
  0x27   :  { %255 = vmatprep.subr.bf16.mxu0 %v364_v0  ;;  %271 = vmatprep.mubr.msk.bf16.mxu0 %vm365_vm0, %v364_v0  ;;  %v284_v3 = vld [vmem:[#allocation2 + $0x28] sm:$0xff]   ;;  %v285_v4 = vld [vmem:[#allocation2 + $0x20] sm:$0xff]   ;;  %v286_v5 = vld [vmem:[#allocation2 + $0x18] sm:$0xff]  }
  0x28   :  { %256 = vmatpush3.bf16.msra.mxu0 %v282_v1  ;;  %v287_v6 = vld [vmem:[#allocation2 + $0x10] sm:$0xff]   ;;  %v288_v7 = vld [vmem:[#allocation2 + $0x8] sm:$0xff]   ;;  %v289_v8 = vld [vmem:[#allocation2] sm:$0xff]  }
  0x29   :  { %257 = vmatprep.subr.bf16.mxu0 %v364_v0  ;;  %v290_v9 = vld [vmem:[%s428_s0] sm:$0xff]   ;;  %v182_v17 = vld [vmem:[%s431_s3 + $0x8] sm:$0xff] }
  0x2a   :  { %v234_v10 = vld [vmem:[%s430_s2] ss:$0 sm:$0xff]  ;;  %v245_v38 = vld [vmem:[#allocation6] ss:$0 sm:$0xff] }
  0x2b   :  { %v181_v12 = vld [vmem:[%s431_s3] sm:$0xff] }
  0x2c   :  { %258 = vmatpush3.bf16.msra.mxu0 %v283_v2  ;;  %v244_v36 = vld [vmem:[#allocation4] ss:$0 sm:$0xff] }
  0x2d   :  { %259 = vmatprep.subr.bf16.mxu0 %v364_v0 }
  0x30   :  { %260 = vmatpush3.bf16.msra.mxu0 %v284_v3 }
  0x31   :  { %261 = vmatprep.subr.bf16.mxu0 %v364_v0 }
  0x34   :  { %262 = vmatpush3.bf16.msra.mxu0 %v285_v4 }
  0x35   :  { %263 = vmatprep.subr.bf16.mxu0 %v364_v0 }
  0x38   :  { %264 = vmatpush3.bf16.msra.mxu0 %v286_v5 }
  0x39   :  { %265 = vmatprep.subr.bf16.mxu0 %v364_v0 }
  0x3c   :  { %266 = vmatpush3.bf16.msra.mxu0 %v287_v6 }
  0x3d   :  { %267 = vmatprep.subr.bf16.mxu0 %v364_v0 }
  0x40   :  { %268 = vmatpush3.bf16.msra.mxu0 %v288_v7 }
  0x41   :  { %269 = vmatprep.subr.bf16.mxu0 %v364_v0 }
  0x44   :  { %270 = vmatpush3.bf16.msra.mxu0 %v289_v8 }
  0x47   :  { %272 = vmatmul.mubr.bf16.vlgmr.msra.gmra.mxu0 %v290_v9 }
 0x107   :  { %v174_v11 = vpop.f32.mrf.mxu0 }
 0x108   :  { %v175_v13 = vadd.f32 %v234_v10, %v174_v11 }
 0x109   :  { %v273_v14 = vpop.f32.mrf.mxu0 }
 0x10a   :  { %v183_v15 = vadd.f32 %v181_v12, %v175_v13 }
 0x10b   :  { %v177_v16 = vpop.f32.mrf.mxu0 }
 0x10c   :  { %v178_v18 = vadd.f32 %v234_v10, %v177_v16  ;;  %185 = vadd.xlane.f32.xlu0 %v183_v15 }
 0x10d   :  { %v274_v19 = vpop.f32.mrf.mxu0 }
 0x10e   :  { %v184_v20 = vadd.f32 %v182_v17, %v178_v18 }
 0x110   :  { %187 = vadd.xlane.f32.xlu0 %v184_v20 }
 0x195   :  { %v186_v21 = vpop.xlane.xlu0 %185 }
 0x196   :  { %v190_v22 = vmul.f32 0.0078125, %v186_v21 }
 0x198   :  { %v192_v23 = vsub.f32 %v183_v15, %v190_v22 }
 0x199   :  { %v188_v24 = vpop.xlane.xlu0 %187 }
 0x19a   :  { %v191_v25 = vmul.f32 0.0078125, %v188_v24  ;;  %v194_v26 = vmul.f32 %v192_v23, %v192_v23 }
 0x19c   :  { %v193_v27 = vsub.f32 %v184_v20, %v191_v25  ;;  %196 = vadd.xlane.f32.xlu1 %v194_v26 }
 0x19e   :  { %v195_v28 = vmul.f32 %v193_v27, %v193_v27 }
 0x1a0   :  { %198 = vadd.xlane.f32.xlu1 %v195_v28 }
 0x225   :  { %v197_v29 = vpop.xlane.xlu1 %196 }
 0x226   :  { %v200_v30 = vmul.f32 0.0078125, %v197_v29 }
 0x228   :  { %v202_v31 = vadd.f32 1e-12, %v200_v30 }
 0x229   :  { %v199_v32 = vpop.xlane.xlu1 %198 }
 0x22a   :  { %291 = vrsqrt.f32 %v202_v31  ;;  %v201_v33 = vmul.f32 0.0078125, %v199_v32 }
 0x22c   :  { %v203_v34 = vadd.f32 1e-12, %v201_v33 }
 0x22e   :  { %293 = vrsqrt.f32 %v203_v34 }
 0x237   :  { %v292_v35 = vpop.eup %291 }
 0x238   :  { %v206_v37 = vmul.f32 %v292_v35, %v192_v23 }
 0x23a   :  { %v215_v39 = vmul.f32 %v244_v36, %v206_v37 }
 0x23b   :  { %v294_v40 = vpop.eup %293 }
 0x23c   :  { %v224_v41 = vadd.f32 %v245_v38, %v215_v39  ;;  %v207_v42 = vmul.f32 %v294_v40, %v193_v27 }
 0x23e   :  { %226 = vst [vmem:[%s434_s6] sm:$0xff] %v224_v41  ;;  %v216_v43 = vmul.f32 %v244_v36, %v207_v42 }
 0x240   :  { %v225_v44 = vadd.f32 %v245_v38, %v216_v43 }
 0x242   :  { %227 = vst [vmem:[%s434_s6 + $0x8] sm:$0xff] %v225_v44 }
 0x243   :  { %232 = vsyncpa [#allocation3], 1 }
 0x244   :  { %233 = vsyncpa [#allocation5], 1 }

// kernel: encoder_forward.14
= control target key start
LH: loop header
LB: loop body
LE: loop exit
PB: predicated region body
PF: predicated region fallthrough
CT: control target
= control target key end

     0   :  { %v403_v0 = vmov 0.0   ;;  %vm404_vm0 = vmmov 0   ;;  %v405_v3 = vmov 0   ;;  %v52_v29 = vlaneseq  ;;  %s519_s1 = inlined_call_operand.vmem [shape: bf16[128,384], index: 1, kind: input, shape index: {}]   ;;  %s520_s0 = inlined_call_operand.vmem [shape: f32[16,128], index: 0, kind: input, shape index: {}]   ;;  %s521_s2 = inlined_call_operand.vmem [shape: f32[1,384], index: 2, kind: input, shape index: {}]   ;;  %s522_s3 = inlined_call_operand.vmem [shape: bf16[16,384], index: 3, kind: output, shape index: {}]  }
   0x1   :  { %348 = vmatprep.subr.bf16.mxu1 %v403_v0  ;;  %v371_v1 = vld [vmem:[%s519_s1 + $0xac] ss:$12 sps:$4 sm:$0xff]   ;;  %364 = vmatprep.mubr.msk.bf16.mxu1 %vm404_vm0, %v403_v0  ;;  %v373_v2 = vld [vmem:[%s519_s1 + $0xb0] ss:$12 sps:$4 sm:$0xff]   ;;  %v374_v4 = vld [vmem:[%s519_s1 + $0xa8] ss:$12 sps:$4 sm:$0xff]  }
   0x2   :  { %227 = vmatprep.mubr.bf16.mxu0 %v405_v3  ;;  %195 = vmatprep.subr.bf16.mxu0 %v371_v1  ;;  %v375_v5 = vld [vmem:[%s519_s1 + $0x94] ss:$12 sps:$4 sm:$0xff]   ;;  %v377_v6 = vld [vmem:[%s519_s1 + $0x98] ss:$12 sps:$4 sm:$0xff]   ;;  %v378_v7 = vld [vmem:[%s519_s1 + $0x90] ss:$12 sps:$4 sm:$0xff]  }
   0x3   :  { %349 = vmatpush3.bf16.msra.mxu1 %v373_v2  ;;  %196 = vmatpush1.bf16.msra.mxu0 %v374_v4  ;;  %v379_v8 = vld [vmem:[%s519_s1 + $0x7c] ss:$12 sps:$4 sm:$0xff]   ;;  %v381_v9 = vld [vmem:[%s519_s1 + $0x80] ss:$12 sps:$4 sm:$0xff]   ;;  %v382_v10 = vld [vmem:[%s519_s1 + $0x78] ss:$12 sps:$4 sm:$0xff]  }
   0x4   :  { %350 = vmatprep.subr.bf16.mxu1 %v403_v0  ;;  %197 = vmatprep.subr.bf16.mxu0 %v375_v5  ;;  %v383_v11 = vld [vmem:[%s519_s1 + $0x64] ss:$12 sps:$4 sm:$0xff]   ;;  %v385_v12 = vld [vmem:[%s519_s1 + $0x68] ss:$12 sps:$4 sm:$0xff]   ;;  %v386_v13 = vld [vmem:[%s519_s1 + $0x60] ss:$12 sps:$4 sm:$0xff]  }
   0x5   :  { %v387_v14 = vld [vmem:[%s519_s1 + $0x4c] ss:$12 sps:$4 sm:$0xff]   ;;  %v389_v15 = vld [vmem:[%s519_s1 + $0x50] ss:$12 sps:$4 sm:$0xff]   ;;  %v390_v16 = vld [vmem:[%s519_s1 + $0x48] ss:$12 sps:$4 sm:$0xff]  }
   0x6   :  { %v391_v17 = vld [vmem:[%s519_s1 + $0x34] ss:$12 sps:$4 sm:$0xff]   ;;  %v393_v18 = vld [vmem:[%s519_s1 + $0x38] ss:$12 sps:$4 sm:$0xff]   ;;  %v394_v19 = vld [vmem:[%s519_s1 + $0x30] ss:$12 sps:$4 sm:$0xff]  }
   0x7   :  { %351 = vmatpush3.bf16.msra.mxu1 %v377_v6  ;;  %198 = vmatpush1.bf16.msra.mxu0 %v378_v7  ;;  %v395_v20 = vld [vmem:[%s519_s1 + $0x1c] ss:$12 sps:$4 sm:$0xff]   ;;  %v397_v21 = vld [vmem:[%s519_s1 + $0x20] ss:$12 sps:$4 sm:$0xff]   ;;  %v398_v22 = vld [vmem:[%s519_s1 + $0x18] ss:$12 sps:$4 sm:$0xff]  }
   0x8   :  { %352 = vmatprep.subr.bf16.mxu1 %v403_v0  ;;  %199 = vmatprep.subr.bf16.mxu0 %v379_v8  ;;  %v399_v23 = vld [vmem:[%s519_s1 + $0x4] ss:$12 sps:$4 sm:$0xff]   ;;  %v401_v24 = vld [vmem:[%s519_s1 + $0x8] ss:$12 sps:$4 sm:$0xff]   ;;  %v402_v27 = vld [vmem:[%s519_s1] ss:$12 sps:$4 sm:$0xff]  }
   0x9   :  { %v15_v25 = vld [vmem:[%s520_s0] sm:$0xff]  ;;  %v16_v26 = vld [vmem:[%s520_s0 + $0x8] sm:$0xff]  ;;  %v53_v30 = vshrl.u32 %v52_v29, 7 }
   0xa   :  { %v17_v28 = vpack.c.bf16 %v16_v26, %v15_v25  ;;  %v50_v32 = vld [vmem:[%s521_s2] sm:$0x7] }
   0xb   :  { %353 = vmatpush3.bf16.msra.mxu1 %v381_v9  ;;  %200 = vmatpush1.bf16.msra.mxu0 %v382_v10  ;;  %v62_v31 = vsub.s32 2, %v53_v30  ;;  %v54_v33 = vsub.s32 0, %v53_v30  ;;  %v58_v34 = vsub.s32 1, %v53_v30 }
   0xc   :  { %354 = vmatprep.subr.bf16.mxu1 %v403_v0  ;;  %201 = vmatprep.subr.bf16.mxu0 %v383_v11 }
   0xd   :  { %v63_v35 = vrot.slane %v50_v32, %v62_v31  ;;  %v55_v37 = vrot.slane %v50_v32, %v54_v33  ;;  %v59_v38 = vrot.slane %v50_v32, %v58_v34 }
   0xf   :  { %355 = vmatpush3.bf16.msra.mxu1 %v385_v12  ;;  %202 = vmatpush1.bf16.msra.mxu0 %v386_v13 }
  0x10   :  { %356 = vmatprep.subr.bf16.mxu1 %v403_v0  ;;  %203 = vmatprep.subr.bf16.mxu0 %v387_v14 }
  0x13   :  { %357 = vmatpush3.bf16.msra.mxu1 %v389_v15  ;;  %204 = vmatpush1.bf16.msra.mxu0 %v390_v16 }
  0x14   :  { %358 = vmatprep.subr.bf16.mxu1 %v403_v0  ;;  %205 = vmatprep.subr.bf16.mxu0 %v391_v17 }
  0x17   :  { %359 = vmatpush3.bf16.msra.mxu1 %v393_v18  ;;  %206 = vmatpush1.bf16.msra.mxu0 %v394_v19 }
  0x18   :  { %360 = vmatprep.subr.bf16.mxu1 %v403_v0  ;;  %207 = vmatprep.subr.bf16.mxu0 %v395_v20 }
  0x1b   :  { %361 = vmatpush3.bf16.msra.mxu1 %v397_v21  ;;  %208 = vmatpush1.bf16.msra.mxu0 %v398_v22 }
  0x1c   :  { %362 = vmatprep.subr.bf16.mxu1 %v403_v0  ;;  %209 = vmatprep.subr.bf16.mxu0 %v399_v23 }
  0x1f   :  { %363 = vmatpush3.bf16.msra.mxu1 %v401_v24  ;;  %210 = vmatpush1.bf16.msra.mxu0 %v402_v27 }
  0x22   :  { %365 = vmatmul.mubr.bf16.vlgmr.msra.gmra.mxu1 %v17_v28  ;;  %228 = vmatmul.mubr.bf16.vlgmr.msra.gmra.mxu0 %v17_v28 }
  0xe2   :  { %v272_v36 = vpop.f32.mrf.mxu1  ;;  %v229_v40 = vpop.f32.mrf.mxu0 }
  0xe3   :  { %v273_v39 = vadd.f32 %v272_v36, %v63_v35  ;;  %v230_v44 = vadd.f32 %v229_v40, %v55_v37 }
  0xe4   :  { %v366_v41 = vpop.f32.mrf.mxu1  ;;  %v231_v43 = vpop.f32.mrf.mxu0 }
  0xe5   :  { %v336_v42 = vpack.c.bf16 %v273_v39, %v273_v39  ;;  %v232_v45 = vadd.f32 %v231_v43, %v59_v38 }
  0xe6   :  { %v275_v46 = vpop.f32.mrf.mxu1  ;;  %v233_v48 = vpop.f32.mrf.mxu0 }
  0xe7   :  { %300 = vst [vmem:[%s522_s3 + $0x8] sm:$0xf] %v336_v42  ;;  %v276_v47 = vadd.f32 %v275_v46, %v63_v35  ;;  %v335_v49 = vpack.c.bf16 %v232_v45, %v230_v44  ;;  %v234_v53 = vadd.f32 %v233_v48, %v55_v37 }
  0xe8   :  { %v367_v50 = vpop.f32.mrf.mxu1  ;;  %v235_v52 = vpop.f32.mrf.mxu0 }
  0xe9   :  { %v338_v51 = vpack.c.bf16 %v276_v47, %v276_v47  ;;  %299 = vst [vmem:[%s522_s3] sm:$0xff] %v335_v49  ;;  %v236_v54 = vadd.f32 %v235_v52, %v59_v38 }
  0xeb   :  { %302 = vst [vmem:[%s522_s3 + $0x14] sm:$0xf] %v338_v51  ;;  %v337_v55 = vpack.c.bf16 %v236_v54, %v234_v53 }
  0xed   :  { %301 = vst [vmem:[%s522_s3 + $0xc] sm:$0xff] %v337_v55 }

// kernel: encoder_forward.13
= control target key start
LH: loop header
LB: loop body
LE: loop exit
PB: predicated region body
PF: predicated region fallthrough
CT: control target
= control target key end

     0   :  { %12 = vsyncpa [#allocation5], 0  ;;  %s1428_s0 = inlined_call_operand.vmem [shape: f32[16,128], index: 0, kind: input, shape index: {}]   ;;  %s1429_s1 = inlined_call_operand.vmem [shape: bf16[128,512], index: 1, kind: input, shape index: {}]   ;;  %s1430_s2 = inlined_call_operand.hbm [shape: f32[1,512], index: 2, kind: input, shape index: {}]   ;;  %s1431_s3 = inlined_call_operand.vmem [shape: bf16[512,128], index: 3, kind: input, shape index: {}]   ;;  %s1432_s4 = inlined_call_operand.hbm [shape: f32[1,128], index: 4, kind: input, shape index: {}]   ;;  %s1433_s5 = inlined_call_operand.vmem [shape: f32[1,128], index: 5, kind: input, shape index: {}]   ;;  %s1434_s6 = inlined_call_operand.vmem [shape: f32[1,128], index: 6, kind: input, shape index: {}]   ;;  %s1435_s7 = inlined_call_operand.vmem [shape: f32[16,128], index: 7, kind: output, shape index: {}]  }
   0x1   :  { %13 = vsyncpa [#allocation7], 0  ;;  %s1133_s24 = smov [#allocation4]   ;;  %s1134_s26 = smov [#allocation6]  }
   0x2   :  { %s24_s25 = sshll.u32 %s1133_s24, 4  ;;  %s36_s27 = sshll.u32 %s1134_s26, 4  ;;  %s25_s25 = int_to_ptr.vmem [resolvable:$true] %s24_s25  ;;  %s37_s27 = int_to_ptr.vmem [resolvable:$true] %s36_s27 }
   0x3   :  { %s1097_s28 = scalar_lea.vmem %s25_s25, 64  ;;  %p1102_p1 = scmp.lt.s32.totalorder %s25_s25, %s25_s25 }
   0x4   :  { %p1098_p0 = scmp.ne.s32.totalorder %s25_s25, %s1097_s28  ;;  %p1103_p2 = scmp.lt.s32.totalorder %s1097_s28, %s1097_s28 }
   0x6   :  { %p1104_p3 = por %p1103_p2, %p1102_p1 }
   0x8   :  { %p1105_p4 = pnand %p1104_p3, %p1098_p0 }
   0xa   :  { %1108 = shalt.err (!%p1105_p4)
}
   0xb   :  { %27 = dma.hbm_to_vmem [thread:$0]  %s1430_s2, 64, %s25_s25, [#allocation5]  }
   0xc   :  { %s1117_s8 = scalar_lea.vmem %s37_s27, 16  ;;  %s1121_s9 = scalar_lea.vmem %s37_s27, 32 }
   0xd   :  { %p1118_p5 = scmp.ne.s32.totalorder %s37_s27, %s1117_s8  ;;  %p1122_p6 = scmp.lt.s32.totalorder %s37_s27, %s37_s27 }
   0xe   :  { %p1123_p7 = scmp.lt.s32.totalorder %s1121_s9, %s1117_s8 }
  0x10   :  { %p1124_p8 = por %p1123_p7, %p1122_p6 }
  0x12   :  { %p1125_p9 = pnand %p1124_p8, %p1118_p5 }
  0x14   :  { %1128 = shalt.err (!%p1125_p9)
}
  0x15   :  { %39 = dma.hbm_to_vmem [thread:$0]  %s1432_s4, 16, %s37_s27, [#allocation7]  }
  0x16   :  { %1129 = dma.done.wait [#allocation5], 64  }
  0x17   :  { %1130 = vsyncadd [#allocation5], 4294967232 }
  0x18   :  { %1131 = dma.done.wait [#allocation7], 16  }
  0x19   :  { %1132 = vsyncadd [#allocation7], 4294967280  ;;  %v1135_v0 = vmov 0   ;;  %v988_v1 = vld [vmem:[%s1429_s1 + $0xe4] ss:$16 sps:$4 sm:$0xff]   ;;  %v1268_v28 = vld [vmem:[%s1428_s0 + $0x8] sm:$0xff] }
  0x1a   :  { %323 = vmatprep.mubr.bf16.mxu0 %v1135_v0  ;;  %366 = vmatprep.mubr.bf16.mxu1 %v1135_v0  ;;  %v990_v2 = vld [vmem:[%s1429_s1 + $0xec] ss:$16 sps:$4 sm:$0xff]   ;;  %v992_v3 = vld [vmem:[%s1429_s1 + $0xe0] ss:$16 sps:$4 sm:$0xff]   ;;  %v993_v4 = vld [vmem:[%s1429_s1 + $0xe8] ss:$16 sps:$4 sm:$0xff]  }
  0x1b   :  { %291 = vmatprep.subr.bf16.mxu0 %v988_v1  ;;  %334 = vmatprep.subr.bf16.mxu1 %v990_v2  ;;  %v994_v5 = vld [vmem:[%s1429_s1 + $0xc4] ss:$16 sps:$4 sm:$0xff]   ;;  %v996_v6 = vld [vmem:[%s1429_s1 + $0xcc] ss:$16 sps:$4 sm:$0xff]   ;;  %v998_v7 = vld [vmem:[%s1429_s1 + $0xc0] ss:$16 sps:$4 sm:$0xff]  }
  0x1c   :  { %292 = vmatpush1.bf16.msra.mxu0 %v992_v3  ;;  %335 = vmatpush1.bf16.msra.mxu1 %v993_v4  ;;  %v999_v8 = vld [vmem:[%s1429_s1 + $0xc8] ss:$16 sps:$4 sm:$0xff]   ;;  %v1000_v9 = vld [vmem:[%s1429_s1 + $0xa4] ss:$16 sps:$4 sm:$0xff]   ;;  %v1002_v10 = vld [vmem:[%s1429_s1 + $0xac] ss:$16 sps:$4 sm:$0xff]  }
  0x1d   :  { %293 = vmatprep.subr.bf16.mxu0 %v994_v5  ;;  %336 = vmatprep.subr.bf16.mxu1 %v996_v6  ;;  %v1004_v11 = vld [vmem:[%s1429_s1 + $0xa0] ss:$16 sps:$4 sm:$0xff]   ;;  %v1005_v12 = vld [vmem:[%s1429_s1 + $0xa8] ss:$16 sps:$4 sm:$0xff]   ;;  %v1006_v13 = vld [vmem:[%s1429_s1 + $0x84] ss:$16 sps:$4 sm:$0xff]   ;;  %v105_v5 = vlaneseq }
  0x1e   :  { %v1008_v14 = vld [vmem:[%s1429_s1 + $0x8c] ss:$16 sps:$4 sm:$0xff]   ;;  %v1010_v15 = vld [vmem:[%s1429_s1 + $0x80] ss:$16 sps:$4 sm:$0xff]   ;;  %v1011_v16 = vld [vmem:[%s1429_s1 + $0x88] ss:$16 sps:$4 sm:$0xff]  }
  0x1f   :  { %v1012_v17 = vld [vmem:[%s1429_s1 + $0x64] ss:$16 sps:$4 sm:$0xff]   ;;  %v1014_v18 = vld [vmem:[%s1429_s1 + $0x6c] ss:$16 sps:$4 sm:$0xff]   ;;  %v1016_v19 = vld [vmem:[%s1429_s1 + $0x60] ss:$16 sps:$4 sm:$0xff]  }
  0x20   :  { %294 = vmatpush1.bf16.msra.mxu0 %v998_v7  ;;  %337 = vmatpush1.bf16.msra.mxu1 %v999_v8  ;;  %v1017_v20 = vld [vmem:[%s1429_s1 + $0x68] ss:$16 sps:$4 sm:$0xff]   ;;  %v1018_v21 = vld [vmem:[%s1429_s1 + $0x44] ss:$16 sps:$4 sm:$0xff]   ;;  %v1020_v22 = vld [vmem:[%s1429_s1 + $0x4c] ss:$16 sps:$4 sm:$0xff]  }
  0x21   :  { %295 = vmatprep.subr.bf16.mxu0 %v1000_v9  ;;  %338 = vmatprep.subr.bf16.mxu1 %v1002_v10  ;;  %v1022_v23 = vld [vmem:[%s1429_s1 + $0x40] ss:$16 sps:$4 sm:$0xff]   ;;  %v1023_v24 = vld [vmem:[%s1429_s1 + $0x48] ss:$16 sps:$4 sm:$0xff]   ;;  %v1024_v25 = vld [vmem:[%s1429_s1 + $0x24] ss:$16 sps:$4 sm:$0xff]  }
  0x22   :  { %v1026_v26 = vld [vmem:[%s1429_s1 + $0x2c] ss:$16 sps:$4 sm:$0xff]   ;;  %v1263_v27 = vld [vmem:[%s1428_s0] sm:$0xff]  ;;  %v1029_v30 = vld [vmem:[%s1429_s1 + $0x28] ss:$16 sps:$4 sm:$0xff]   ;;  %v106_v6 = vshrl.u32 %v105_v5, 7 }
  0x23   :  { %v1028_v29 = vld [vmem:[%s1429_s1 + $0x20] ss:$16 sps:$4 sm:$0xff]   ;;  %v939_v31 = vpack.c.bf16 %v1268_v28, %v1263_v27  ;;  %v1030_v32 = vld [vmem:[%s1429_s1 + $0x4] ss:$16 sps:$4 sm:$0xff]   ;;  %v1032_v33 = vld [vmem:[%s1429_s1 + $0xc] ss:$16 sps:$4 sm:$0xff]  }
  0x24   :  { %296 = vmatpush1.bf16.msra.mxu0 %v1004_v11  ;;  %339 = vmatpush1.bf16.msra.mxu1 %v1005_v12  ;;  %v1034_v34 = vld [vmem:[%s1429_s1] ss:$16 sps:$4 sm:$0xff]   ;;  %v1035_v35 = vld [vmem:[%s1429_s1 + $0x8] ss:$16 sps:$4 sm:$0xff]   ;;  %v107_v7 = vsub.s32 0, %v106_v6  ;;  %v115_v8 = vsub.s32 2, %v106_v6 }
  0x25   :  { %297 = vmatprep.subr.bf16.mxu0 %v1006_v13  ;;  %340 = vmatprep.subr.bf16.mxu1 %v1008_v14  ;;  %940 = vst [vmem:[#allocation3] sm:$0xff] %v939_v31   ;;  %v1037_v37 = vld [vmem:[%s1431_s3 + $0x78] sm:$0xff]   ;;  %v1041_v41 = vld [vmem:[%s1431_s3 + $0x70] sm:$0xff]   ;;  %v1045_v45 = vld [vmem:[%s1431_s3 + $0x68] sm:$0xff]   ;;  %v111_v10 = vsub.s32 1, %v106_v6  ;;  %v119_v11 = vsub.s32 3, %v106_v6 }
  0x26   :  { %v1038_v38 = vld [vmem:[%s1431_s3 + $0xf8] sm:$0xff]   ;;  %v1042_v42 = vld [vmem:[%s1431_s3 + $0xf0] sm:$0xff]   ;;  %v1046_v46 = vld [vmem:[%s1431_s3 + $0xe8] sm:$0xff]  }
  0x27   :  { %v1039_v39 = vld [vmem:[%s1431_s3 + $0x38] sm:$0xff]   ;;  %v1043_v43 = vld [vmem:[%s1431_s3 + $0x30] sm:$0xff]   ;;  %v1047_v47 = vld [vmem:[%s1431_s3 + $0x28] sm:$0xff]  }
  0x28   :  { %298 = vmatpush1.bf16.msra.mxu0 %v1010_v15  ;;  %341 = vmatpush1.bf16.msra.mxu1 %v1011_v16  ;;  %v1040_v40 = vld [vmem:[%s1431_s3 + $0xb8] sm:$0xff]   ;;  %v1044_v44 = vld [vmem:[%s1431_s3 + $0xb0] sm:$0xff]   ;;  %v1048_v48 = vld [vmem:[%s1431_s3 + $0xa8] sm:$0xff]  }
  0x29   :  { %299 = vmatprep.subr.bf16.mxu0 %v1012_v17  ;;  %342 = vmatprep.subr.bf16.mxu1 %v1014_v18  ;;  %v1049_v49 = vld [vmem:[%s1431_s3 + $0x60] sm:$0xff]   ;;  %v1053_v53 = vld [vmem:[%s1431_s3 + $0x58] sm:$0xff]   ;;  %v1057_v57 = vld [vmem:[%s1431_s3 + $0x50] sm:$0xff]  }
  0x2a   :  { %v1050_v50 = vld [vmem:[%s1431_s3 + $0xe0] sm:$0xff]   ;;  %v1054_v54 = vld [vmem:[%s1431_s3 + $0xd8] sm:$0xff]   ;;  %v1058_v58 = vld [vmem:[%s1431_s3 + $0xd0] sm:$0xff]  }
  0x2b   :  { %v1051_v51 = vld [vmem:[%s1431_s3 + $0x20] sm:$0xff]   ;;  %v1055_v55 = vld [vmem:[%s1431_s3 + $0x18] sm:$0xff]   ;;  %v1059_v59 = vld [vmem:[%s1431_s3 + $0x10] sm:$0xff]  }
  0x2c   :  { %300 = vmatpush1.bf16.msra.mxu0 %v1016_v19  ;;  %343 = vmatpush1.bf16.msra.mxu1 %v1017_v20  ;;  %v1036_v36 = vld [vmem:[#allocation3] sm:$0xff]   ;;  %v1056_v56 = vld [vmem:[%s1431_s3 + $0x98] sm:$0xff]   ;;  %v1060_v60 = vld [vmem:[%s1431_s3 + $0x90] sm:$0xff]  }
  0x2d   :  { %301 = vmatprep.subr.bf16.mxu0 %v1018_v21  ;;  %344 = vmatprep.subr.bf16.mxu1 %v1020_v22  ;;  %v1052_v52 = vld [vmem:[%s1431_s3 + $0xa0] sm:$0xff]   ;;  %v1061_v61 = vld [vmem:[%s1431_s3 + $0x48] sm:$0xff]  }
  0x2e   :  { %v1062_v62 = vld [vmem:[%s1431_s3 + $0xc8] sm:$0xff]   ;;  %v1065_v1 = vld [vmem:[%s1431_s3 + $0x40] sm:$0xff]  }
  0x2f   :  { %v1063_v63 = vld [vmem:[%s1431_s3 + $0x8] sm:$0xff]   ;;  %v1066_v2 = vld [vmem:[%s1431_s3 + $0xc0] sm:$0xff]  }
  0x30   :  { %302 = vmatpush1.bf16.msra.mxu0 %v1022_v23  ;;  %345 = vmatpush1.bf16.msra.mxu1 %v1023_v24  ;;  %v1064_v0 = vld [vmem:[%s1431_s3 + $0x88] sm:$0xff]   ;;  %v1067_v3 = vld [vmem:[%s1431_s3] sm:$0xff]  }
  0x31   :  { %303 = vmatprep.subr.bf16.mxu0 %v1024_v25  ;;  %346 = vmatprep.subr.bf16.mxu1 %v1026_v26  ;;  %v1068_v4 = vld [vmem:[%s1431_s3 + $0x80] sm:$0xff]   ;;  %v103_v9 = vld [vmem:[#allocation4] sm:$0xf] }
  0x32   :  { %v108_v12 = vrot.slane %v103_v9, %v107_v7  ;;  %v116_v13 = vrot.slane %v103_v9, %v115_v8  ;;  %v112_v14 = vrot.slane %v103_v9, %v111_v10  ;;  %v120_v15 = vrot.slane %v103_v9, %v119_v11 }
  0x34   :  { %304 = vmatpush1.bf16.msra.mxu0 %v1028_v29  ;;  %347 = vmatpush1.bf16.msra.mxu1 %v1029_v30 }
  0x35   :  { %305 = vmatprep.subr.bf16.mxu0 %v1030_v32  ;;  %348 = vmatprep.subr.bf16.mxu1 %v1032_v33 }
  0x38   :  { %306 = vmatpush1.bf16.msra.mxu0 %v1034_v34  ;;  %349 = vmatpush1.bf16.msra.mxu1 %v1035_v35 }
  0x39   :  { %941 = vmatprep.subr.bf16.mxu0 %v1037_v37  ;;  %963 = vmatprep.subr.bf16.mxu1 %v1038_v38 }
  0x3b   :  { %324 = vmatmul.mubr.bf16.vlgmr.msra.gmra.mxu0 %v1036_v36  ;;  %367 = vmatmul.mubr.bf16.vlgmr.msra.gmra.mxu1 %v1036_v36 }
  0x3c   :  { %942 = vmatpush3.bf16.msra.mxu0 %v1039_v39  ;;  %964 = vmatpush3.bf16.msra.mxu1 %v1040_v40 }
  0x3d   :  { %943 = vmatprep.subr.bf16.mxu0 %v1041_v41  ;;  %965 = vmatprep.subr.bf16.mxu1 %v1042_v42 }
  0x40   :  { %944 = vmatpush3.bf16.msra.mxu0 %v1043_v43  ;;  %966 = vmatpush3.bf16.msra.mxu1 %v1044_v44 }
  0x41   :  { %945 = vmatprep.subr.bf16.mxu0 %v1045_v45  ;;  %967 = vmatprep.subr.bf16.mxu1 %v1046_v46 }
  0x44   :  { %946 = vmatpush3.bf16.msra.mxu0 %v1047_v47  ;;  %968 = vmatpush3.bf16.msra.mxu1 %v1048_v48 }
  0x45   :  { %947 = vmatprep.subr.bf16.mxu0 %v1049_v49  ;;  %969 = vmatprep.subr.bf16.mxu1 %v1050_v50 }
  0x48   :  { %948 = vmatpush3.bf16.msra.mxu0 %v1051_v51  ;;  %970 = vmatpush3.bf16.msra.mxu1 %v1052_v52 }
  0x49   :  { %949 = vmatprep.subr.bf16.mxu0 %v1053_v53  ;;  %971 = vmatprep.subr.bf16.mxu1 %v1054_v54 }
  0x4c   :  { %950 = vmatpush3.bf16.msra.mxu0 %v1055_v55  ;;  %972 = vmatpush3.bf16.msra.mxu1 %v1056_v56 }
  0x4d   :  { %951 = vmatprep.subr.bf16.mxu0 %v1057_v57  ;;  %973 = vmatprep.subr.bf16.mxu1 %v1058_v58 }
  0x50   :  { %952 = vmatpush3.bf16.msra.mxu0 %v1059_v59  ;;  %974 = vmatpush3.bf16.msra.mxu1 %v1060_v60 }
  0x51   :  { %953 = vmatprep.subr.bf16.mxu0 %v1061_v61  ;;  %975 = vmatprep.subr.bf16.mxu1 %v1062_v62 }
  0x54   :  { %954 = vmatpush3.bf16.msra.mxu0 %v1063_v63  ;;  %976 = vmatpush3.bf16.msra.mxu1 %v1064_v0 }
  0x55   :  { %955 = vmatprep.subr.bf16.mxu0 %v1065_v1  ;;  %977 = vmatprep.subr.bf16.mxu1 %v1066_v2 }
  0x58   :  { %956 = vmatpush3.bf16.msra.mxu0 %v1067_v3  ;;  %978 = vmatpush3.bf16.msra.mxu1 %v1068_v4 }
  0xfb   :  { %v325_v16 = vpop.f32.mrf.mxu0  ;;  %v368_v17 = vpop.f32.mrf.mxu1 }
  0xfc   :  { %v1386_v18 = vadd.f32 %v325_v16, %v108_v12  ;;  %v1388_v19 = vadd.f32 %v368_v17, %v116_v13 }
  0xfd   :  { %v327_v20 = vpop.f32.mrf.mxu0  ;;  %v370_v21 = vpop.f32.mrf.mxu1 }
  0xfe   :  { %v385_v22 = vmul.f32 0.044715, %v1386_v18  ;;  %v387_v23 = vmul.f32 0.044715, %v1388_v19  ;;  %v328_v24 = vadd.f32 %v327_v20, %v112_v14  ;;  %v1392_v25 = vadd.f32 %v370_v21, %v120_v15 }
  0xff   :  { %v329_v26 = vpop.f32.mrf.mxu0  ;;  %v372_v29 = vpop.f32.mrf.mxu1  ;;  %v377_v20 = vmul.f32 0.5, %v1386_v18 }
 0x100   :  { %v393_v30 = vmul.f32 %v385_v22, %v1386_v18  ;;  %v395_v31 = vmul.f32 %v387_v23, %v1388_v19  ;;  %v386_v32 = vmul.f32 0.044715, %v328_v24  ;;  %v388_v33 = vmul.f32 0.044715, %v1392_v25 }
 0x101   :  { %v330_v34 = vadd.f32 %v329_v26, %v108_v12  ;;  %v1397_v35 = vadd.f32 %v372_v29, %v116_v13  ;;  %v331_v36 = vpop.f32.mrf.mxu0  ;;  %v374_v37 = vpop.f32.mrf.mxu1  ;;  %v378_v16 = vmul.f32 0.5, %v328_v24 }
 0x102   :  { %v401_v38 = vmul.f32 %v393_v30, %v1386_v18  ;;  %v403_v39 = vmul.f32 %v395_v31, %v1388_v19  ;;  %v394_v40 = vmul.f32 %v386_v32, %v328_v24  ;;  %v396_v41 = vmul.f32 %v388_v33, %v1392_v25 }
 0x103   :  { %v389_v42 = vmul.f32 0.044715, %v330_v34  ;;  %v391_v43 = vmul.f32 0.044715, %v1397_v35  ;;  %v332_v44 = vadd.f32 %v331_v36, %v112_v14  ;;  %v375_v45 = vadd.f32 %v374_v37, %v120_v15 }
 0x104   :  { %v409_v46 = vadd.f32 %v401_v38, %v1386_v18  ;;  %v411_v47 = vadd.f32 %v403_v39, %v1388_v19  ;;  %v402_v48 = vmul.f32 %v394_v40, %v328_v24  ;;  %v404_v49 = vmul.f32 %v396_v41, %v1392_v25 }
 0x105   :  { %v397_v50 = vmul.f32 %v389_v42, %v330_v34  ;;  %v399_v51 = vmul.f32 %v391_v43, %v1397_v35  ;;  %v390_v52 = vmul.f32 0.044715, %v332_v44  ;;  %v392_v53 = vmul.f32 0.044715, %v375_v45 }
 0x106   :  { %v417_v54 = vmul.f32 0.7978846, %v409_v46  ;;  %v419_v55 = vmul.f32 0.7978846, %v411_v47  ;;  %v410_v56 = vadd.f32 %v402_v48, %v328_v24  ;;  %v412_v62 = vadd.f32 %v404_v49, %v1392_v25 }
 0x107   :  { %v405_v57 = vmul.f32 %v397_v50, %v330_v34  ;;  %v407_v58 = vmul.f32 %v399_v51, %v1397_v35  ;;  %v398_v59 = vmul.f32 %v390_v52, %v332_v44  ;;  %v400_v60 = vmul.f32 %v392_v53, %v375_v45 }
 0x108   :  { %v418_v61 = vmul.f32 0.7978846, %v410_v56  ;;  %1069 = vtanh.f32 %v417_v54  ;;  %v420_v3 = vmul.f32 0.7978846, %v412_v62  ;;  %v381_v26 = vmul.f32 0.5, %v330_v34 }
 0x109   :  { %v413_v63 = vadd.f32 %v405_v57, %v330_v34  ;;  %v415_v0 = vadd.f32 %v407_v58, %v1397_v35  ;;  %v406_v1 = vmul.f32 %v398_v59, %v332_v44  ;;  %1071 = vtanh.f32 %v419_v55  ;;  %v931_v56 = vld [vmem:[#allocation6] ss:$0 sm:$0xff] }
 0x10a   :  { %v408_v2 = vmul.f32 %v400_v60, %v375_v45  ;;  %1073 = vtanh.f32 %v418_v61  ;;  %v382_v32 = vmul.f32 0.5, %v332_v44  ;;  %v383_v36 = vmul.f32 0.5, %v1397_v35 }
 0x10b   :  { %v421_v4 = vmul.f32 0.7978846, %v413_v63  ;;  %v423_v5 = vmul.f32 0.7978846, %v415_v0  ;;  %v414_v6 = vadd.f32 %v406_v1, %v332_v44  ;;  %1075 = vtanh.f32 %v420_v3 }
 0x10c   :  { %v416_v7 = vadd.f32 %v408_v2, %v375_v45  ;;  %v380_v38 = vmul.f32 0.5, %v1392_v25  ;;  %v384_v39 = vmul.f32 0.5, %v375_v45  ;;  %v379_v18 = vmul.f32 0.5, %v1388_v19 }
 0x10d   :  { %1077 = vtanh.f32 %v421_v4  ;;  %v422_v8 = vmul.f32 0.7978846, %v414_v6 }
 0x10e   :  { %1079 = vtanh.f32 %v423_v5  ;;  %v424_v9 = vmul.f32 0.7978846, %v416_v7 }
 0x10f   :  { %1081 = vtanh.f32 %v422_v8 }
 0x110   :  { %1083 = vtanh.f32 %v424_v9 }
 0x115   :  { %v1070_v10 = vpop.eup %1069 }
 0x116   :  { %v1072_v11 = vpop.eup %1071  ;;  %v433_v29 = vadd.f32 1.0, %v1070_v10 }
 0x117   :  { %v1074_v12 = vpop.eup %1073  ;;  %v435_v37 = vadd.f32 1.0, %v1072_v11 }
 0x118   :  { %v1076_v13 = vpop.eup %1075  ;;  %v434_v17 = vadd.f32 1.0, %v1074_v12  ;;  %v441_v47 = vmul.f32 %v433_v29, %v377_v20  ;;  %v933_v20 = vld [vmem:[%s1434_s6] ss:$0 sm:$0xff] }
 0x119   :  { %v436_v23 = vadd.f32 1.0, %v1076_v13  ;;  %v443_v49 = vmul.f32 %v435_v37, %v379_v18 }
 0x11a   :  { %v1078_v14 = vpop.eup %1077  ;;  %v442_v41 = vmul.f32 %v434_v17, %v378_v16  ;;  %v932_v16 = vld [vmem:[%s1433_s5] ss:$0 sm:$0xff] }
 0x11b   :  { %v1080_v15 = vpop.eup %1079  ;;  %v437_v21 = vadd.f32 1.0, %v1078_v14  ;;  %v444_v46 = vmul.f32 %v436_v23, %v380_v38 }
 0x11c   :  { %v1082_v22 = vpop.eup %1081  ;;  %v439_v30 = vadd.f32 1.0, %v1080_v15 }
 0x11d   :  { %v1084_v31 = vpop.eup %1083  ;;  %v438_v33 = vadd.f32 1.0, %v1082_v22  ;;  %v445_v24 = vmul.f32 %v437_v21, %v381_v26 }
 0x11e   :  { %v440_v40 = vadd.f32 1.0, %v1084_v31  ;;  %v447_v43 = vmul.f32 %v439_v30, %v383_v36 }
 0x11f   :  { %v446_v42 = vmul.f32 %v438_v33, %v382_v32  ;;  %v451_v50 = vpack.c.bf16 %v445_v24, %v441_v47 }
 0x120   :  { %v448_v34 = vmul.f32 %v440_v40, %v384_v39  ;;  %v453_v35 = vpack.c.bf16 %v447_v43, %v443_v49 }
 0x121   :  { %v452_v48 = vpack.c.bf16 %v446_v42, %v442_v41 }
 0x122   :  { %v454_v44 = vpack.c.bf16 %v448_v34, %v444_v46 }
 0x123   :  { %743 = vmatprep.mubr.bf16.mxu0 %v452_v48 }
 0x124   :  { %784 = vmatprep.mubr.bf16.mxu1 %v454_v44  ;;  %744 = vmatmul.mubr.bf16.vlgmr.msra.gmra.mxu0 %v451_v50 }
 0x125   :  { %785 = vmatmul.mubr.bf16.vlgmr.msra.gmra.mxu1 %v453_v35 }
 0x1e4   :  { %v957_v25 = vpop.f32.mrf.mxu0 }
 0x1e5   :  { %v979_v45 = vpop.f32.mrf.mxu1 }
 0x1e6   :  { %v958_v51 = vpop.f32.mrf.mxu0 }
 0x1e7   :  { %v959_v52 = vadd.f32 %v958_v51, %v957_v25  ;;  %v980_v53 = vpop.f32.mrf.mxu1 }
 0x1e8   :  { %v981_v54 = vadd.f32 %v980_v53, %v979_v45  ;;  %v960_v19 = vpop.f32.mrf.mxu0 }
 0x1e9   :  { %v982_v55 = vpop.f32.mrf.mxu1 }
 0x1ea   :  { %v787_v57 = vadd.f32 %v981_v54, %v959_v52  ;;  %v961_v58 = vpop.f32.mrf.mxu0 }
 0x1eb   :  { %v962_v59 = vadd.f32 %v961_v58, %v960_v19  ;;  %v983_v60 = vpop.f32.mrf.mxu1 }
 0x1ec   :  { %v984_v61 = vadd.f32 %v983_v60, %v982_v55  ;;  %v809_v62 = vadd.f32 %v931_v56, %v787_v57 }
 0x1ee   :  { %v790_v63 = vadd.f32 %v984_v61, %v962_v59  ;;  %v813_v0 = vadd.f32 %v809_v62, %v1263_v27 }
 0x1f0   :  { %815 = vadd.xlane.f32.xlu0 %v813_v0  ;;  %v810_v1 = vadd.f32 %v931_v56, %v790_v63 }
 0x1f2   :  { %v814_v2 = vadd.f32 %v810_v1, %v1268_v28 }
 0x1f4   :  { %817 = vadd.xlane.f32.xlu0 %v814_v2 }
 0x279   :  { %v816_v3 = vpop.xlane.xlu0 %815 }
 0x27a   :  { %v820_v4 = vmul.f32 0.0078125, %v816_v3 }
 0x27c   :  { %v822_v5 = vsub.f32 %v813_v0, %v820_v4 }
 0x27d   :  { %v818_v6 = vpop.xlane.xlu0 %817 }
 0x27e   :  { %v821_v7 = vmul.f32 0.0078125, %v818_v6  ;;  %v824_v8 = vmul.f32 %v822_v5, %v822_v5 }
 0x280   :  { %v823_v9 = vsub.f32 %v814_v2, %v821_v7  ;;  %826 = vadd.xlane.f32.xlu1 %v824_v8 }
 0x282   :  { %v825_v10 = vmul.f32 %v823_v9, %v823_v9 }
 0x284   :  { %828 = vadd.xlane.f32.xlu1 %v825_v10 }
 0x309   :  { %v827_v11 = vpop.xlane.xlu1 %826 }
 0x30a   :  { %v830_v12 = vmul.f32 0.0078125, %v827_v11 }
 0x30c   :  { %v832_v13 = vadd.f32 1e-12, %v830_v12 }
 0x30d   :  { %v829_v14 = vpop.xlane.xlu1 %828 }
 0x30e   :  { %1085 = vrsqrt.f32 %v832_v13  ;;  %v831_v27 = vmul.f32 0.0078125, %v829_v14 }
 0x310   :  { %v833_v15 = vadd.f32 1e-12, %v831_v27 }
 0x312   :  { %1087 = vrsqrt.f32 %v833_v15 }
 0x31b   :  { %v1086_v28 = vpop.eup %1085 }
 0x31c   :  { %v836_v17 = vmul.f32 %v1086_v28, %v822_v5 }
 0x31e   :  { %v845_v21 = vmul.f32 %v932_v16, %v836_v17 }
 0x31f   :  { %v1088_v22 = vpop.eup %1087 }
 0x320   :  { %v854_v23 = vadd.f32 %v933_v20, %v845_v21  ;;  %v837_v26 = vmul.f32 %v1088_v22, %v823_v9 }
 0x322   :  { %856 = vst [vmem:[%s1435_s7] sm:$0xff] %v854_v23  ;;  %v846_v29 = vmul.f32 %v932_v16, %v837_v26 }
 0x324   :  { %v855_v30 = vadd.f32 %v933_v20, %v846_v29 }
 0x326   :  { %857 = vst [vmem:[%s1435_s7 + $0x8] sm:$0xff] %v855_v30 }
 0x327   :  { %862 = vsyncpa [#allocation5], 1 }
 0x328   :  { %863 = vsyncpa [#allocation7], 1 }

// kernel: encoder_forward.16
= control target key start
LH: loop header
LB: loop body
LE: loop exit
PB: predicated region body
PF: predicated region fallthrough
CT: control target
= control target key end

     0   :  { %v251_v0 = vmov 0.0   ;;  %vm252_vm0 = vmmov 0   ;;  %s336_s1 = inlined_call_operand.vmem [shape: bf16[128,128], index: 1, kind: input, shape index: {}]   ;;  %s337_s0 = inlined_call_operand.vmem [shape: bf16[16,128], index: 0, kind: input, shape index: {}]   ;;  %s338_s2 = inlined_call_operand.vmem [shape: f32[1,128], index: 2, kind: input, shape index: {}]   ;;  %s339_s3 = inlined_call_operand.vmem [shape: f32[16,128], index: 3, kind: input, shape index: {}]   ;;  %s340_s4 = inlined_call_operand.vmem [shape: f32[1,128], index: 4, kind: input, shape index: {}]   ;;  %s341_s5 = inlined_call_operand.vmem [shape: f32[1,128], index: 5, kind: input, shape index: {}]   ;;  %s342_s6 = inlined_call_operand.vmem [shape: f32[16,128], index: 6, kind: output, shape index: {}]  }
   0x1   :  { %216 = vmatprep.subr.bf16.mxu0 %v251_v0  ;;  %v238_v1 = vld [vmem:[%s336_s1 + $0x38] sm:$0xff]   ;;  %232 = vmatprep.mubr.msk.bf16.mxu0 %vm252_vm0, %v251_v0  ;;  %v239_v2 = vld [vmem:[%s336_s1 + $0x30] sm:$0xff]   ;;  %v240_v3 = vld [vmem:[%s336_s1 + $0x28] sm:$0xff]  }
   0x2   :  { %217 = vmatpush3.bf16.msra.mxu0 %v238_v1  ;;  %v241_v4 = vld [vmem:[%s336_s1 + $0x20] sm:$0xff]   ;;  %v242_v5 = vld [vmem:[%s336_s1 + $0x18] sm:$0xff]   ;;  %v243_v6 = vld [vmem:[%s336_s1 + $0x10] sm:$0xff]  }
   0x3   :  { %218 = vmatprep.subr.bf16.mxu0 %v251_v0  ;;  %v244_v7 = vld [vmem:[%s336_s1 + $0x8] sm:$0xff]   ;;  %v245_v8 = vld [vmem:[%s336_s1] sm:$0xff]  }
   0x4   :  { %v246_v9 = vld [vmem:[%s337_s0] sm:$0xff]   ;;  %v145_v17 = vld [vmem:[%s339_s3 + $0x8] sm:$0xff] }
   0x5   :  { %v195_v10 = vld [vmem:[%s338_s2] ss:$0 sm:$0xff] }
   0x6   :  { %219 = vmatpush3.bf16.msra.mxu0 %v239_v2  ;;  %v144_v12 = vld [vmem:[%s339_s3] sm:$0xff] }
   0x7   :  { %220 = vmatprep.subr.bf16.mxu0 %v251_v0  ;;  %v205_v36 = vld [vmem:[%s340_s4] ss:$0 sm:$0xff] }
   0x8   :  { %v206_v38 = vld [vmem:[%s341_s5] ss:$0 sm:$0xff] }
   0xa   :  { %221 = vmatpush3.bf16.msra.mxu0 %v240_v3 }
   0xb   :  { %222 = vmatprep.subr.bf16.mxu0 %v251_v0 }
   0xe   :  { %223 = vmatpush3.bf16.msra.mxu0 %v241_v4 }
   0xf   :  { %224 = vmatprep.subr.bf16.mxu0 %v251_v0 }
  0x12   :  { %225 = vmatpush3.bf16.msra.mxu0 %v242_v5 }
  0x13   :  { %226 = vmatprep.subr.bf16.mxu0 %v251_v0 }
  0x16   :  { %227 = vmatpush3.bf16.msra.mxu0 %v243_v6 }
  0x17   :  { %228 = vmatprep.subr.bf16.mxu0 %v251_v0 }
  0x1a   :  { %229 = vmatpush3.bf16.msra.mxu0 %v244_v7 }
  0x1b   :  { %230 = vmatprep.subr.bf16.mxu0 %v251_v0 }
  0x1e   :  { %231 = vmatpush3.bf16.msra.mxu0 %v245_v8 }
  0x21   :  { %233 = vmatmul.mubr.bf16.vlgmr.msra.gmra.mxu0 %v246_v9 }
  0xe1   :  { %v137_v11 = vpop.f32.mrf.mxu0 }
  0xe2   :  { %v138_v13 = vadd.f32 %v195_v10, %v137_v11 }
  0xe3   :  { %v234_v14 = vpop.f32.mrf.mxu0 }
  0xe4   :  { %v146_v15 = vadd.f32 %v144_v12, %v138_v13 }
  0xe5   :  { %v140_v16 = vpop.f32.mrf.mxu0 }
  0xe6   :  { %v141_v18 = vadd.f32 %v195_v10, %v140_v16  ;;  %148 = vadd.xlane.f32.xlu0 %v146_v15 }
  0xe7   :  { %v235_v19 = vpop.f32.mrf.mxu0 }
  0xe8   :  { %v147_v20 = vadd.f32 %v145_v17, %v141_v18 }
  0xea   :  { %150 = vadd.xlane.f32.xlu0 %v147_v20 }
 0x16f   :  { %v149_v21 = vpop.xlane.xlu0 %148 }
 0x170   :  { %v153_v22 = vmul.f32 0.0078125, %v149_v21 }
 0x172   :  { %v155_v23 = vsub.f32 %v146_v15, %v153_v22 }
 0x173   :  { %v151_v24 = vpop.xlane.xlu0 %150 }
 0x174   :  { %v154_v25 = vmul.f32 0.0078125, %v151_v24  ;;  %v157_v26 = vmul.f32 %v155_v23, %v155_v23 }
 0x176   :  { %v156_v27 = vsub.f32 %v147_v20, %v154_v25  ;;  %159 = vadd.xlane.f32.xlu1 %v157_v26 }
 0x178   :  { %v158_v28 = vmul.f32 %v156_v27, %v156_v27 }
 0x17a   :  { %161 = vadd.xlane.f32.xlu1 %v158_v28 }
 0x1ff   :  { %v160_v29 = vpop.xlane.xlu1 %159 }
 0x200   :  { %v163_v30 = vmul.f32 0.0078125, %v160_v29 }
 0x202   :  { %v165_v31 = vadd.f32 1e-12, %v163_v30 }
 0x203   :  { %v162_v32 = vpop.xlane.xlu1 %161 }
 0x204   :  { %247 = vrsqrt.f32 %v165_v31  ;;  %v164_v33 = vmul.f32 0.0078125, %v162_v32 }
 0x206   :  { %v166_v34 = vadd.f32 1e-12, %v164_v33 }
 0x208   :  { %249 = vrsqrt.f32 %v166_v34 }
 0x211   :  { %v248_v35 = vpop.eup %247 }
 0x212   :  { %v169_v37 = vmul.f32 %v248_v35, %v155_v23 }
 0x214   :  { %v178_v39 = vmul.f32 %v205_v36, %v169_v37 }
 0x215   :  { %v250_v40 = vpop.eup %249 }
 0x216   :  { %v187_v41 = vadd.f32 %v206_v38, %v178_v39  ;;  %v170_v42 = vmul.f32 %v250_v40, %v156_v27 }
 0x218   :  { %189 = vst [vmem:[%s342_s6] sm:$0xff] %v187_v41  ;;  %v179_v43 = vmul.f32 %v205_v36, %v170_v42 }
 0x21a   :  { %v188_v44 = vadd.f32 %v206_v38, %v179_v43 }
 0x21c   :  { %190 = vst [vmem:[%s342_s6 + $0x8] sm:$0xff] %v188_v44 }

// kernel: encoder_forward.15
= control target key start
LH: loop header
LB: loop body
LE: loop exit
PB: predicated region body
PF: predicated region fallthrough
CT: control target
= control target key end

     0   :  { %s1215_s15 = smov 0   ;;  %s1217_s16 = smov 0   ;;  %s1353_s0 = inlined_call_operand.vmem [shape: f32[2,1,8], index: 0, kind: input, shape index: {}]   ;;  %s1354_s1 = inlined_call_operand.vmem [shape: bf16[2,8,384], index: 1, kind: input, shape index: {}, may-alias: {1,2,3}]   ;;  %s1355_s2 = inlined_call_operand.vmem [shape: bf16[2,8,384], index: 2, kind: input, shape index: {}, may-alias: {1,2,3}]   ;;  %s1356_s3 = inlined_call_operand.vmem [shape: bf16[2,8,384], index: 3, kind: input, shape index: {}, may-alias: {1,2,3}]   ;;  %s1357_s4 = inlined_call_operand.vmem [shape: bf16[2,8,128], index: 4, kind: output, shape index: {}]  }
   0x1   :  { %s1219_s17 = smov 0  }
   0x2 LB: > { %s33_s18 = sadd.s32 1, %s1179_s16  ;;  %p1005_p0 = scmp.ge.s32.totalorder %s1183_s17, 1  ;;  %s1183_s17 = sphi %s1219_s17, %s14_s17   ;;  %s1179_s16 = sphi %s1217_s16, %s1359_s16   ;;  %s1175_s15 = sphi %s1215_s15, %s1358_s15  }
   0x3   : > { %p35_p1 = scmp.ge.s32.totalorder %s33_s18, 2  ;;  %p242_p2 = scmp.lt.s32.totalorder %s1183_s17, 3 }
   0x5   : > { %s1361_s18 = smov (%p35_p1, %s33_s18), 0  ;;  %p243_p3 = pnand %p1005_p0, %p242_p2 }
   0x6   : > { %p301_p4 = scmp.lt.s32.totalorder (!%p243_p3), %s1175_s15, 1  ;;  %s1187_s27 = smov (!%p243_p3), 96  }
   0x7   : > { %246 = sbr.rel (%p243_p3) target bundleno = 1108 (0x454), region = 36  ;;  %s1188_s28 = smov (!%p243_p3), 64  }
   0x8   : > { %s1189_s29 = smov (!%p243_p3), 32  }
   0xc   : > { %v1185_v0 = vmov 0.0   ;;  %vm1186_vm0 = vmmov 0   ;;  %s1363_s15 = smov (!%p301_p4, %s1175_s15), 1  ;;  %vm357_vm1 = vcmask 261120   ;;  %vm404_vm2 = vcmask 64512  }
   0xd   : > { %1056 = vmatprep.subr.bf16.mxu0 %v1185_v0  ;;  %1058 = vmatprep.mubr.msk.bf16.mxu0 %vm1186_vm0, %v1185_v0  ;;  %s1242_s19 = smul.u32 12, %s1363_s15  ;;  %s303_s6 = scalar_lea.vmem %s1353_s0, %s1363_s15  ;;  %vm418_vm3 = vcmask 1043456   ;;  %vm465_vm4 = vcmask 257024   ;;  %vm596_vm5 = vcmask 519424   ;;  %vm727_vm6 = vcmask 781824  }
   0xe   : > { %1062 = vmatprep.subr.bf16.mxu1 %v1185_v0  ;;  %1064 = vmatprep.mubr.msk.bf16.mxu1 %vm1186_vm0, %v1185_v0  ;;  %v1271_v9 = vld [vmem:[%s303_s6] ss:$0 sm:$0xff]  ;;  %s1009_s11 = sshll.u32 %s1363_s15, 2  ;;  %vm858_vm7 = vcmask 1044224  }
   0xf   : > { %s1034_s20 = sadd.s32 4, %s1242_s19  ;;  %s315_s23 = scalar_lea.vmem %s1354_s1, %s1242_s19 }
  0x10   : > { %s1252_s26 = scalar_lea.vmem %s1355_s2, %s1034_s20  ;;  %v348_v3 = vld [vmem:[%s315_s23] sm:$0xf]  ;;  %s1036_s7 = sadd.s32 8, %s1242_s19 }
  0x11   : > { %v349_v1 = vld [vmem:[%s1252_s26] sm:$0xf]  ;;  %s1279_s10 = scalar_lea.vmem %s1356_s3, %s1036_s7  ;;  %s345_s14 = scalar_lea.vmem %s1357_s4, %s1009_s11 }
  0x12   : > { %v362_v2 = vsel %vm357_vm1, %v349_v1, 0  ;;  %v1137_v4 = vld [vmem:[%s315_s23] ss:$0 sps:$4 sm:$0xff]  }
  0x13   : > { %1057 = vmatpush3.bf16.xpose.msra.mxu0 %v362_v2  ;;  %473 = vrot.lane.b32.xlu1 %v1137_v4, %s1187_s27  ;;  %v1138_v5 = vld [vmem:[%s1252_s26] ss:$0 sps:$4 sm:$0xff]  }
  0x14   : > { %1074 = vmatprep.subr.bf16.mxu0 %v1185_v0  ;;  %v1139_v6 = vld [vmem:[%s315_s23] ss:$0 sps:$4 sm:$0xff]  }
  0x15   : > { %v1140_v7 = vld [vmem:[%s1252_s26] ss:$0 sps:$4 sm:$0xff]  }
  0x16   : > { %v1141_v8 = vld [vmem:[%s315_s23] ss:$0 sps:$4 sm:$0xff]  }
  0x17   : > { %609 = vrot.lane.b32.xlu1 %v1138_v5, %s1188_s28  ;;  %v350_v16 = vld [vmem:[%s1279_s10] sm:$0xf] }
  0x18   : > { %v420_v17 = vsel %vm418_vm3, %v350_v16, 0  ;;  %v1136_v18 = vld [vmem:[%s1252_s26] ss:$0 sps:$4 sm:$0xff]  }
  0x19   : > { %1063 = vmatpush3.bf16.msra.mxu1 %v420_v17  ;;  %v1142_v50 = vld [vmem:[%s1279_s10] ss:$0 sps:$4 sm:$0xff]  }
  0x1a   : > { %1059 = vmatmul.mubr.msk.bf16.vlgmr.msra.gmra.mxu0 %vm357_vm1, %v348_v3  ;;  %1068 = vmatprep.subr.bf16.mxu1 %v1185_v0  ;;  %v1143_v54 = vld [vmem:[%s1279_s10] ss:$0 sps:$4 sm:$0xff]  }
  0x1b   : > { %1076 = vmatprep.mubr.msk.bf16.mxu0 %vm1186_vm0, %v1185_v0  ;;  %604 = vrot.lane.b32.xlu1 %v1139_v6, %s1188_s28  ;;  %v1144_v57 = vld [vmem:[%s1279_s10] ss:$0 sps:$4 sm:$0xff]  }
  0x1f   : > { %740 = vrot.lane.b32.xlu1 %v1140_v7, %s1189_s29 }
  0x23   : > { %735 = vrot.lane.b32.xlu1 %v1141_v8, %s1189_s29 }
  0x85   : > { %v474_v24 = vpop.permute.xlu1 %473 }
  0x89   : > { %v610_v27 = vpop.permute.xlu1 %609 }
  0x8a   : > { %v615_v28 = vsel %vm357_vm1, %v610_v27, 0 }
  0x8d   : > { %v605_v29 = vpop.permute.xlu1 %604 }
  0x91   : > { %v741_v30 = vpop.permute.xlu1 %740 }
  0x92   : > { %v746_v31 = vsel %vm357_vm1, %v741_v30, 0 }
  0x95   : > { %v736_v32 = vpop.permute.xlu1 %735 }
  0xda   : > { %v398_v10 = vpop.f32.mrf.mxu0 }
  0xdb   : > { %v399_v11 = vadd.f32 %v1271_v9, %v398_v10 }
  0xdc   : > { %v1060_v12 = vpop.f32.mrf.mxu0 }
  0xdd   : > { %v405_v13 = vsel %vm404_vm2, %v399_v11, -inf }
  0xde   : > { %v401_v14 = vpop.f32.mrf.mxu0  ;;  %406 = vmax.xlane.f32.xlu0 %v405_v13 }
  0xe0   : > { %v1061_v15 = vpop.f32.mrf.mxu0 }
  0xf4   : > { %478 = vrot.lane.b32.xlu0 %v1136_v18, %s1187_s27 }
 0x167   : > { %v407_v19 = vpop.xlane.xlu0 %406 }
 0x168   : > { %v408_v20 = vsub.f32 %v399_v11, %v407_v19 }
 0x16a   : > { %v409_v21 = vmul.f32 1.442695, %v408_v20 }
 0x16b   : > { %v479_v22 = vpop.permute.xlu0 %478 }
 0x16c   : > { %1145 = vpow2.f32 %v409_v21  ;;  %v484_v25 = vsel %vm357_vm1, %v479_v22, 0 }
 0x179   : > { %v1286_v23 = vpop.eup %1145 }
 0x17a   : > { %v414_v26 = vpack.c.bf16 %v1286_v23, %v1286_v23  ;;  %v411_v19 = vsel %vm404_vm2, %v1286_v23, 0.0 }
 0x17c   : > { %1065 = vmatmul.mubr.msk.bf16.vlgmr.msra.gmra.mxu1 %vm404_vm2, %v414_v26 }
 0x17d   : > { %1069 = vmatpush3.bf16.xpose.msra.mxu1 %v484_v25  ;;  %1070 = vmatprep.mubr.msk.bf16.mxu1 %vm1186_vm0, %v1185_v0 }
 0x17e   : > { %1080 = vmatprep.subr.bf16.mxu1 %v1185_v0 }
 0x184   : > { %1071 = vmatmul.mubr.msk.bf16.vlgmr.msra.gmra.mxu1 %vm357_vm1, %v474_v24 }
 0x185   : > { %1081 = vmatpush3.bf16.xpose.msra.mxu1 %v615_v28  ;;  %1082 = vmatprep.mubr.msk.bf16.mxu1 %vm1186_vm0, %v1185_v0 }
 0x186   : > { %1092 = vmatprep.subr.bf16.mxu1 %v1185_v0 }
 0x18c   : > { %1083 = vmatmul.mubr.msk.bf16.vlgmr.msra.gmra.mxu1 %vm357_vm1, %v605_v29 }
 0x18d   : > { %1093 = vmatpush3.bf16.xpose.msra.mxu1 %v746_v31  ;;  %1094 = vmatprep.mubr.msk.bf16.mxu1 %vm1186_vm0, %v1185_v0 }
 0x194   : > { %1095 = vmatmul.mubr.msk.bf16.vlgmr.msra.gmra.mxu1 %vm357_vm1, %v736_v32 }
 0x23c   : > { %v1305_v33 = vpop.f32.mrf.mxu1 }
 0x23e   : > { %v1066_v34 = vpop.f32.mrf.mxu1 }
 0x240   : > { %v459_v35 = vpop.f32.mrf.mxu1 }
 0x242   : > { %v1067_v36 = vpop.f32.mrf.mxu1 }
 0x244   : > { %v520_v37 = vpop.f32.mrf.mxu1 }
 0x245   : > { %v521_v38 = vadd.f32 %v1271_v9, %v520_v37 }
 0x246   : > { %v1072_v39 = vpop.f32.mrf.mxu1 }
 0x247   : > { %v526_v40 = vsel %vm404_vm2, %v521_v38, -inf }
 0x248   : > { %527 = vmax.xlane.f32.xlu1 %v526_v40  ;;  %v523_v41 = vpop.f32.mrf.mxu1 }
 0x24a   : > { %v1073_v42 = vpop.f32.mrf.mxu1 }
 0x24c   : > { %v651_v43 = vpop.f32.mrf.mxu1 }
 0x24d   : > { %v652_v44 = vadd.f32 %v1271_v9, %v651_v43 }
 0x24e   : > { %v1084_v45 = vpop.f32.mrf.mxu1 }
 0x24f   : > { %v657_v46 = vsel %vm404_vm2, %v652_v44, -inf }
 0x250   : > { %658 = vmax.xlane.f32.xlu0 %v657_v46  ;;  %v654_v47 = vpop.f32.mrf.mxu1 }
 0x252   : > { %v1085_v48 = vpop.f32.mrf.mxu1 }
 0x254   : > { %v782_v49 = vpop.f32.mrf.mxu1 }
 0x255   : > { %v783_v55 = vadd.f32 %v1271_v9, %v782_v49 }
 0x256   : > { %v1096_v51 = vpop.f32.mrf.mxu1 }
 0x257   : > { %v788_v56 = vsel %vm404_vm2, %v783_v55, -inf }
 0x258   : > { %v785_v52 = vpop.f32.mrf.mxu1 }
 0x259   : > { %670 = vrot.lane.b32.xlu1 %v1142_v50, %s1188_s28 }
 0x25a   : > { %v1097_v53 = vpop.f32.mrf.mxu1 }
 0x266   : > { %539 = vrot.lane.b32.xlu0 %v1143_v54, %s1187_s27 }
 0x27d   : > { %789 = vmax.xlane.f32.xlu1 %v788_v56 }
 0x28e   : > { %801 = vrot.lane.b32.xlu1 %v1144_v57, %s1189_s29 }
 0x2d1   : > { %v528_v58 = vpop.xlane.xlu1 %527 }
 0x2d2   : > { %v529_v59 = vsub.f32 %v521_v38, %v528_v58 }
 0x2d4   : > { %v530_v60 = vmul.f32 1.442695, %v529_v59 }
 0x2d5   : > { %v671_v4 = vpop.permute.xlu1 %670 }
 0x2d6   : > { %1147 = vpow2.f32 %v530_v60  ;;  %v676_v7 = vsel %vm418_vm3, %v671_v4, 0 }
 0x2d9   : > { %v659_v61 = vpop.xlane.xlu0 %658 }
 0x2da   : > { %v660_v62 = vsub.f32 %v652_v44, %v659_v61 }
 0x2dc   : > { %v661_v63 = vmul.f32 1.442695, %v660_v62 }
 0x2dd   : > { %v540_v1 = vpop.permute.xlu0 %539 }
 0x2de   : > { %1149 = vpow2.f32 %v661_v63  ;;  %v545_v2 = vsel %vm418_vm3, %v540_v1, 0 }
 0x2df   : > { %1075 = vmatpush3.bf16.msra.mxu0 %v545_v2 }
 0x2e0   : > { %1086 = vmatprep.subr.bf16.mxu0 %v1185_v0 }
 0x2e3   : > { %v1148_v3 = vpop.eup %1147 }
 0x2e4   : > { %v532_v5 = vsel %vm404_vm2, %v1148_v3, 0.0  ;;  %v535_v6 = vpack.c.bf16 %v1148_v3, %v1148_v3 }
 0x2e5   : > { %533 = vadd.xlane.f32.xlu0 %v532_v5 }
 0x2e6   : > { %1077 = vmatmul.mubr.msk.bf16.vlgmr.msra.gmra.mxu0 %vm404_vm2, %v535_v6 }
 0x2e7   : > { %1087 = vmatpush3.bf16.msra.mxu0 %v676_v7  ;;  %1088 = vmatprep.mubr.msk.bf16.mxu0 %vm1186_vm0, %v1185_v0 }
 0x2e8   : > { %1098 = vmatprep.subr.bf16.mxu0 %v1185_v0 }
 0x2eb   : > { %v1150_v8 = vpop.eup %1149 }
 0x2ec   : > { %v663_v9 = vsel %vm404_vm2, %v1150_v8, 0.0  ;;  %v666_v10 = vpack.c.bf16 %v1150_v8, %v1150_v8 }
 0x2ed   : > { %664 = vadd.xlane.f32.xlu1 %v663_v9 }
 0x2ee   : > { %1089 = vmatmul.mubr.msk.bf16.vlgmr.msra.gmra.mxu0 %vm404_vm2, %v666_v10 }
 0x2ef   : > { %1100 = vmatprep.mubr.msk.bf16.mxu0 %vm1186_vm0, %v1185_v0 }
 0x306   : > { %v790_v11 = vpop.xlane.xlu1 %789 }
 0x307   : > { %v791_v12 = vsub.f32 %v783_v55, %v790_v11 }
 0x309   : > { %v792_v13 = vmul.f32 1.442695, %v791_v12 }
 0x30a   : > { %v802_v14 = vpop.permute.xlu1 %801 }
 0x30b   : > { %1151 = vpow2.f32 %v792_v13  ;;  %v807_v15 = vsel %vm418_vm3, %v802_v14, 0 }
 0x30c   : > { %1099 = vmatpush3.bf16.msra.mxu0 %v807_v15 }
 0x318   : > { %v1152_v16 = vpop.eup %1151 }
 0x319   : > { %v794_v17 = vsel %vm404_vm2, %v1152_v16, 0.0  ;;  %v797_v18 = vpack.c.bf16 %v1152_v16, %v1152_v16 }
 0x31a   : > { %795 = vadd.xlane.f32.xlu0 %v794_v17 }
 0x31b   : > { %1101 = vmatmul.mubr.msk.bf16.vlgmr.msra.gmra.mxu0 %vm404_vm2, %v797_v18 }
 0x31e   : > { %412 = vadd.xlane.f32.xlu0 %v411_v19 }
 0x36e   : > { %v534_v0 = vpop.xlane.xlu0 %533 }
 0x36f   : > { %1153 = vrcp.f32 %v534_v0 }
 0x376   : > { %v665_v20 = vpop.xlane.xlu1 %664 }
 0x377   : > { %1155 = vrcp.f32 %v665_v20 }
 0x37c   : > { %v1154_v22 = vpop.eup %1153 }
 0x384   : > { %v1156_v31 = vpop.eup %1155 }
 0x3a3   : > { %v796_v21 = vpop.xlane.xlu0 %795 }
 0x3a6   : > { %v581_v24 = vpop.f32.mrf.mxu0 }
 0x3a7   : > { %v588_v25 = vmul.f32 %v1154_v22, %v581_v24  ;;  %v413_v26 = vpop.xlane.xlu0 %412 }
 0x3a8   : > { %1157 = vrcp.f32 %v413_v26  ;;  %v1078_v27 = vpop.f32.mrf.mxu0 }
 0x3a9   : > { %v1037_v28 = vpack.c.bf16 %v588_v25, %v588_v25  ;;  %1159 = vrcp.f32 %v796_v21 }
 0x3aa   : > { %v584_v29 = vpop.f32.mrf.mxu0 }
 0x3ab   : > { %593 = vrot.lane.b32.xlu1 %v1037_v28, %s1189_s29 }
 0x3ac   : > { %v1079_v30 = vpop.f32.mrf.mxu0 }
 0x3ae   : > { %v712_v23 = vpop.f32.mrf.mxu0 }
 0x3af   : > { %v719_v32 = vmul.f32 %v1156_v31, %v712_v23 }
 0x3b0   : > { %v1090_v34 = vpop.f32.mrf.mxu0 }
 0x3b1   : > { %v1038_v35 = vpack.c.bf16 %v719_v32, %v719_v32 }
 0x3b2   : > { %v715_v36 = vpop.f32.mrf.mxu0 }
 0x3b3   : > { %724 = vrot.lane.b32.xlu0 %v1038_v35, %s1188_s28 }
 0x3b4   : > { %v1091_v37 = vpop.f32.mrf.mxu0 }
 0x3b5   : > { %v1158_v38 = vpop.eup %1157 }
 0x3b6   : > { %v463_v39 = vmul.f32 %v1158_v38, %v1305_v33  ;;  %v1160_v41 = vpop.eup %1159 }
 0x3b8   : > { %v464_v40 = vpack.c.bf16 %v463_v39, %v463_v39 }
 0x3ba   : > { %466 = vst.msk [vmem:[%s345_s14] sm:$0xf] %vm465_vm4, %v464_v40 }
 0x3db   : > { %v843_v42 = vpop.f32.mrf.mxu0 }
 0x3dc   : > { %v850_v43 = vmul.f32 %v1160_v41, %v843_v42 }
 0x3dd   : > { %v1102_v44 = vpop.f32.mrf.mxu0 }
 0x3de   : > { %v1039_v45 = vpack.c.bf16 %v850_v43, %v850_v43 }
 0x3df   : > { %v846_v46 = vpop.f32.mrf.mxu0 }
 0x3e0   : > { %855 = vrot.lane.b32.xlu1 %v1039_v45, %s1187_s27 }
 0x3e1   : > { %v1103_v47 = vpop.f32.mrf.mxu0 }
 0x41d   : > { %v594_v48 = vpop.permute.xlu1 %593 }
 0x41e   : > { %597 = vst.msk [vmem:[%s345_s14] sm:$0xf] %vm596_vm5, %v594_v48 }
 0x425   : > { %v725_v33 = vpop.permute.xlu0 %724 }
 0x426   : > { %728 = vst.msk [vmem:[%s345_s14] sm:$0xf] %vm727_vm6, %v725_v33 }
 0x452   : > { %v856_v49 = vpop.permute.xlu1 %855 }
 0x453   : > { %859 = vst.msk [vmem:[%s345_s14] sm:$0xf] %vm858_vm7, %v856_v49 }
 0x454 PF: > { %s14_s17 = sadd.s32 1, %s1183_s17   ;;  %s1358_s15 = smov %s1179_s16 }
 0x455   : > { %p11_p5 = scmp.ge.s32.totalorder %s14_s17, 4   ;;  %s1359_s16 = smov %s1361_s18 }
 0x457   :  { %13 = sbr.rel (!%p11_p5) target bundleno = 2 (0x2), region = 75 }

// kernel: encoder_forward.17
= control target key start
LH: loop header
LB: loop body
LE: loop exit
PB: predicated region body
PF: predicated region fallthrough
CT: control target
= control target key end

     0   :  { %v1099_v2 = vmov 0   ;;  %s1392_s0 = inlined_call_operand.vmem [shape: f32[16,128], index: 0, kind: input, shape index: {}]   ;;  %s1393_s1 = inlined_call_operand.vmem [shape: bf16[128,512], index: 1, kind: input, shape index: {}]   ;;  %s1394_s2 = inlined_call_operand.vmem [shape: f32[1,512], index: 2, kind: input, shape index: {}]   ;;  %s1395_s3 = inlined_call_operand.vmem [shape: bf16[512,128], index: 3, kind: input, shape index: {}]   ;;  %s1396_s4 = inlined_call_operand.vmem [shape: f32[1,128], index: 4, kind: input, shape index: {}]   ;;  %s1397_s5 = inlined_call_operand.vmem [shape: f32[1,128], index: 5, kind: input, shape index: {}]   ;;  %s1398_s6 = inlined_call_operand.vmem [shape: f32[1,128], index: 6, kind: input, shape index: {}]   ;;  %s1399_s7 = inlined_call_operand.hbm [shape: f32[16,128], index: 7, kind: output, shape index: {}]  }
   0x1   :  { %v976_v0 = vld [vmem:[%s1393_s1 + $0xe4] ss:$16 sps:$4 sm:$0xff]   ;;  %v978_v1 = vld [vmem:[%s1393_s1 + $0xec] ss:$16 sps:$4 sm:$0xff]   ;;  %300 = vmatprep.mubr.bf16.mxu0 %v1099_v2  ;;  %343 = vmatprep.mubr.bf16.mxu1 %v1099_v2  ;;  %v980_v3 = vld [vmem:[%s1393_s1 + $0xe0] ss:$16 sps:$4 sm:$0xff]  }
   0x2   :  { %268 = vmatprep.subr.bf16.mxu0 %v976_v0  ;;  %v981_v4 = vld [vmem:[%s1393_s1 + $0xe8] ss:$16 sps:$4 sm:$0xff]   ;;  %311 = vmatprep.subr.bf16.mxu1 %v978_v1  ;;  %v982_v5 = vld [vmem:[%s1393_s1 + $0xc4] ss:$16 sps:$4 sm:$0xff]   ;;  %v984_v6 = vld [vmem:[%s1393_s1 + $0xcc] ss:$16 sps:$4 sm:$0xff]  }
   0x3   :  { %269 = vmatpush1.bf16.msra.mxu0 %v980_v3  ;;  %312 = vmatpush1.bf16.msra.mxu1 %v981_v4  ;;  %v986_v7 = vld [vmem:[%s1393_s1 + $0xc0] ss:$16 sps:$4 sm:$0xff]   ;;  %v987_v8 = vld [vmem:[%s1393_s1 + $0xc8] ss:$16 sps:$4 sm:$0xff]   ;;  %v988_v9 = vld [vmem:[%s1393_s1 + $0xa4] ss:$16 sps:$4 sm:$0xff]  }
   0x4   :  { %270 = vmatprep.subr.bf16.mxu0 %v982_v5  ;;  %313 = vmatprep.subr.bf16.mxu1 %v984_v6  ;;  %v990_v10 = vld [vmem:[%s1393_s1 + $0xac] ss:$16 sps:$4 sm:$0xff]   ;;  %v992_v11 = vld [vmem:[%s1393_s1 + $0xa0] ss:$16 sps:$4 sm:$0xff]   ;;  %v993_v12 = vld [vmem:[%s1393_s1 + $0xa8] ss:$16 sps:$4 sm:$0xff]  }
   0x5   :  { %v994_v13 = vld [vmem:[%s1393_s1 + $0x84] ss:$16 sps:$4 sm:$0xff]   ;;  %v996_v14 = vld [vmem:[%s1393_s1 + $0x8c] ss:$16 sps:$4 sm:$0xff]   ;;  %v998_v15 = vld [vmem:[%s1393_s1 + $0x80] ss:$16 sps:$4 sm:$0xff]  }
   0x6   :  { %v999_v16 = vld [vmem:[%s1393_s1 + $0x88] ss:$16 sps:$4 sm:$0xff]   ;;  %v1000_v17 = vld [vmem:[%s1393_s1 + $0x64] ss:$16 sps:$4 sm:$0xff]   ;;  %v1002_v18 = vld [vmem:[%s1393_s1 + $0x6c] ss:$16 sps:$4 sm:$0xff]  }
   0x7   :  { %271 = vmatpush1.bf16.msra.mxu0 %v986_v7  ;;  %314 = vmatpush1.bf16.msra.mxu1 %v987_v8  ;;  %v1004_v19 = vld [vmem:[%s1393_s1 + $0x60] ss:$16 sps:$4 sm:$0xff]   ;;  %v1005_v20 = vld [vmem:[%s1393_s1 + $0x68] ss:$16 sps:$4 sm:$0xff]   ;;  %v1006_v21 = vld [vmem:[%s1393_s1 + $0x44] ss:$16 sps:$4 sm:$0xff]  }
   0x8   :  { %272 = vmatprep.subr.bf16.mxu0 %v988_v9  ;;  %315 = vmatprep.subr.bf16.mxu1 %v990_v10  ;;  %v1008_v22 = vld [vmem:[%s1393_s1 + $0x4c] ss:$16 sps:$4 sm:$0xff]   ;;  %v1010_v23 = vld [vmem:[%s1393_s1 + $0x40] ss:$16 sps:$4 sm:$0xff]   ;;  %v1011_v24 = vld [vmem:[%s1393_s1 + $0x48] ss:$16 sps:$4 sm:$0xff]  }
   0x9   :  { %v1012_v25 = vld [vmem:[%s1393_s1 + $0x24] ss:$16 sps:$4 sm:$0xff]   ;;  %v1014_v26 = vld [vmem:[%s1393_s1 + $0x2c] ss:$16 sps:$4 sm:$0xff]   ;;  %v1016_v29 = vld [vmem:[%s1393_s1 + $0x20] ss:$16 sps:$4 sm:$0xff]  }
   0xa   :  { %v1224_v27 = vld [vmem:[%s1392_s0] sm:$0xff]  ;;  %v1229_v28 = vld [vmem:[%s1392_s0 + $0x8] sm:$0xff] }
   0xb   :  { %273 = vmatpush1.bf16.msra.mxu0 %v992_v11  ;;  %316 = vmatpush1.bf16.msra.mxu1 %v993_v12  ;;  %v1017_v30 = vld [vmem:[%s1393_s1 + $0x28] ss:$16 sps:$4 sm:$0xff]   ;;  %v926_v31 = vpack.c.bf16 %v1229_v28, %v1224_v27  ;;  %v1018_v32 = vld [vmem:[%s1393_s1 + $0x4] ss:$16 sps:$4 sm:$0xff]   ;;  %v1020_v33 = vld [vmem:[%s1393_s1 + $0xc] ss:$16 sps:$4 sm:$0xff]  }
   0xc   :  { %274 = vmatprep.subr.bf16.mxu0 %v994_v13  ;;  %317 = vmatprep.subr.bf16.mxu1 %v996_v14  ;;  %v1022_v34 = vld [vmem:[%s1393_s1] ss:$16 sps:$4 sm:$0xff]   ;;  %v1023_v35 = vld [vmem:[%s1393_s1 + $0x8] ss:$16 sps:$4 sm:$0xff]  }
   0xd   :  { %927 = vst [vmem:[#allocation3] sm:$0xff] %v926_v31  }
   0xf   :  { %275 = vmatpush1.bf16.msra.mxu0 %v998_v15  ;;  %318 = vmatpush1.bf16.msra.mxu1 %v999_v16 }
  0x10   :  { %276 = vmatprep.subr.bf16.mxu0 %v1000_v17  ;;  %319 = vmatprep.subr.bf16.mxu1 %v1002_v18 }
  0x13   :  { %277 = vmatpush1.bf16.msra.mxu0 %v1004_v19  ;;  %320 = vmatpush1.bf16.msra.mxu1 %v1005_v20 }
  0x14   :  { %278 = vmatprep.subr.bf16.mxu0 %v1006_v21  ;;  %321 = vmatprep.subr.bf16.mxu1 %v1008_v22  ;;  %v1024_v36 = vld [vmem:[#allocation3] sm:$0xff]  }
  0x17   :  { %279 = vmatpush1.bf16.msra.mxu0 %v1010_v23  ;;  %322 = vmatpush1.bf16.msra.mxu1 %v1011_v24 }
  0x18   :  { %280 = vmatprep.subr.bf16.mxu0 %v1012_v25  ;;  %323 = vmatprep.subr.bf16.mxu1 %v1014_v26 }
  0x1b   :  { %281 = vmatpush1.bf16.msra.mxu0 %v1016_v29  ;;  %324 = vmatpush1.bf16.msra.mxu1 %v1017_v30 }
  0x1c   :  { %282 = vmatprep.subr.bf16.mxu0 %v1018_v32  ;;  %325 = vmatprep.subr.bf16.mxu1 %v1020_v33 }
  0x1f   :  { %283 = vmatpush1.bf16.msra.mxu0 %v1022_v34  ;;  %326 = vmatpush1.bf16.msra.mxu1 %v1023_v35 }
  0x22   :  { %301 = vmatmul.mubr.bf16.vlgmr.msra.gmra.mxu0 %v1024_v36  ;;  %344 = vmatmul.mubr.bf16.vlgmr.msra.gmra.mxu1 %v1024_v36 }
  0x23   :  { %12 = vsyncpa [#allocation5], 0  ;;  %v1025_v37 = vld [vmem:[%s1395_s3 + $0x78] sm:$0xff]   ;;  %v1029_v41 = vld [vmem:[%s1395_s3 + $0x70] sm:$0xff]   ;;  %v82_v5 = vlaneseq  ;;  %s1100_s17 = smov [#allocation4]  }
  0x24   :  { %v1026_v38 = vld [vmem:[%s1395_s3 + $0xf8] sm:$0xff]   ;;  %928 = vmatprep.subr.bf16.mxu0 %v1025_v37  ;;  %v1030_v42 = vld [vmem:[%s1395_s3 + $0xf0] sm:$0xff]   ;;  %v1033_v45 = vld [vmem:[%s1395_s3 + $0x68] sm:$0xff]   ;;  %s840_s18 = sshll.u32 %s1100_s17, 4  ;;  %s841_s18 = int_to_ptr.vmem [resolvable:$true] %s840_s18 }
  0x25   :  { %v1027_v39 = vld [vmem:[%s1395_s3 + $0x38] sm:$0xff]   ;;  %950 = vmatprep.subr.bf16.mxu1 %v1026_v38  ;;  %v1031_v43 = vld [vmem:[%s1395_s3 + $0x30] sm:$0xff]   ;;  %v1034_v46 = vld [vmem:[%s1395_s3 + $0xe8] sm:$0xff]   ;;  %v83_v6 = vshrl.u32 %v82_v5, 7  ;;  %s1077_s0 = scalar_lea.vmem %s841_s18, 256  ;;  %p1082_p1 = scmp.lt.s32.totalorder %s841_s18, %s841_s18 }
  0x26   :  { %v1028_v40 = vld [vmem:[%s1395_s3 + $0xb8] sm:$0xff]   ;;  %929 = vmatpush3.bf16.msra.mxu0 %v1027_v39  ;;  %v1032_v44 = vld [vmem:[%s1395_s3 + $0xb0] sm:$0xff]   ;;  %v1035_v47 = vld [vmem:[%s1395_s3 + $0x28] sm:$0xff]   ;;  %p1078_p0 = scmp.ne.s32.totalorder %s841_s18, %s1077_s0  ;;  %p1083_p2 = scmp.lt.s32.totalorder %s1077_s0, %s1077_s0 }
  0x27   :  { %951 = vmatpush3.bf16.msra.mxu1 %v1028_v40  ;;  %930 = vmatprep.subr.bf16.mxu0 %v1029_v41  ;;  %v1036_v48 = vld [vmem:[%s1395_s3 + $0xa8] sm:$0xff]   ;;  %v1037_v49 = vld [vmem:[%s1395_s3 + $0x60] sm:$0xff]   ;;  %v1041_v53 = vld [vmem:[%s1395_s3 + $0x58] sm:$0xff]   ;;  %v84_v7 = vsub.s32 0, %v83_v6  ;;  %v92_v8 = vsub.s32 2, %v83_v6  ;;  %v88_v10 = vsub.s32 1, %v83_v6 }
  0x28   :  { %952 = vmatprep.subr.bf16.mxu1 %v1030_v42  ;;  %v1038_v50 = vld [vmem:[%s1395_s3 + $0xe0] sm:$0xff]   ;;  %v1042_v54 = vld [vmem:[%s1395_s3 + $0xd8] sm:$0xff]   ;;  %v1045_v57 = vld [vmem:[%s1395_s3 + $0x50] sm:$0xff]   ;;  %v96_v11 = vsub.s32 3, %v83_v6  ;;  %p1084_p3 = por %p1083_p2, %p1082_p1 }
  0x29   :  { %v1039_v51 = vld [vmem:[%s1395_s3 + $0x20] sm:$0xff]   ;;  %v1043_v55 = vld [vmem:[%s1395_s3 + $0x18] sm:$0xff]   ;;  %v1046_v58 = vld [vmem:[%s1395_s3 + $0xd0] sm:$0xff]  }
  0x2a   :  { %931 = vmatpush3.bf16.msra.mxu0 %v1031_v43  ;;  %v1040_v52 = vld [vmem:[%s1395_s3 + $0xa0] sm:$0xff]   ;;  %v1044_v56 = vld [vmem:[%s1395_s3 + $0x98] sm:$0xff]   ;;  %v1047_v59 = vld [vmem:[%s1395_s3 + $0x10] sm:$0xff]   ;;  %p1085_p4 = pnand %p1084_p3, %p1078_p0 }
  0x2b   :  { %953 = vmatpush3.bf16.msra.mxu1 %v1032_v44  ;;  %932 = vmatprep.subr.bf16.mxu0 %v1033_v45  ;;  %v1048_v60 = vld [vmem:[%s1395_s3 + $0x90] sm:$0xff]   ;;  %v1049_v61 = vld [vmem:[%s1395_s3 + $0x48] sm:$0xff]   ;;  %v1053_v1 = vld [vmem:[%s1395_s3 + $0x40] sm:$0xff]  }
  0x2c   :  { %954 = vmatprep.subr.bf16.mxu1 %v1034_v46  ;;  %v1050_v62 = vld [vmem:[%s1395_s3 + $0xc8] sm:$0xff]   ;;  %v1054_v2 = vld [vmem:[%s1395_s3 + $0xc0] sm:$0xff]  }
  0x2d   :  { %v1051_v63 = vld [vmem:[%s1395_s3 + $0x8] sm:$0xff]   ;;  %v1055_v3 = vld [vmem:[%s1395_s3] sm:$0xff]  }
  0x2e   :  { %933 = vmatpush3.bf16.msra.mxu0 %v1035_v47  ;;  %v1052_v0 = vld [vmem:[%s1395_s3 + $0x88] sm:$0xff]   ;;  %v1056_v4 = vld [vmem:[%s1395_s3 + $0x80] sm:$0xff]  }
  0x2f   :  { %955 = vmatpush3.bf16.msra.mxu1 %v1036_v48  ;;  %934 = vmatprep.subr.bf16.mxu0 %v1037_v49  ;;  %v80_v9 = vld [vmem:[%s1394_s2] sm:$0xf] }
  0x30   :  { %956 = vmatprep.subr.bf16.mxu1 %v1038_v50  ;;  %v85_v12 = vrot.slane %v80_v9, %v84_v7  ;;  %v93_v13 = vrot.slane %v80_v9, %v92_v8  ;;  %v89_v14 = vrot.slane %v80_v9, %v88_v10  ;;  %v97_v15 = vrot.slane %v80_v9, %v96_v11 }
  0x32   :  { %935 = vmatpush3.bf16.msra.mxu0 %v1039_v51 }
  0x33   :  { %957 = vmatpush3.bf16.msra.mxu1 %v1040_v52  ;;  %936 = vmatprep.subr.bf16.mxu0 %v1041_v53 }
  0x34   :  { %958 = vmatprep.subr.bf16.mxu1 %v1042_v54 }
  0x36   :  { %937 = vmatpush3.bf16.msra.mxu0 %v1043_v55 }
  0x37   :  { %959 = vmatpush3.bf16.msra.mxu1 %v1044_v56  ;;  %938 = vmatprep.subr.bf16.mxu0 %v1045_v57 }
  0x38   :  { %960 = vmatprep.subr.bf16.mxu1 %v1046_v58 }
  0x3a   :  { %939 = vmatpush3.bf16.msra.mxu0 %v1047_v59 }
  0x3b   :  { %961 = vmatpush3.bf16.msra.mxu1 %v1048_v60  ;;  %940 = vmatprep.subr.bf16.mxu0 %v1049_v61 }
  0x3c   :  { %962 = vmatprep.subr.bf16.mxu1 %v1050_v62 }
  0x3e   :  { %941 = vmatpush3.bf16.msra.mxu0 %v1051_v63 }
  0x3f   :  { %963 = vmatpush3.bf16.msra.mxu1 %v1052_v0  ;;  %942 = vmatprep.subr.bf16.mxu0 %v1053_v1 }
  0x40   :  { %964 = vmatprep.subr.bf16.mxu1 %v1054_v2 }
  0x42   :  { %943 = vmatpush3.bf16.msra.mxu0 %v1055_v3 }
  0x43   :  { %965 = vmatpush3.bf16.msra.mxu1 %v1056_v4 }
  0xe2   :  { %v302_v16 = vpop.f32.mrf.mxu0  ;;  %v345_v17 = vpop.f32.mrf.mxu1 }
  0xe3   :  { %v1350_v18 = vadd.f32 %v302_v16, %v85_v12  ;;  %v1352_v19 = vadd.f32 %v345_v17, %v93_v13 }
  0xe4   :  { %v304_v20 = vpop.f32.mrf.mxu0  ;;  %v347_v21 = vpop.f32.mrf.mxu1 }
  0xe5   :  { %v362_v22 = vmul.f32 0.044715, %v1350_v18  ;;  %v364_v23 = vmul.f32 0.044715, %v1352_v19  ;;  %v305_v24 = vadd.f32 %v304_v20, %v89_v14  ;;  %v1356_v25 = vadd.f32 %v347_v21, %v97_v15 }
  0xe6   :  { %v306_v26 = vpop.f32.mrf.mxu0  ;;  %v349_v29 = vpop.f32.mrf.mxu1  ;;  %v354_v20 = vmul.f32 0.5, %v1350_v18 }
  0xe7   :  { %v370_v30 = vmul.f32 %v362_v22, %v1350_v18  ;;  %v372_v31 = vmul.f32 %v364_v23, %v1352_v19  ;;  %v363_v32 = vmul.f32 0.044715, %v305_v24  ;;  %v365_v33 = vmul.f32 0.044715, %v1356_v25 }
  0xe8   :  { %v307_v34 = vadd.f32 %v306_v26, %v85_v12  ;;  %v1361_v35 = vadd.f32 %v349_v29, %v93_v13  ;;  %v308_v36 = vpop.f32.mrf.mxu0  ;;  %v351_v37 = vpop.f32.mrf.mxu1  ;;  %v355_v16 = vmul.f32 0.5, %v305_v24 }
  0xe9   :  { %v378_v38 = vmul.f32 %v370_v30, %v1350_v18  ;;  %v380_v39 = vmul.f32 %v372_v31, %v1352_v19  ;;  %v371_v40 = vmul.f32 %v363_v32, %v305_v24  ;;  %v373_v41 = vmul.f32 %v365_v33, %v1356_v25 }
  0xea   :  { %v366_v42 = vmul.f32 0.044715, %v307_v34  ;;  %v368_v43 = vmul.f32 0.044715, %v1361_v35  ;;  %v309_v44 = vadd.f32 %v308_v36, %v89_v14  ;;  %v352_v45 = vadd.f32 %v351_v37, %v97_v15 }
  0xeb   :  { %v386_v46 = vadd.f32 %v378_v38, %v1350_v18  ;;  %v388_v47 = vadd.f32 %v380_v39, %v1352_v19  ;;  %v379_v48 = vmul.f32 %v371_v40, %v305_v24  ;;  %v381_v49 = vmul.f32 %v373_v41, %v1356_v25 }
  0xec   :  { %v374_v50 = vmul.f32 %v366_v42, %v307_v34  ;;  %v376_v51 = vmul.f32 %v368_v43, %v1361_v35  ;;  %v367_v52 = vmul.f32 0.044715, %v309_v44  ;;  %v369_v53 = vmul.f32 0.044715, %v352_v45 }
  0xed   :  { %v394_v54 = vmul.f32 0.7978846, %v386_v46  ;;  %v396_v55 = vmul.f32 0.7978846, %v388_v47  ;;  %v387_v56 = vadd.f32 %v379_v48, %v305_v24  ;;  %v389_v62 = vadd.f32 %v381_v49, %v1356_v25 }
  0xee   :  { %v382_v57 = vmul.f32 %v374_v50, %v307_v34  ;;  %v384_v58 = vmul.f32 %v376_v51, %v1361_v35  ;;  %v375_v59 = vmul.f32 %v367_v52, %v309_v44  ;;  %v377_v60 = vmul.f32 %v369_v53, %v352_v45 }
  0xef   :  { %v395_v61 = vmul.f32 0.7978846, %v387_v56  ;;  %1057 = vtanh.f32 %v394_v54  ;;  %v397_v3 = vmul.f32 0.7978846, %v389_v62  ;;  %v358_v26 = vmul.f32 0.5, %v307_v34 }
  0xf0   :  { %v390_v63 = vadd.f32 %v382_v57, %v307_v34  ;;  %v392_v0 = vadd.f32 %v384_v58, %v1361_v35  ;;  %v383_v1 = vmul.f32 %v375_v59, %v309_v44  ;;  %1059 = vtanh.f32 %v396_v55  ;;  %v918_v56 = vld [vmem:[%s1396_s4] ss:$0 sm:$0xff] }
  0xf1   :  { %v385_v2 = vmul.f32 %v377_v60, %v352_v45  ;;  %1061 = vtanh.f32 %v395_v61  ;;  %v359_v32 = vmul.f32 0.5, %v309_v44  ;;  %v360_v36 = vmul.f32 0.5, %v1361_v35 }
  0xf2   :  { %v398_v4 = vmul.f32 0.7978846, %v390_v63  ;;  %v400_v5 = vmul.f32 0.7978846, %v392_v0  ;;  %v391_v6 = vadd.f32 %v383_v1, %v309_v44  ;;  %1063 = vtanh.f32 %v397_v3 }
  0xf3   :  { %v393_v7 = vadd.f32 %v385_v2, %v352_v45  ;;  %v357_v38 = vmul.f32 0.5, %v1356_v25  ;;  %v361_v39 = vmul.f32 0.5, %v352_v45  ;;  %v356_v18 = vmul.f32 0.5, %v1352_v19 }
  0xf4   :  { %1065 = vtanh.f32 %v398_v4  ;;  %v399_v8 = vmul.f32 0.7978846, %v391_v6 }
  0xf5   :  { %1067 = vtanh.f32 %v400_v5  ;;  %v401_v9 = vmul.f32 0.7978846, %v393_v7 }
  0xf6   :  { %1069 = vtanh.f32 %v399_v8 }
  0xf7   :  { %1071 = vtanh.f32 %v401_v9 }
  0xfc   :  { %v1058_v10 = vpop.eup %1057 }
  0xfd   :  { %v1060_v11 = vpop.eup %1059  ;;  %v410_v29 = vadd.f32 1.0, %v1058_v10 }
  0xfe   :  { %v1062_v12 = vpop.eup %1061  ;;  %v412_v37 = vadd.f32 1.0, %v1060_v11 }
  0xff   :  { %v1064_v13 = vpop.eup %1063  ;;  %v411_v17 = vadd.f32 1.0, %v1062_v12  ;;  %v418_v47 = vmul.f32 %v410_v29, %v354_v20  ;;  %v920_v20 = vld [vmem:[%s1398_s6] ss:$0 sm:$0xff] }
 0x100   :  { %v413_v23 = vadd.f32 1.0, %v1064_v13  ;;  %v420_v49 = vmul.f32 %v412_v37, %v356_v18 }
 0x101   :  { %v1066_v14 = vpop.eup %1065  ;;  %v419_v41 = vmul.f32 %v411_v17, %v355_v16  ;;  %v919_v16 = vld [vmem:[%s1397_s5] ss:$0 sm:$0xff] }
 0x102   :  { %v1068_v15 = vpop.eup %1067  ;;  %v414_v21 = vadd.f32 1.0, %v1066_v14  ;;  %v421_v46 = vmul.f32 %v413_v23, %v357_v38 }
 0x103   :  { %v1070_v22 = vpop.eup %1069  ;;  %v416_v30 = vadd.f32 1.0, %v1068_v15 }
 0x104   :  { %v1072_v31 = vpop.eup %1071  ;;  %v415_v33 = vadd.f32 1.0, %v1070_v22  ;;  %v422_v24 = vmul.f32 %v414_v21, %v358_v26 }
 0x105   :  { %v417_v40 = vadd.f32 1.0, %v1072_v31  ;;  %v424_v43 = vmul.f32 %v416_v30, %v360_v36 }
 0x106   :  { %v423_v42 = vmul.f32 %v415_v33, %v359_v32  ;;  %v428_v50 = vpack.c.bf16 %v422_v24, %v418_v47 }
 0x107   :  { %v425_v34 = vmul.f32 %v417_v40, %v361_v39  ;;  %v430_v35 = vpack.c.bf16 %v424_v43, %v420_v49 }
 0x108   :  { %v429_v48 = vpack.c.bf16 %v423_v42, %v419_v41 }
 0x109   :  { %v431_v44 = vpack.c.bf16 %v425_v34, %v421_v46 }
 0x10a   :  { %720 = vmatprep.mubr.bf16.mxu0 %v429_v48 }
 0x10b   :  { %761 = vmatprep.mubr.bf16.mxu1 %v431_v44  ;;  %721 = vmatmul.mubr.bf16.vlgmr.msra.gmra.mxu0 %v428_v50 }
 0x10c   :  { %762 = vmatmul.mubr.bf16.vlgmr.msra.gmra.mxu1 %v430_v35 }
 0x1cb   :  { %v944_v25 = vpop.f32.mrf.mxu0 }
 0x1cc   :  { %v966_v45 = vpop.f32.mrf.mxu1 }
 0x1cd   :  { %v945_v51 = vpop.f32.mrf.mxu0 }
 0x1ce   :  { %v946_v52 = vadd.f32 %v945_v51, %v944_v25  ;;  %v967_v53 = vpop.f32.mrf.mxu1 }
 0x1cf   :  { %v968_v54 = vadd.f32 %v967_v53, %v966_v45  ;;  %v947_v19 = vpop.f32.mrf.mxu0 }
 0x1d0   :  { %v969_v55 = vpop.f32.mrf.mxu1 }
 0x1d1   :  { %v764_v57 = vadd.f32 %v968_v54, %v946_v52  ;;  %v948_v58 = vpop.f32.mrf.mxu0 }
 0x1d2   :  { %v949_v59 = vadd.f32 %v948_v58, %v947_v19  ;;  %v970_v60 = vpop.f32.mrf.mxu1 }
 0x1d3   :  { %v971_v61 = vadd.f32 %v970_v60, %v969_v55  ;;  %v786_v62 = vadd.f32 %v918_v56, %v764_v57 }
 0x1d5   :  { %v767_v63 = vadd.f32 %v971_v61, %v949_v59  ;;  %v790_v0 = vadd.f32 %v786_v62, %v1224_v27 }
 0x1d7   :  { %792 = vadd.xlane.f32.xlu0 %v790_v0  ;;  %v787_v1 = vadd.f32 %v918_v56, %v767_v63 }
 0x1d9   :  { %v791_v2 = vadd.f32 %v787_v1, %v1229_v28 }
 0x1db   :  { %794 = vadd.xlane.f32.xlu0 %v791_v2 }
 0x260   :  { %v793_v3 = vpop.xlane.xlu0 %792 }
 0x261   :  { %v797_v4 = vmul.f32 0.0078125, %v793_v3 }
 0x263   :  { %v799_v5 = vsub.f32 %v790_v0, %v797_v4 }
 0x264   :  { %v795_v6 = vpop.xlane.xlu0 %794 }
 0x265   :  { %v798_v7 = vmul.f32 0.0078125, %v795_v6  ;;  %v801_v8 = vmul.f32 %v799_v5, %v799_v5 }
 0x267   :  { %v800_v9 = vsub.f32 %v791_v2, %v798_v7  ;;  %803 = vadd.xlane.f32.xlu1 %v801_v8 }
 0x269   :  { %v802_v10 = vmul.f32 %v800_v9, %v800_v9 }
 0x26b   :  { %805 = vadd.xlane.f32.xlu1 %v802_v10 }
 0x2f0   :  { %v804_v11 = vpop.xlane.xlu1 %803 }
 0x2f1   :  { %v807_v12 = vmul.f32 0.0078125, %v804_v11 }
 0x2f3   :  { %v809_v13 = vadd.f32 1e-12, %v807_v12 }
 0x2f4   :  { %v806_v14 = vpop.xlane.xlu1 %805 }
 0x2f5   :  { %1073 = vrsqrt.f32 %v809_v13  ;;  %v808_v27 = vmul.f32 0.0078125, %v806_v14 }
 0x2f7   :  { %v810_v15 = vadd.f32 1e-12, %v808_v27 }
 0x2f9   :  { %1075 = vrsqrt.f32 %v810_v15 }
 0x302   :  { %v1074_v28 = vpop.eup %1073 }
 0x303   :  { %v813_v17 = vmul.f32 %v1074_v28, %v799_v5 }
 0x305   :  { %v822_v21 = vmul.f32 %v919_v16, %v813_v17 }
 0x306   :  { %v1076_v22 = vpop.eup %1075 }
 0x307   :  { %v814_v23 = vmul.f32 %v1076_v22, %v800_v9  ;;  %v831_v26 = vadd.f32 %v920_v20, %v822_v21 }
 0x309   :  { %v823_v29 = vmul.f32 %v919_v16, %v814_v23  ;;  %833 = vst [vmem:[#allocation4] sm:$0xff] %v831_v26 }
 0x30b   :  { %v832_v30 = vadd.f32 %v920_v20, %v823_v29 }
 0x30d   :  { %834 = vst [vmem:[#allocation4 + $0x8] sm:$0xff] %v832_v30 }
 0x30e   :  { %1088 = shalt.err (!%p1085_p4)
}
 0x30f   :  { %s1101_s5 = smov 128   ;;  %s1102_s6 = smov 8  }
 0x310   :  { %846 = dma.vmem_to_hbm [thread:$0]  %s841_s18, 256, %s1399_s7, [#allocation5], %s1101_s5, %s1101_s5, %s1102_s6  }
 0x311   :  { %1097 = dma.done.wait [#allocation5], 256  }
 0x312   :  { %1098 = vsyncadd [#allocation5], 4294967040 }
 0x313   :  { %850 = vsyncpa [#allocation5], 1 }

</bundles_post_ra>
